<compile_context>
chip_gen: v5e
topology: v5e:2x2
jax: 0.10.0
libtpu: 0.0.40
codegen_flags: <defaults>
</compile_context>

<pallas_src>
import math

import jax
import jax.numpy as jnp
from jax.experimental import pallas as pl
from jax.experimental.pallas import tpu as pltpu


# ------------------------------- fused forward kernel -------------------------------
def _pet_fused_kernel(x_ref, w_ref, out_ref, gx_scr, h_scr):
    B, T, D = x_ref.shape
    H8 = w_ref.shape[1]
    H = H8 // 8
    H2 = 2 * H
    f32 = jnp.float32

    # Row offsets inside the packed weight slab (must match init_params).
    sec0 = ((D + 7) // 8) * 8
    R_B0, R_B1, R_CONV = sec0, sec0 + 1, sec0 + 2
    R_WHH0 = sec0 + 8
    R_WIH1 = R_WHH0 + H2
    R_WHH1 = R_WIH1 + H2

    # ---- hoisted lane constants (gate-major, direction-minor column layout) ----
    # columns: [i_f i_b | f_f f_b | g_f g_b | o_f o_b], each block H lanes wide.
    lane = jax.lax.broadcasted_iota(jnp.int32, (B, H8), 1)
    is_g = (lane >= 4 * H) & (lane < 6 * H)          # g-gate block (tanh)
    s_pre = jnp.where(is_g, 1.0, 0.5)                # sigmoid(x) = 0.5*tanh(0.5x)+0.5
    a_post = s_pre                                   # (same values: 1 on g, 0.5 on i/f/o)
    b_post = jnp.where(is_g, 0.0, 0.5)
    fwd_lane = (lane % H2) < H                       # forward-direction lanes

    def cell(gates, c):
        # ONE full-vreg transcendental: tanh on g-lanes, sigmoid (via tanh) on i/f/o lanes.
        act = a_post * jnp.tanh(s_pre * gates) + b_post
        i = act[:, 0:H2]
        f = act[:, H2:2 * H2]
        g = act[:, 2 * H2:3 * H2]
        o = act[:, 3 * H2:4 * H2]
        c_new = f * c + i * g                        # packed [fwd | bwd] cell state
        h_new = o * jnp.tanh(c_new)                  # packed [fwd | bwd] hidden state
        return h_new, c_new

    def recurrence(whh):
        # gx_scr holds time-major input projections (T*B, 8H); h_scr receives the
        # time-aligned [h_fwd(t) | h_bwd(t)] outputs (T*B, 2H).
        h = jnp.zeros((B, H2), f32)
        c = jnp.zeros((B, H2), f32)
        for s in range(T):                           # fully unrolled; T is small & static
            tf, tb = s, T - 1 - s
            gx_f = gx_scr[pl.ds(tf * B, B), :]       # fwd gates use timestep tf
            gx_b = gx_scr[pl.ds(tb * B, B), :]       # bwd gates use timestep tb
            gates = jnp.where(fwd_lane, gx_f, gx_b) + jnp.dot(
                h, whh, preferred_element_type=f32)  # one matmul for BOTH directions
            h, c = cell(gates, c)
            h_scr[pl.ds(tf * B, B), 0:H] = h[:, 0:H]
            h_scr[pl.ds(tb * B, B), H:H2] = h[:, H:H2]

    # ---- layer 0 input projection (prologue, off the serial recurrence) ----
    wih0 = w_ref[pl.ds(0, D), :]                     # (D, 8H)
    b0 = w_ref[pl.ds(R_B0, 1), :]                    # (1, 8H)
    for t in range(T):
        gx_scr[pl.ds(t * B, B), :] = (
            jnp.dot(x_ref[:, t, :], wih0, preferred_element_type=f32) + b0)

    # ---- layer 0 recurrence (fwd + rev fused per step) ----
    recurrence(w_ref[pl.ds(R_WHH0, H2), :])          # (2H, 8H) block-structured

    # ---- layer 1 input projection: ONE batched matmul over all timesteps ----
    wih1 = w_ref[pl.ds(R_WIH1, H2), :]               # (2H, 8H)
    b1 = w_ref[pl.ds(R_B1, 1), :]                    # (1, 8H)
    gx_scr[...] = jnp.dot(h_scr[...], wih1, preferred_element_type=f32) + b1

    # ---- layer 1 recurrence ----
    recurrence(w_ref[pl.ds(R_WHH1, H2), :])

    # ---- head: dropout(p=0) -> ReLU -> Conv2d(1,1,(1,2H)) -> +bias -> clamp ----
    conv_row = w_ref[pl.ds(R_CONV, 1), :]            # (1, 8H)
    cw = conv_row[:, 0:H2]                           # (1, 2H) conv weights ([fwd|bwd])
    cb = conv_row[:, H2:H2 + 1]                      # (1, 1)  conv bias
    cols = []
    for t in range(T):
        ht = h_scr[pl.ds(t * B, B), :]               # (B, 2H) layer-1 output at time t
        cols.append(jnp.sum(jnp.maximum(ht, 0.0) * cw, axis=1, keepdims=True))
    out_ref[...] = jnp.clip(jnp.concatenate(cols, axis=1) + cb, 0.0, 1.0)


# --------------------------------- python wrapper ------------------------------------
def pet_tracker_forward(x_btd, w_slab):
    """x_btd: (B, T, input_dim) == pad_sequence(in_list, batch_first=True) -> (B, T)."""
    B, T, _ = x_btd.shape
    H8 = w_slab.shape[1]
    H = H8 // 8
    vmem = pl.BlockSpec(memory_space=pltpu.MemorySpace.VMEM)
    return pl.pallas_call(
        _pet_fused_kernel,
        out_shape=jax.ShapeDtypeStruct((B, T), jnp.float32),
        in_specs=[vmem, vmem],
        out_specs=vmem,
        scratch_shapes=[
            pltpu.VMEM((T * B, H8), jnp.float32),    # gx: time-major input projections
            pltpu.VMEM((T * B, 2 * H), jnp.float32), # h : time-aligned [fwd|bwd] outputs
        ],
    )(x_btd, w_slab)


# ------------------------------ deterministic params --------------------------------
def init_params(key, input_dim, hidden_size):
    """Builds the single packed weight slab (rows, 8H) used by the kernel.

    Column layout (8H): gate-major, direction-minor: [i_f i_b | f_f f_b | g_f g_b | o_f o_b].
    Row layout:
      [0, D)              wih0 (input projection, layer 0)
      sec0                b0  (= b_ih + b_hh, both directions)
      sec0+1              b1
      sec0+2              conv row: [conv_w (2H) | conv_b | 0...]
      [sec0+8,  +2H)      whh0 (block-structured recurrent matrix, layer 0)
      [.. +2H,  +4H)      wih1 (input projection, layer 1; rows ordered [fwd feats | bwd feats])
      [.. +4H,  +6H)      whh1
    """
    H = hidden_size
    D = input_dim
    k = 1.0 / math.sqrt(H)                      # PyTorch nn.LSTM init: U(-1/sqrt(H), 1/sqrt(H))

    def lstm_dir(kk, d_in):
        k1, k2, k3, k4 = jax.random.split(kk, 4)
        w_ih = jax.random.uniform(k1, (4 * H, d_in), jnp.float32, -k, k)
        w_hh = jax.random.uniform(k2, (4 * H, H), jnp.float32, -k, k)
        b_ih = jax.random.uniform(k3, (4 * H,), jnp.float32, -k, k)
        b_hh = jax.random.uniform(k4, (4 * H,), jnp.float32, -k, k)
        return w_ih.T, w_hh.T, (b_ih + b_hh)[None, :]   # (d_in,4H), (H,4H), (1,4H)

    def interleave(wf, wb):
        # (rows, 4H) fwd + (rows, 4H) bwd -> (rows, 8H) gate-major / direction-minor.
        blocks = []
        for q in range(4):                      # PyTorch gate order i, f, g, o
            blocks.append(wf[:, q * H:(q + 1) * H])
            blocks.append(wb[:, q * H:(q + 1) * H])
        return jnp.concatenate(blocks, axis=1)

    def packed_whh(whh_f, whh_r):
        # (H,4H)x2 -> (2H,8H): rows 0:H (from h_fwd) feed only fwd-gate columns,
        # rows H:2H (from h_bwd) feed only bwd-gate columns.
        z = jnp.zeros((H, 4 * H), jnp.float32)
        return interleave(jnp.concatenate([whh_f, z], axis=0),
                          jnp.concatenate([z, whh_r], axis=0))

    keys = jax.random.split(key, 6)
    wih0f, whh0f, b0f = lstm_dir(keys[0], D)            # layer 0 forward
    wih0r, whh0r, b0r = lstm_dir(keys[1], D)            # layer 0 reverse
    wih1f, whh1f, b1f = lstm_dir(keys[2], 2 * H)        # layer 1 forward
    wih1r, whh1r, b1r = lstm_dir(keys[3], 2 * H)        # layer 1 reverse

    kc = 1.0 / math.sqrt(2 * H)                 # Conv2d(1,1,(1,2H)): fan_in = 2H
    conv_w = jax.random.uniform(keys[4], (2 * H,), jnp.float32, -kc, kc)
    conv_b = jax.random.uniform(keys[5], (1,), jnp.float32, -kc, kc)

    sec0 = ((D + 7) // 8) * 8
    rows = sec0 + 8 + 6 * H
    conv_row = jnp.zeros((8 * H,), jnp.float32).at[0:2 * H].set(conv_w).at[2 * H].set(conv_b[0])

    W = jnp.zeros((rows, 8 * H), jnp.float32)
    W = W.at[0:D].set(interleave(wih0f, wih0r))
    W = W.at[sec0].set(interleave(b0f, b0r)[0])
    W = W.at[sec0 + 1].set(interleave(b1f, b1r)[0])
    W = W.at[sec0 + 2].set(conv_row)
    W = W.at[sec0 + 8:sec0 + 8 + 2 * H].set(packed_whh(whh0f, whh0r))
    W = W.at[sec0 + 8 + 2 * H:sec0 + 8 + 4 * H].set(interleave(wih1f, wih1r))
    W = W.at[sec0 + 8 + 4 * H:sec0 + 8 + 6 * H].set(packed_whh(whh1f, whh1r))
    return W


if __name__ == "__main__":
    B, T, INPUT_DIM, HIDDEN = 2, 8, 6, 32        # batch=2, seq=8, input_dim=6, hidden=32
    key = jax.random.PRNGKey(0)
    key, kp, kx = jax.random.split(key, 3)
    w_slab = init_params(kp, INPUT_DIM, HIDDEN)
    # equal-length sequences -> pad_sequence is just a stack of the in_list tensors
    x = jax.random.normal(kx, (B, T, INPUT_DIM), dtype=jnp.float32)

    out = jax.jit(pet_tracker_forward)(x, w_slab)
    out = jax.block_until_ready(out)
    assert out.shape == (B, T), out.shape
    assert bool(jnp.all(out >= 0.0)) and bool(jnp.all(out <= 1.0))
    print("KERNEL_OK")
</pallas_src>

<mosaic_0001>
module attributes {stable_mosaic.version = 11 : i64} {
  func.func @_pet_fused_kernel(%arg0: memref<2x8x6xf32, #tpu.memory_space<vmem>>, %arg1: memref<208x256xf32, #tpu.memory_space<vmem>>, %arg2: memref<2x8xf32, #tpu.memory_space<vmem>>, %arg3: memref<16x256xf32, #tpu.memory_space<vmem>>, %arg4: memref<16x64xf32, #tpu.memory_space<vmem>>) attributes {dimension_semantics = [], scalar_prefetch = 0 : i64, scratch_operands = 2 : i64, tpu.core_type = #tpu.core_type<tc>} {
    %0 = tpu.iota {dimensions = array<i32: 1>} : vector<2x256xi32>
    %c128_i32 = arith.constant 128 : i32
    %1 = vector.broadcast %c128_i32 : i32 to vector<2x256xi32>
    %2 = arith.cmpi sge, %0, %1 : vector<2x256xi32>
    %c192_i32 = arith.constant 192 : i32
    %3 = vector.broadcast %c192_i32 : i32 to vector<2x256xi32>
    %4 = arith.cmpi slt, %0, %3 : vector<2x256xi32>
    %5 = arith.andi %2, %4 : vector<2x256xi1>
    %cst = arith.constant 1.000000e+00 : f32
    %cst_0 = arith.constant 5.000000e-01 : f32
    %6 = vector.broadcast %cst : f32 to vector<2x256xf32>
    %7 = vector.broadcast %cst_0 : f32 to vector<2x256xf32>
    %8 = arith.select %5, %6, %7 : vector<2x256xi1>, vector<2x256xf32>
    %cst_1 = arith.constant 0.000000e+00 : f32
    %cst_2 = arith.constant 5.000000e-01 : f32
    %9 = vector.broadcast %cst_1 : f32 to vector<2x256xf32>
    %10 = vector.broadcast %cst_2 : f32 to vector<2x256xf32>
    %11 = arith.select %5, %9, %10 : vector<2x256xi1>, vector<2x256xf32>
    %c64_i32 = arith.constant 64 : i32
    %c0_i32 = arith.constant 0 : i32
    %12 = arith.cmpi eq, %c64_i32, %c0_i32 : i32
    %c1_i32 = arith.constant 1 : i32
    %13 = arith.select %12, %c1_i32, %c64_i32 : i32
    %14 = vector.broadcast %13 : i32 to vector<2x256xi32>
    %15 = arith.remsi %0, %14 : vector<2x256xi32>
    %c0_i32_3 = arith.constant 0 : i32
    %16 = vector.broadcast %c0_i32_3 : i32 to vector<2x256xi32>
    %17 = arith.cmpi ne, %15, %16 : vector<2x256xi32>
    %c0_i32_4 = arith.constant 0 : i32
    %18 = vector.broadcast %c0_i32_4 : i32 to vector<2x256xi32>
    %19 = arith.cmpi slt, %15, %18 : vector<2x256xi32>
    %c0_i32_5 = arith.constant 0 : i32
    %20 = arith.cmpi slt, %13, %c0_i32_5 : i32
    %21 = vector.broadcast %20 : i1 to vector<2x256xi1>
    %22 = vector.broadcast %21 : vector<2x256xi1> to vector<2x256xi1>
    %23 = arith.xori %19, %22 : vector<2x256xi1>
    %24 = arith.andi %23, %17 : vector<2x256xi1>
    %25 = vector.broadcast %13 : i32 to vector<2x256xi32>
    %26 = arith.addi %15, %25 : vector<2x256xi32>
    %27 = arith.select %24, %26, %15 : vector<2x256xi1>, vector<2x256xi32>
    %c32_i32 = arith.constant 32 : i32
    %28 = vector.broadcast %c32_i32 : i32 to vector<2x256xi32>
    %29 = arith.cmpi slt, %27, %28 : vector<2x256xi32>
    %c0 = arith.constant 0 : index
    %c0_6 = arith.constant 0 : index
    %30 = vector.load %arg1[%c0, %c0_6] : memref<208x256xf32, #tpu.memory_space<vmem>>, vector<6x256xf32>
    %c8 = arith.constant 8 : index
    %c0_7 = arith.constant 0 : index
    %31 = vector.load %arg1[%c8, %c0_7] : memref<208x256xf32, #tpu.memory_space<vmem>>, vector<1x256xf32>
    %c0_8 = arith.constant 0 : index
    %c0_9 = arith.constant 0 : index
    %c0_10 = arith.constant 0 : index
    %32 = vector.load %arg0[%c0_8, %c0_9, %c0_10] : memref<2x8x6xf32, #tpu.memory_space<vmem>>, vector<2x1x6xf32>
    %33 = vector.shape_cast %32 : vector<2x1x6xf32> to vector<2x6xf32>
    %cst_11 = arith.constant dense<0.000000e+00> : vector<2x256xf32>
    %34 = tpu.matmul %33, %30, %cst_11 {dimension_numbers = #tpu.dot_dimension_numbers<[1], [0], [0], [1], [0, 0, 1, 1], [], []>} : vector<2x6xf32>, vector<6x256xf32>, vector<2x256xf32> -> vector<2x256xf32>
    %35 = vector.broadcast %31 : vector<1x256xf32> to vector<2x256xf32>
    %36 = arith.addf %34, %35 : vector<2x256xf32>
    %c0_12 = arith.constant 0 : index
    %c0_13 = arith.constant 0 : index
    %37 = vector.load %arg3[%c0_12, %c0_13] : memref<16x256xf32, #tpu.memory_space<vmem>>, vector<2x256xf32>
    tpu.vector_store %arg3[%c0_12, %c0_13], %36 {strides = array<i32>} : memref<16x256xf32, #tpu.memory_space<vmem>>, vector<2x256xf32>,
    %c0_14 = arith.constant 0 : index
    %c1 = arith.constant 1 : index
    %c0_15 = arith.constant 0 : index
    %38 = vector.load %arg0[%c0_14, %c1, %c0_15] : memref<2x8x6xf32, #tpu.memory_space<vmem>>, vector<2x1x6xf32>
    %39 = vector.shape_cast %38 : vector<2x1x6xf32> to vector<2x6xf32>
    %cst_16 = arith.constant dense<0.000000e+00> : vector<2x256xf32>
    %40 = tpu.matmul %39, %30, %cst_16 {dimension_numbers = #tpu.dot_dimension_numbers<[1], [0], [0], [1], [0, 0, 1, 1], [], []>} : vector<2x6xf32>, vector<6x256xf32>, vector<2x256xf32> -> vector<2x256xf32>
    %41 = vector.broadcast %31 : vector<1x256xf32> to vector<2x256xf32>
    %42 = arith.addf %40, %41 : vector<2x256xf32>
    %c2 = arith.constant 2 : index
    %c0_17 = arith.constant 0 : index
    %43 = vector.load %arg3[%c2, %c0_17] : memref<16x256xf32, #tpu.memory_space<vmem>>, vector<2x256xf32>
    tpu.vector_store %arg3[%c2, %c0_17], %42 {strides = array<i32>} : memref<16x256xf32, #tpu.memory_space<vmem>>, vector<2x256xf32>,
    %c0_18 = arith.constant 0 : index
    %c2_19 = arith.constant 2 : index
    %c0_20 = arith.constant 0 : index
    %44 = vector.load %arg0[%c0_18, %c2_19, %c0_20] : memref<2x8x6xf32, #tpu.memory_space<vmem>>, vector<2x1x6xf32>
    %45 = vector.shape_cast %44 : vector<2x1x6xf32> to vector<2x6xf32>
    %cst_21 = arith.constant dense<0.000000e+00> : vector<2x256xf32>
    %46 = tpu.matmul %45, %30, %cst_21 {dimension_numbers = #tpu.dot_dimension_numbers<[1], [0], [0], [1], [0, 0, 1, 1], [], []>} : vector<2x6xf32>, vector<6x256xf32>, vector<2x256xf32> -> vector<2x256xf32>
    %47 = vector.broadcast %31 : vector<1x256xf32> to vector<2x256xf32>
    %48 = arith.addf %46, %47 : vector<2x256xf32>
    %c4 = arith.constant 4 : index
    %c0_22 = arith.constant 0 : index
    %49 = vector.load %arg3[%c4, %c0_22] : memref<16x256xf32, #tpu.memory_space<vmem>>, vector<2x256xf32>
    tpu.vector_store %arg3[%c4, %c0_22], %48 {strides = array<i32>} : memref<16x256xf32, #tpu.memory_space<vmem>>, vector<2x256xf32>,
    %c0_23 = arith.constant 0 : index
    %c3 = arith.constant 3 : index
    %c0_24 = arith.constant 0 : index
    %50 = vector.load %arg0[%c0_23, %c3, %c0_24] : memref<2x8x6xf32, #tpu.memory_space<vmem>>, vector<2x1x6xf32>
    %51 = vector.shape_cast %50 : vector<2x1x6xf32> to vector<2x6xf32>
    %cst_25 = arith.constant dense<0.000000e+00> : vector<2x256xf32>
    %52 = tpu.matmul %51, %30, %cst_25 {dimension_numbers = #tpu.dot_dimension_numbers<[1], [0], [0], [1], [0, 0, 1, 1], [], []>} : vector<2x6xf32>, vector<6x256xf32>, vector<2x256xf32> -> vector<2x256xf32>
    %53 = vector.broadcast %31 : vector<1x256xf32> to vector<2x256xf32>
    %54 = arith.addf %52, %53 : vector<2x256xf32>
    %c6 = arith.constant 6 : index
    %c0_26 = arith.constant 0 : index
    %55 = vector.load %arg3[%c6, %c0_26] : memref<16x256xf32, #tpu.memory_space<vmem>>, vector<2x256xf32>
    tpu.vector_store %arg3[%c6, %c0_26], %54 {strides = array<i32>} : memref<16x256xf32, #tpu.memory_space<vmem>>, vector<2x256xf32>,
    %c0_27 = arith.constant 0 : index
    %c4_28 = arith.constant 4 : index
    %c0_29 = arith.constant 0 : index
    %56 = vector.load %arg0[%c0_27, %c4_28, %c0_29] : memref<2x8x6xf32, #tpu.memory_space<vmem>>, vector<2x1x6xf32>
    %57 = vector.shape_cast %56 : vector<2x1x6xf32> to vector<2x6xf32>
    %cst_30 = arith.constant dense<0.000000e+00> : vector<2x256xf32>
    %58 = tpu.matmul %57, %30, %cst_30 {dimension_numbers = #tpu.dot_dimension_numbers<[1], [0], [0], [1], [0, 0, 1, 1], [], []>} : vector<2x6xf32>, vector<6x256xf32>, vector<2x256xf32> -> vector<2x256xf32>
    %59 = vector.broadcast %31 : vector<1x256xf32> to vector<2x256xf32>
    %60 = arith.addf %58, %59 : vector<2x256xf32>
    %c8_31 = arith.constant 8 : index
    %c0_32 = arith.constant 0 : index
    %61 = vector.load %arg3[%c8_31, %c0_32] : memref<16x256xf32, #tpu.memory_space<vmem>>, vector<2x256xf32>
    tpu.vector_store %arg3[%c8_31, %c0_32], %60 {strides = array<i32>} : memref<16x256xf32, #tpu.memory_space<vmem>>, vector<2x256xf32>,
    %c0_33 = arith.constant 0 : index
    %c5 = arith.constant 5 : index
    %c0_34 = arith.constant 0 : index
    %62 = vector.load %arg0[%c0_33, %c5, %c0_34] : memref<2x8x6xf32, #tpu.memory_space<vmem>>, vector<2x1x6xf32>
    %63 = vector.shape_cast %62 : vector<2x1x6xf32> to vector<2x6xf32>
    %cst_35 = arith.constant dense<0.000000e+00> : vector<2x256xf32>
    %64 = tpu.matmul %63, %30, %cst_35 {dimension_numbers = #tpu.dot_dimension_numbers<[1], [0], [0], [1], [0, 0, 1, 1], [], []>} : vector<2x6xf32>, vector<6x256xf32>, vector<2x256xf32> -> vector<2x256xf32>
    %65 = vector.broadcast %31 : vector<1x256xf32> to vector<2x256xf32>
    %66 = arith.addf %64, %65 : vector<2x256xf32>
    %c10 = arith.constant 10 : index
    %c0_36 = arith.constant 0 : index
    %67 = vector.load %arg3[%c10, %c0_36] : memref<16x256xf32, #tpu.memory_space<vmem>>, vector<2x256xf32>
    tpu.vector_store %arg3[%c10, %c0_36], %66 {strides = array<i32>} : memref<16x256xf32, #tpu.memory_space<vmem>>, vector<2x256xf32>,
    %c0_37 = arith.constant 0 : index
    %c6_38 = arith.constant 6 : index
    %c0_39 = arith.constant 0 : index
    %68 = vector.load %arg0[%c0_37, %c6_38, %c0_39] : memref<2x8x6xf32, #tpu.memory_space<vmem>>, vector<2x1x6xf32>
    %69 = vector.shape_cast %68 : vector<2x1x6xf32> to vector<2x6xf32>
    %cst_40 = arith.constant dense<0.000000e+00> : vector<2x256xf32>
    %70 = tpu.matmul %69, %30, %cst_40 {dimension_numbers = #tpu.dot_dimension_numbers<[1], [0], [0], [1], [0, 0, 1, 1], [], []>} : vector<2x6xf32>, vector<6x256xf32>, vector<2x256xf32> -> vector<2x256xf32>
    %71 = vector.broadcast %31 : vector<1x256xf32> to vector<2x256xf32>
    %72 = arith.addf %70, %71 : vector<2x256xf32>
    %c12 = arith.constant 12 : index
    %c0_41 = arith.constant 0 : index
    %73 = vector.load %arg3[%c12, %c0_41] : memref<16x256xf32, #tpu.memory_space<vmem>>, vector<2x256xf32>
    tpu.vector_store %arg3[%c12, %c0_41], %72 {strides = array<i32>} : memref<16x256xf32, #tpu.memory_space<vmem>>, vector<2x256xf32>,
    %c0_42 = arith.constant 0 : index
    %c7 = arith.constant 7 : index
    %c0_43 = arith.constant 0 : index
    %74 = vector.load %arg0[%c0_42, %c7, %c0_43] : memref<2x8x6xf32, #tpu.memory_space<vmem>>, vector<2x1x6xf32>
    %75 = vector.shape_cast %74 : vector<2x1x6xf32> to vector<2x6xf32>
    %cst_44 = arith.constant dense<0.000000e+00> : vector<2x256xf32>
    %76 = tpu.matmul %75, %30, %cst_44 {dimension_numbers = #tpu.dot_dimension_numbers<[1], [0], [0], [1], [0, 0, 1, 1], [], []>} : vector<2x6xf32>, vector<6x256xf32>, vector<2x256xf32> -> vector<2x256xf32>
    %77 = vector.broadcast %31 : vector<1x256xf32> to vector<2x256xf32>
    %78 = arith.addf %76, %77 : vector<2x256xf32>
    %c14 = arith.constant 14 : index
    %c0_45 = arith.constant 0 : index
    %79 = vector.load %arg3[%c14, %c0_45] : memref<16x256xf32, #tpu.memory_space<vmem>>, vector<2x256xf32>
    tpu.vector_store %arg3[%c14, %c0_45], %78 {strides = array<i32>} : memref<16x256xf32, #tpu.memory_space<vmem>>, vector<2x256xf32>,
    %c16 = arith.constant 16 : index
    %c0_46 = arith.constant 0 : index
    %80 = vector.load %arg1[%c16, %c0_46] : memref<208x256xf32, #tpu.memory_space<vmem>>, vector<64x256xf32>
    %cst_47 = arith.constant 0.000000e+00 : f32
    %81 = vector.broadcast %cst_47 : f32 to vector<2x64xf32>
    %cst_48 = arith.constant 0.000000e+00 : f32
    %82 = vector.broadcast %cst_48 : f32 to vector<2x64xf32>
    %c0_49 = arith.constant 0 : index
    %c0_50 = arith.constant 0 : index
    %83 = vector.load %arg3[%c0_49, %c0_50] : memref<16x256xf32, #tpu.memory_space<vmem>>, vector<2x256xf32>
    %c14_51 = arith.constant 14 : index
    %c0_52 = arith.constant 0 : index
    %84 = vector.load %arg3[%c14_51, %c0_52] : memref<16x256xf32, #tpu.memory_space<vmem>>, vector<2x256xf32>
    %85 = arith.select %29, %83, %84 : vector<2x256xi1>, vector<2x256xf32>
    %cst_53 = arith.constant dense<0.000000e+00> : vector<2x256xf32>
    %86 = tpu.matmul %81, %80, %cst_53 {dimension_numbers = #tpu.dot_dimension_numbers<[1], [0], [0], [1], [0, 0, 1, 1], [], []>} : vector<2x64xf32>, vector<64x256xf32>, vector<2x256xf32> -> vector<2x256xf32>
    %87 = arith.addf %85, %86 : vector<2x256xf32>
    %88 = arith.mulf %8, %87 : vector<2x256xf32>
    %89 = math.tanh %88 : vector<2x256xf32>
    %90 = arith.mulf %8, %89 : vector<2x256xf32>
    %91 = arith.addf %90, %11 : vector<2x256xf32>
    %92 = vector.extract_strided_slice %91 {offsets = [0, 0], sizes = [2, 64], strides = [1, 1]} : vector<2x256xf32> to vector<2x64xf32>
    %93 = vector.extract_strided_slice %91 {offsets = [0, 64], sizes = [2, 64], strides = [1, 1]} : vector<2x256xf32> to vector<2x64xf32>
    %94 = vector.extract_strided_slice %91 {offsets = [0, 128], sizes = [2, 64], strides = [1, 1]} : vector<2x256xf32> to vector<2x64xf32>
    %95 = vector.extract_strided_slice %91 {offsets = [0, 192], sizes = [2, 64], strides = [1, 1]} : vector<2x256xf32> to vector<2x64xf32>
    %96 = arith.mulf %93, %82 : vector<2x64xf32>
    %97 = arith.mulf %92, %94 : vector<2x64xf32>
    %98 = arith.addf %96, %97 : vector<2x64xf32>
    %99 = math.tanh %98 : vector<2x64xf32>
    %100 = arith.mulf %95, %99 : vector<2x64xf32>
    %101 = vector.extract_strided_slice %100 {offsets = [0, 0], sizes = [2, 32], strides = [1, 1]} : vector<2x64xf32> to vector<2x32xf32>
    %c0_54 = arith.constant 0 : index
    %c0_55 = arith.constant 0 : index
    %102 = vector.load %arg4[%c0_54, %c0_55] : memref<16x64xf32, #tpu.memory_space<vmem>>, vector<2x32xf32>
    tpu.vector_store %arg4[%c0_54, %c0_55], %101 {strides = array<i32>} : memref<16x64xf32, #tpu.memory_space<vmem>>, vector<2x32xf32>,
    %103 = vector.extract_strided_slice %100 {offsets = [0, 32], sizes = [2, 32], strides = [1, 1]} : vector<2x64xf32> to vector<2x32xf32>
    %c14_56 = arith.constant 14 : index
    %c32 = arith.constant 32 : index
    %104 = vector.load %arg4[%c14_56, %c32] : memref<16x64xf32, #tpu.memory_space<vmem>>, vector<2x32xf32>
    tpu.vector_store %arg4[%c14_56, %c32], %103 {strides = array<i32>} : memref<16x64xf32, #tpu.memory_space<vmem>>, vector<2x32xf32>,
    %c2_57 = arith.constant 2 : index
    %c0_58 = arith.constant 0 : index
    %105 = vector.load %arg3[%c2_57, %c0_58] : memref<16x256xf32, #tpu.memory_space<vmem>>, vector<2x256xf32>
    %c12_59 = arith.constant 12 : index
    %c0_60 = arith.constant 0 : index
    %106 = vector.load %arg3[%c12_59, %c0_60] : memref<16x256xf32, #tpu.memory_space<vmem>>, vector<2x256xf32>
    %107 = arith.select %29, %105, %106 : vector<2x256xi1>, vector<2x256xf32>
    %cst_61 = arith.constant dense<0.000000e+00> : vector<2x256xf32>
    %108 = tpu.matmul %100, %80, %cst_61 {dimension_numbers = #tpu.dot_dimension_numbers<[1], [0], [0], [1], [0, 0, 1, 1], [], []>} : vector<2x64xf32>, vector<64x256xf32>, vector<2x256xf32> -> vector<2x256xf32>
    %109 = arith.addf %107, %108 : vector<2x256xf32>
    %110 = arith.mulf %8, %109 : vector<2x256xf32>
    %111 = math.tanh %110 : vector<2x256xf32>
    %112 = arith.mulf %8, %111 : vector<2x256xf32>
    %113 = arith.addf %112, %11 : vector<2x256xf32>
    %114 = vector.extract_strided_slice %113 {offsets = [0, 0], sizes = [2, 64], strides = [1, 1]} : vector<2x256xf32> to vector<2x64xf32>
    %115 = vector.extract_strided_slice %113 {offsets = [0, 64], sizes = [2, 64], strides = [1, 1]} : vector<2x256xf32> to vector<2x64xf32>
    %116 = vector.extract_strided_slice %113 {offsets = [0, 128], sizes = [2, 64], strides = [1, 1]} : vector<2x256xf32> to vector<2x64xf32>
    %117 = vector.extract_strided_slice %113 {offsets = [0, 192], sizes = [2, 64], strides = [1, 1]} : vector<2x256xf32> to vector<2x64xf32>
    %118 = arith.mulf %115, %98 : vector<2x64xf32>
    %119 = arith.mulf %114, %116 : vector<2x64xf32>
    %120 = arith.addf %118, %119 : vector<2x64xf32>
    %121 = math.tanh %120 : vector<2x64xf32>
    %122 = arith.mulf %117, %121 : vector<2x64xf32>
    %123 = vector.extract_strided_slice %122 {offsets = [0, 0], sizes = [2, 32], strides = [1, 1]} : vector<2x64xf32> to vector<2x32xf32>
    %c2_62 = arith.constant 2 : index
    %c0_63 = arith.constant 0 : index
    %124 = vector.load %arg4[%c2_62, %c0_63] : memref<16x64xf32, #tpu.memory_space<vmem>>, vector<2x32xf32>
    tpu.vector_store %arg4[%c2_62, %c0_63], %123 {strides = array<i32>} : memref<16x64xf32, #tpu.memory_space<vmem>>, vector<2x32xf32>,
    %125 = vector.extract_strided_slice %122 {offsets = [0, 32], sizes = [2, 32], strides = [1, 1]} : vector<2x64xf32> to vector<2x32xf32>
    %c12_64 = arith.constant 12 : index
    %c32_65 = arith.constant 32 : index
    %126 = vector.load %arg4[%c12_64, %c32_65] : memref<16x64xf32, #tpu.memory_space<vmem>>, vector<2x32xf32>
    tpu.vector_store %arg4[%c12_64, %c32_65], %125 {strides = array<i32>} : memref<16x64xf32, #tpu.memory_space<vmem>>, vector<2x32xf32>,
    %c4_66 = arith.constant 4 : index
    %c0_67 = arith.constant 0 : index
    %127 = vector.load %arg3[%c4_66, %c0_67] : memref<16x256xf32, #tpu.memory_space<vmem>>, vector<2x256xf32>
    %c10_68 = arith.constant 10 : index
    %c0_69 = arith.constant 0 : index
    %128 = vector.load %arg3[%c10_68, %c0_69] : memref<16x256xf32, #tpu.memory_space<vmem>>, vector<2x256xf32>
    %129 = arith.select %29, %127, %128 : vector<2x256xi1>, vector<2x256xf32>
    %cst_70 = arith.constant dense<0.000000e+00> : vector<2x256xf32>
    %130 = tpu.matmul %122, %80, %cst_70 {dimension_numbers = #tpu.dot_dimension_numbers<[1], [0], [0], [1], [0, 0, 1, 1], [], []>} : vector<2x64xf32>, vector<64x256xf32>, vector<2x256xf32> -> vector<2x256xf32>
    %131 = arith.addf %129, %130 : vector<2x256xf32>
    %132 = arith.mulf %8, %131 : vector<2x256xf32>
    %133 = math.tanh %132 : vector<2x256xf32>
    %134 = arith.mulf %8, %133 : vector<2x256xf32>
    %135 = arith.addf %134, %11 : vector<2x256xf32>
    %136 = vector.extract_strided_slice %135 {offsets = [0, 0], sizes = [2, 64], strides = [1, 1]} : vector<2x256xf32> to vector<2x64xf32>
    %137 = vector.extract_strided_slice %135 {offsets = [0, 64], sizes = [2, 64], strides = [1, 1]} : vector<2x256xf32> to vector<2x64xf32>
    %138 = vector.extract_strided_slice %135 {offsets = [0, 128], sizes = [2, 64], strides = [1, 1]} : vector<2x256xf32> to vector<2x64xf32>
    %139 = vector.extract_strided_slice %135 {offsets = [0, 192], sizes = [2, 64], strides = [1, 1]} : vector<2x256xf32> to vector<2x64xf32>
    %140 = arith.mulf %137, %120 : vector<2x64xf32>
    %141 = arith.mulf %136, %138 : vector<2x64xf32>
    %142 = arith.addf %140, %141 : vector<2x64xf32>
    %143 = math.tanh %142 : vector<2x64xf32>
    %144 = arith.mulf %139, %143 : vector<2x64xf32>
    %145 = vector.extract_strided_slice %144 {offsets = [0, 0], sizes = [2, 32], strides = [1, 1]} : vector<2x64xf32> to vector<2x32xf32>
    %c4_71 = arith.constant 4 : index
    %c0_72 = arith.constant 0 : index
    %146 = vector.load %arg4[%c4_71, %c0_72] : memref<16x64xf32, #tpu.memory_space<vmem>>, vector<2x32xf32>
    tpu.vector_store %arg4[%c4_71, %c0_72], %145 {strides = array<i32>} : memref<16x64xf32, #tpu.memory_space<vmem>>, vector<2x32xf32>,
    %147 = vector.extract_strided_slice %144 {offsets = [0, 32], sizes = [2, 32], strides = [1, 1]} : vector<2x64xf32> to vector<2x32xf32>
    %c10_73 = arith.constant 10 : index
    %c32_74 = arith.constant 32 : index
    %148 = vector.load %arg4[%c10_73, %c32_74] : memref<16x64xf32, #tpu.memory_space<vmem>>, vector<2x32xf32>
    tpu.vector_store %arg4[%c10_73, %c32_74], %147 {strides = array<i32>} : memref<16x64xf32, #tpu.memory_space<vmem>>, vector<2x32xf32>,
    %c6_75 = arith.constant 6 : index
    %c0_76 = arith.constant 0 : index
    %149 = vector.load %arg3[%c6_75, %c0_76] : memref<16x256xf32, #tpu.memory_space<vmem>>, vector<2x256xf32>
    %c8_77 = arith.constant 8 : index
    %c0_78 = arith.constant 0 : index
    %150 = vector.load %arg3[%c8_77, %c0_78] : memref<16x256xf32, #tpu.memory_space<vmem>>, vector<2x256xf32>
    %151 = arith.select %29, %149, %150 : vector<2x256xi1>, vector<2x256xf32>
    %cst_79 = arith.constant dense<0.000000e+00> : vector<2x256xf32>
    %152 = tpu.matmul %144, %80, %cst_79 {dimension_numbers = #tpu.dot_dimension_numbers<[1], [0], [0], [1], [0, 0, 1, 1], [], []>} : vector<2x64xf32>, vector<64x256xf32>, vector<2x256xf32> -> vector<2x256xf32>
    %153 = arith.addf %151, %152 : vector<2x256xf32>
    %154 = arith.mulf %8, %153 : vector<2x256xf32>
    %155 = math.tanh %154 : vector<2x256xf32>
    %156 = arith.mulf %8, %155 : vector<2x256xf32>
    %157 = arith.addf %156, %11 : vector<2x256xf32>
    %158 = vector.extract_strided_slice %157 {offsets = [0, 0], sizes = [2, 64], strides = [1, 1]} : vector<2x256xf32> to vector<2x64xf32>
    %159 = vector.extract_strided_slice %157 {offsets = [0, 64], sizes = [2, 64], strides = [1, 1]} : vector<2x256xf32> to vector<2x64xf32>
    %160 = vector.extract_strided_slice %157 {offsets = [0, 128], sizes = [2, 64], strides = [1, 1]} : vector<2x256xf32> to vector<2x64xf32>
    %161 = vector.extract_strided_slice %157 {offsets = [0, 192], sizes = [2, 64], strides = [1, 1]} : vector<2x256xf32> to vector<2x64xf32>
    %162 = arith.mulf %159, %142 : vector<2x64xf32>
    %163 = arith.mulf %158, %160 : vector<2x64xf32>
    %164 = arith.addf %162, %163 : vector<2x64xf32>
    %165 = math.tanh %164 : vector<2x64xf32>
    %166 = arith.mulf %161, %165 : vector<2x64xf32>
    %167 = vector.extract_strided_slice %166 {offsets = [0, 0], sizes = [2, 32], strides = [1, 1]} : vector<2x64xf32> to vector<2x32xf32>
    %c6_80 = arith.constant 6 : index
    %c0_81 = arith.constant 0 : index
    %168 = vector.load %arg4[%c6_80, %c0_81] : memref<16x64xf32, #tpu.memory_space<vmem>>, vector<2x32xf32>
    tpu.vector_store %arg4[%c6_80, %c0_81], %167 {strides = array<i32>} : memref<16x64xf32, #tpu.memory_space<vmem>>, vector<2x32xf32>,
    %169 = vector.extract_strided_slice %166 {offsets = [0, 32], sizes = [2, 32], strides = [1, 1]} : vector<2x64xf32> to vector<2x32xf32>
    %c8_82 = arith.constant 8 : index
    %c32_83 = arith.constant 32 : index
    %170 = vector.load %arg4[%c8_82, %c32_83] : memref<16x64xf32, #tpu.memory_space<vmem>>, vector<2x32xf32>
    tpu.vector_store %arg4[%c8_82, %c32_83], %169 {strides = array<i32>} : memref<16x64xf32, #tpu.memory_space<vmem>>, vector<2x32xf32>,
    %c8_84 = arith.constant 8 : index
    %c0_85 = arith.constant 0 : index
    %171 = vector.load %arg3[%c8_84, %c0_85] : memref<16x256xf32, #tpu.memory_space<vmem>>, vector<2x256xf32>
    %c6_86 = arith.constant 6 : index
    %c0_87 = arith.constant 0 : index
    %172 = vector.load %arg3[%c6_86, %c0_87] : memref<16x256xf32, #tpu.memory_space<vmem>>, vector<2x256xf32>
    %173 = arith.select %29, %171, %172 : vector<2x256xi1>, vector<2x256xf32>
    %cst_88 = arith.constant dense<0.000000e+00> : vector<2x256xf32>
    %174 = tpu.matmul %166, %80, %cst_88 {dimension_numbers = #tpu.dot_dimension_numbers<[1], [0], [0], [1], [0, 0, 1, 1], [], []>} : vector<2x64xf32>, vector<64x256xf32>, vector<2x256xf32> -> vector<2x256xf32>
    %175 = arith.addf %173, %174 : vector<2x256xf32>
    %176 = arith.mulf %8, %175 : vector<2x256xf32>
    %177 = math.tanh %176 : vector<2x256xf32>
    %178 = arith.mulf %8, %177 : vector<2x256xf32>
    %179 = arith.addf %178, %11 : vector<2x256xf32>
    %180 = vector.extract_strided_slice %179 {offsets = [0, 0], sizes = [2, 64], strides = [1, 1]} : vector<2x256xf32> to vector<2x64xf32>
    %181 = vector.extract_strided_slice %179 {offsets = [0, 64], sizes = [2, 64], strides = [1, 1]} : vector<2x256xf32> to vector<2x64xf32>
    %182 = vector.extract_strided_slice %179 {offsets = [0, 128], sizes = [2, 64], strides = [1, 1]} : vector<2x256xf32> to vector<2x64xf32>
    %183 = vector.extract_strided_slice %179 {offsets = [0, 192], sizes = [2, 64], strides = [1, 1]} : vector<2x256xf32> to vector<2x64xf32>
    %184 = arith.mulf %181, %164 : vector<2x64xf32>
    %185 = arith.mulf %180, %182 : vector<2x64xf32>
    %186 = arith.addf %184, %185 : vector<2x64xf32>
    %187 = math.tanh %186 : vector<2x64xf32>
    %188 = arith.mulf %183, %187 : vector<2x64xf32>
    %189 = vector.extract_strided_slice %188 {offsets = [0, 0], sizes = [2, 32], strides = [1, 1]} : vector<2x64xf32> to vector<2x32xf32>
    %c8_89 = arith.constant 8 : index
    %c0_90 = arith.constant 0 : index
    %190 = vector.load %arg4[%c8_89, %c0_90] : memref<16x64xf32, #tpu.memory_space<vmem>>, vector<2x32xf32>
    tpu.vector_store %arg4[%c8_89, %c0_90], %189 {strides = array<i32>} : memref<16x64xf32, #tpu.memory_space<vmem>>, vector<2x32xf32>,
    %191 = vector.extract_strided_slice %188 {offsets = [0, 32], sizes = [2, 32], strides = [1, 1]} : vector<2x64xf32> to vector<2x32xf32>
    %c6_91 = arith.constant 6 : index
    %c32_92 = arith.constant 32 : index
    %192 = vector.load %arg4[%c6_91, %c32_92] : memref<16x64xf32, #tpu.memory_space<vmem>>, vector<2x32xf32>
    tpu.vector_store %arg4[%c6_91, %c32_92], %191 {strides = array<i32>} : memref<16x64xf32, #tpu.memory_space<vmem>>, vector<2x32xf32>,
    %c10_93 = arith.constant 10 : index
    %c0_94 = arith.constant 0 : index
    %193 = vector.load %arg3[%c10_93, %c0_94] : memref<16x256xf32, #tpu.memory_space<vmem>>, vector<2x256xf32>
    %c4_95 = arith.constant 4 : index
    %c0_96 = arith.constant 0 : index
    %194 = vector.load %arg3[%c4_95, %c0_96] : memref<16x256xf32, #tpu.memory_space<vmem>>, vector<2x256xf32>
    %195 = arith.select %29, %193, %194 : vector<2x256xi1>, vector<2x256xf32>
    %cst_97 = arith.constant dense<0.000000e+00> : vector<2x256xf32>
    %196 = tpu.matmul %188, %80, %cst_97 {dimension_numbers = #tpu.dot_dimension_numbers<[1], [0], [0], [1], [0, 0, 1, 1], [], []>} : vector<2x64xf32>, vector<64x256xf32>, vector<2x256xf32> -> vector<2x256xf32>
    %197 = arith.addf %195, %196 : vector<2x256xf32>
    %198 = arith.mulf %8, %197 : vector<2x256xf32>
    %199 = math.tanh %198 : vector<2x256xf32>
    %200 = arith.mulf %8, %199 : vector<2x256xf32>
    %201 = arith.addf %200, %11 : vector<2x256xf32>
    %202 = vector.extract_strided_slice %201 {offsets = [0, 0], sizes = [2, 64], strides = [1, 1]} : vector<2x256xf32> to vector<2x64xf32>
    %203 = vector.extract_strided_slice %201 {offsets = [0, 64], sizes = [2, 64], strides = [1, 1]} : vector<2x256xf32> to vector<2x64xf32>
    %204 = vector.extract_strided_slice %201 {offsets = [0, 128], sizes = [2, 64], strides = [1, 1]} : vector<2x256xf32> to vector<2x64xf32>
    %205 = vector.extract_strided_slice %201 {offsets = [0, 192], sizes = [2, 64], strides = [1, 1]} : vector<2x256xf32> to vector<2x64xf32>
    %206 = arith.mulf %203, %186 : vector<2x64xf32>
    %207 = arith.mulf %202, %204 : vector<2x64xf32>
    %208 = arith.addf %206, %207 : vector<2x64xf32>
    %209 = math.tanh %208 : vector<2x64xf32>
    %210 = arith.mulf %205, %209 : vector<2x64xf32>
    %211 = vector.extract_strided_slice %210 {offsets = [0, 0], sizes = [2, 32], strides = [1, 1]} : vector<2x64xf32> to vector<2x32xf32>
    %c10_98 = arith.constant 10 : index
    %c0_99 = arith.constant 0 : index
    %212 = vector.load %arg4[%c10_98, %c0_99] : memref<16x64xf32, #tpu.memory_space<vmem>>, vector<2x32xf32>
    tpu.vector_store %arg4[%c10_98, %c0_99], %211 {strides = array<i32>} : memref<16x64xf32, #tpu.memory_space<vmem>>, vector<2x32xf32>,
    %213 = vector.extract_strided_slice %210 {offsets = [0, 32], sizes = [2, 32], strides = [1, 1]} : vector<2x64xf32> to vector<2x32xf32>
    %c4_100 = arith.constant 4 : index
    %c32_101 = arith.constant 32 : index
    %214 = vector.load %arg4[%c4_100, %c32_101] : memref<16x64xf32, #tpu.memory_space<vmem>>, vector<2x32xf32>
    tpu.vector_store %arg4[%c4_100, %c32_101], %213 {strides = array<i32>} : memref<16x64xf32, #tpu.memory_space<vmem>>, vector<2x32xf32>,
    %c12_102 = arith.constant 12 : index
    %c0_103 = arith.constant 0 : index
    %215 = vector.load %arg3[%c12_102, %c0_103] : memref<16x256xf32, #tpu.memory_space<vmem>>, vector<2x256xf32>
    %c2_104 = arith.constant 2 : index
    %c0_105 = arith.constant 0 : index
    %216 = vector.load %arg3[%c2_104, %c0_105] : memref<16x256xf32, #tpu.memory_space<vmem>>, vector<2x256xf32>
    %217 = arith.select %29, %215, %216 : vector<2x256xi1>, vector<2x256xf32>
    %cst_106 = arith.constant dense<0.000000e+00> : vector<2x256xf32>
    %218 = tpu.matmul %210, %80, %cst_106 {dimension_numbers = #tpu.dot_dimension_numbers<[1], [0], [0], [1], [0, 0, 1, 1], [], []>} : vector<2x64xf32>, vector<64x256xf32>, vector<2x256xf32> -> vector<2x256xf32>
    %219 = arith.addf %217, %218 : vector<2x256xf32>
    %220 = arith.mulf %8, %219 : vector<2x256xf32>
    %221 = math.tanh %220 : vector<2x256xf32>
    %222 = arith.mulf %8, %221 : vector<2x256xf32>
    %223 = arith.addf %222, %11 : vector<2x256xf32>
    %224 = vector.extract_strided_slice %223 {offsets = [0, 0], sizes = [2, 64], strides = [1, 1]} : vector<2x256xf32> to vector<2x64xf32>
    %225 = vector.extract_strided_slice %223 {offsets = [0, 64], sizes = [2, 64], strides = [1, 1]} : vector<2x256xf32> to vector<2x64xf32>
    %226 = vector.extract_strided_slice %223 {offsets = [0, 128], sizes = [2, 64], strides = [1, 1]} : vector<2x256xf32> to vector<2x64xf32>
    %227 = vector.extract_strided_slice %223 {offsets = [0, 192], sizes = [2, 64], strides = [1, 1]} : vector<2x256xf32> to vector<2x64xf32>
    %228 = arith.mulf %225, %208 : vector<2x64xf32>
    %229 = arith.mulf %224, %226 : vector<2x64xf32>
    %230 = arith.addf %228, %229 : vector<2x64xf32>
    %231 = math.tanh %230 : vector<2x64xf32>
    %232 = arith.mulf %227, %231 : vector<2x64xf32>
    %233 = vector.extract_strided_slice %232 {offsets = [0, 0], sizes = [2, 32], strides = [1, 1]} : vector<2x64xf32> to vector<2x32xf32>
    %c12_107 = arith.constant 12 : index
    %c0_108 = arith.constant 0 : index
    %234 = vector.load %arg4[%c12_107, %c0_108] : memref<16x64xf32, #tpu.memory_space<vmem>>, vector<2x32xf32>
    tpu.vector_store %arg4[%c12_107, %c0_108], %233 {strides = array<i32>} : memref<16x64xf32, #tpu.memory_space<vmem>>, vector<2x32xf32>,
    %235 = vector.extract_strided_slice %232 {offsets = [0, 32], sizes = [2, 32], strides = [1, 1]} : vector<2x64xf32> to vector<2x32xf32>
    %c2_109 = arith.constant 2 : index
    %c32_110 = arith.constant 32 : index
    %236 = vector.load %arg4[%c2_109, %c32_110] : memref<16x64xf32, #tpu.memory_space<vmem>>, vector<2x32xf32>
    tpu.vector_store %arg4[%c2_109, %c32_110], %235 {strides = array<i32>} : memref<16x64xf32, #tpu.memory_space<vmem>>, vector<2x32xf32>,
    %c14_111 = arith.constant 14 : index
    %c0_112 = arith.constant 0 : index
    %237 = vector.load %arg3[%c14_111, %c0_112] : memref<16x256xf32, #tpu.memory_space<vmem>>, vector<2x256xf32>
    %c0_113 = arith.constant 0 : index
    %c0_114 = arith.constant 0 : index
    %238 = vector.load %arg3[%c0_113, %c0_114] : memref<16x256xf32, #tpu.memory_space<vmem>>, vector<2x256xf32>
    %239 = arith.select %29, %237, %238 : vector<2x256xi1>, vector<2x256xf32>
    %cst_115 = arith.constant dense<0.000000e+00> : vector<2x256xf32>
    %240 = tpu.matmul %232, %80, %cst_115 {dimension_numbers = #tpu.dot_dimension_numbers<[1], [0], [0], [1], [0, 0, 1, 1], [], []>} : vector<2x64xf32>, vector<64x256xf32>, vector<2x256xf32> -> vector<2x256xf32>
    %241 = arith.addf %239, %240 : vector<2x256xf32>
    %242 = arith.mulf %8, %241 : vector<2x256xf32>
    %243 = math.tanh %242 : vector<2x256xf32>
    %244 = arith.mulf %8, %243 : vector<2x256xf32>
    %245 = arith.addf %244, %11 : vector<2x256xf32>
    %246 = vector.extract_strided_slice %245 {offsets = [0, 0], sizes = [2, 64], strides = [1, 1]} : vector<2x256xf32> to vector<2x64xf32>
    %247 = vector.extract_strided_slice %245 {offsets = [0, 64], sizes = [2, 64], strides = [1, 1]} : vector<2x256xf32> to vector<2x64xf32>
    %248 = vector.extract_strided_slice %245 {offsets = [0, 128], sizes = [2, 64], strides = [1, 1]} : vector<2x256xf32> to vector<2x64xf32>
    %249 = vector.extract_strided_slice %245 {offsets = [0, 192], sizes = [2, 64], strides = [1, 1]} : vector<2x256xf32> to vector<2x64xf32>
    %250 = arith.mulf %247, %230 : vector<2x64xf32>
    %251 = arith.mulf %246, %248 : vector<2x64xf32>
    %252 = arith.addf %250, %251 : vector<2x64xf32>
    %253 = math.tanh %252 : vector<2x64xf32>
    %254 = arith.mulf %249, %253 : vector<2x64xf32>
    %255 = vector.extract_strided_slice %254 {offsets = [0, 0], sizes = [2, 32], strides = [1, 1]} : vector<2x64xf32> to vector<2x32xf32>
    %c14_116 = arith.constant 14 : index
    %c0_117 = arith.constant 0 : index
    %256 = vector.load %arg4[%c14_116, %c0_117] : memref<16x64xf32, #tpu.memory_space<vmem>>, vector<2x32xf32>
    tpu.vector_store %arg4[%c14_116, %c0_117], %255 {strides = array<i32>} : memref<16x64xf32, #tpu.memory_space<vmem>>, vector<2x32xf32>,
    %257 = vector.extract_strided_slice %254 {offsets = [0, 32], sizes = [2, 32], strides = [1, 1]} : vector<2x64xf32> to vector<2x32xf32>
    %c0_118 = arith.constant 0 : index
    %c32_119 = arith.constant 32 : index
    %258 = vector.load %arg4[%c0_118, %c32_119] : memref<16x64xf32, #tpu.memory_space<vmem>>, vector<2x32xf32>
    tpu.vector_store %arg4[%c0_118, %c32_119], %257 {strides = array<i32>} : memref<16x64xf32, #tpu.memory_space<vmem>>, vector<2x32xf32>,
    %c80 = arith.constant 80 : index
    %c0_120 = arith.constant 0 : index
    %259 = vector.load %arg1[%c80, %c0_120] : memref<208x256xf32, #tpu.memory_space<vmem>>, vector<64x256xf32>
    %c9 = arith.constant 9 : index
    %c0_121 = arith.constant 0 : index
    %260 = vector.load %arg1[%c9, %c0_121] : memref<208x256xf32, #tpu.memory_space<vmem>>, vector<1x256xf32>
    %c0_122 = arith.constant 0 : index
    %c0_123 = arith.constant 0 : index
    %261 = vector.load %arg4[%c0_122, %c0_123] : memref<16x64xf32, #tpu.memory_space<vmem>>, vector<16x64xf32>
    %cst_124 = arith.constant dense<0.000000e+00> : vector<16x256xf32>
    %262 = tpu.matmul %261, %259, %cst_124 {dimension_numbers = #tpu.dot_dimension_numbers<[1], [0], [0], [1], [0, 0, 1, 1], [], []>} : vector<16x64xf32>, vector<64x256xf32>, vector<16x256xf32> -> vector<16x256xf32>
    %263 = vector.broadcast %260 : vector<1x256xf32> to vector<16x256xf32>
    %264 = arith.addf %262, %263 : vector<16x256xf32>
    %c0_125 = arith.constant 0 : index
    %c0_126 = arith.constant 0 : index
    %265 = vector.load %arg3[%c0_125, %c0_126] : memref<16x256xf32, #tpu.memory_space<vmem>>, vector<16x256xf32>
    tpu.vector_store %arg3[%c0_125, %c0_126], %264 {strides = array<i32>} : memref<16x256xf32, #tpu.memory_space<vmem>>, vector<16x256xf32>,
    %c144 = arith.constant 144 : index
    %c0_127 = arith.constant 0 : index
    %266 = vector.load %arg1[%c144, %c0_127] : memref<208x256xf32, #tpu.memory_space<vmem>>, vector<64x256xf32>
    %cst_128 = arith.constant 0.000000e+00 : f32
    %267 = vector.broadcast %cst_128 : f32 to vector<2x64xf32>
    %cst_129 = arith.constant 0.000000e+00 : f32
    %268 = vector.broadcast %cst_129 : f32 to vector<2x64xf32>
    %c0_130 = arith.constant 0 : index
    %c0_131 = arith.constant 0 : index
    %269 = vector.load %arg3[%c0_130, %c0_131] : memref<16x256xf32, #tpu.memory_space<vmem>>, vector<2x256xf32>
    %c14_132 = arith.constant 14 : index
    %c0_133 = arith.constant 0 : index
    %270 = vector.load %arg3[%c14_132, %c0_133] : memref<16x256xf32, #tpu.memory_space<vmem>>, vector<2x256xf32>
    %271 = arith.select %29, %269, %270 : vector<2x256xi1>, vector<2x256xf32>
    %cst_134 = arith.constant dense<0.000000e+00> : vector<2x256xf32>
    %272 = tpu.matmul %267, %266, %cst_134 {dimension_numbers = #tpu.dot_dimension_numbers<[1], [0], [0], [1], [0, 0, 1, 1], [], []>} : vector<2x64xf32>, vector<64x256xf32>, vector<2x256xf32> -> vector<2x256xf32>
    %273 = arith.addf %271, %272 : vector<2x256xf32>
    %274 = arith.mulf %8, %273 : vector<2x256xf32>
    %275 = math.tanh %274 : vector<2x256xf32>
    %276 = arith.mulf %8, %275 : vector<2x256xf32>
    %277 = arith.addf %276, %11 : vector<2x256xf32>
    %278 = vector.extract_strided_slice %277 {offsets = [0, 0], sizes = [2, 64], strides = [1, 1]} : vector<2x256xf32> to vector<2x64xf32>
    %279 = vector.extract_strided_slice %277 {offsets = [0, 64], sizes = [2, 64], strides = [1, 1]} : vector<2x256xf32> to vector<2x64xf32>
    %280 = vector.extract_strided_slice %277 {offsets = [0, 128], sizes = [2, 64], strides = [1, 1]} : vector<2x256xf32> to vector<2x64xf32>
    %281 = vector.extract_strided_slice %277 {offsets = [0, 192], sizes = [2, 64], strides = [1, 1]} : vector<2x256xf32> to vector<2x64xf32>
    %282 = arith.mulf %279, %268 : vector<2x64xf32>
    %283 = arith.mulf %278, %280 : vector<2x64xf32>
    %284 = arith.addf %282, %283 : vector<2x64xf32>
    %285 = math.tanh %284 : vector<2x64xf32>
    %286 = arith.mulf %281, %285 : vector<2x64xf32>
    %287 = vector.extract_strided_slice %286 {offsets = [0, 0], sizes = [2, 32], strides = [1, 1]} : vector<2x64xf32> to vector<2x32xf32>
    %c0_135 = arith.constant 0 : index
    %c0_136 = arith.constant 0 : index
    %288 = vector.load %arg4[%c0_135, %c0_136] : memref<16x64xf32, #tpu.memory_space<vmem>>, vector<2x32xf32>
    tpu.vector_store %arg4[%c0_135, %c0_136], %287 {strides = array<i32>} : memref<16x64xf32, #tpu.memory_space<vmem>>, vector<2x32xf32>,
    %289 = vector.extract_strided_slice %286 {offsets = [0, 32], sizes = [2, 32], strides = [1, 1]} : vector<2x64xf32> to vector<2x32xf32>
    %c14_137 = arith.constant 14 : index
    %c32_138 = arith.constant 32 : index
    %290 = vector.load %arg4[%c14_137, %c32_138] : memref<16x64xf32, #tpu.memory_space<vmem>>, vector<2x32xf32>
    tpu.vector_store %arg4[%c14_137, %c32_138], %289 {strides = array<i32>} : memref<16x64xf32, #tpu.memory_space<vmem>>, vector<2x32xf32>,
    %c2_139 = arith.constant 2 : index
    %c0_140 = arith.constant 0 : index
    %291 = vector.load %arg3[%c2_139, %c0_140] : memref<16x256xf32, #tpu.memory_space<vmem>>, vector<2x256xf32>
    %c12_141 = arith.constant 12 : index
    %c0_142 = arith.constant 0 : index
    %292 = vector.load %arg3[%c12_141, %c0_142] : memref<16x256xf32, #tpu.memory_space<vmem>>, vector<2x256xf32>
    %293 = arith.select %29, %291, %292 : vector<2x256xi1>, vector<2x256xf32>
    %cst_143 = arith.constant dense<0.000000e+00> : vector<2x256xf32>
    %294 = tpu.matmul %286, %266, %cst_143 {dimension_numbers = #tpu.dot_dimension_numbers<[1], [0], [0], [1], [0, 0, 1, 1], [], []>} : vector<2x64xf32>, vector<64x256xf32>, vector<2x256xf32> -> vector<2x256xf32>
    %295 = arith.addf %293, %294 : vector<2x256xf32>
    %296 = arith.mulf %8, %295 : vector<2x256xf32>
    %297 = math.tanh %296 : vector<2x256xf32>
    %298 = arith.mulf %8, %297 : vector<2x256xf32>
    %299 = arith.addf %298, %11 : vector<2x256xf32>
    %300 = vector.extract_strided_slice %299 {offsets = [0, 0], sizes = [2, 64], strides = [1, 1]} : vector<2x256xf32> to vector<2x64xf32>
    %301 = vector.extract_strided_slice %299 {offsets = [0, 64], sizes = [2, 64], strides = [1, 1]} : vector<2x256xf32> to vector<2x64xf32>
    %302 = vector.extract_strided_slice %299 {offsets = [0, 128], sizes = [2, 64], strides = [1, 1]} : vector<2x256xf32> to vector<2x64xf32>
    %303 = vector.extract_strided_slice %299 {offsets = [0, 192], sizes = [2, 64], strides = [1, 1]} : vector<2x256xf32> to vector<2x64xf32>
    %304 = arith.mulf %301, %284 : vector<2x64xf32>
    %305 = arith.mulf %300, %302 : vector<2x64xf32>
    %306 = arith.addf %304, %305 : vector<2x64xf32>
    %307 = math.tanh %306 : vector<2x64xf32>
    %308 = arith.mulf %303, %307 : vector<2x64xf32>
    %309 = vector.extract_strided_slice %308 {offsets = [0, 0], sizes = [2, 32], strides = [1, 1]} : vector<2x64xf32> to vector<2x32xf32>
    %c2_144 = arith.constant 2 : index
    %c0_145 = arith.constant 0 : index
    %310 = vector.load %arg4[%c2_144, %c0_145] : memref<16x64xf32, #tpu.memory_space<vmem>>, vector<2x32xf32>
    tpu.vector_store %arg4[%c2_144, %c0_145], %309 {strides = array<i32>} : memref<16x64xf32, #tpu.memory_space<vmem>>, vector<2x32xf32>,
    %311 = vector.extract_strided_slice %308 {offsets = [0, 32], sizes = [2, 32], strides = [1, 1]} : vector<2x64xf32> to vector<2x32xf32>
    %c12_146 = arith.constant 12 : index
    %c32_147 = arith.constant 32 : index
    %312 = vector.load %arg4[%c12_146, %c32_147] : memref<16x64xf32, #tpu.memory_space<vmem>>, vector<2x32xf32>
    tpu.vector_store %arg4[%c12_146, %c32_147], %311 {strides = array<i32>} : memref<16x64xf32, #tpu.memory_space<vmem>>, vector<2x32xf32>,
    %c4_148 = arith.constant 4 : index
    %c0_149 = arith.constant 0 : index
    %313 = vector.load %arg3[%c4_148, %c0_149] : memref<16x256xf32, #tpu.memory_space<vmem>>, vector<2x256xf32>
    %c10_150 = arith.constant 10 : index
    %c0_151 = arith.constant 0 : index
    %314 = vector.load %arg3[%c10_150, %c0_151] : memref<16x256xf32, #tpu.memory_space<vmem>>, vector<2x256xf32>
    %315 = arith.select %29, %313, %314 : vector<2x256xi1>, vector<2x256xf32>
    %cst_152 = arith.constant dense<0.000000e+00> : vector<2x256xf32>
    %316 = tpu.matmul %308, %266, %cst_152 {dimension_numbers = #tpu.dot_dimension_numbers<[1], [0], [0], [1], [0, 0, 1, 1], [], []>} : vector<2x64xf32>, vector<64x256xf32>, vector<2x256xf32> -> vector<2x256xf32>
    %317 = arith.addf %315, %316 : vector<2x256xf32>
    %318 = arith.mulf %8, %317 : vector<2x256xf32>
    %319 = math.tanh %318 : vector<2x256xf32>
    %320 = arith.mulf %8, %319 : vector<2x256xf32>
    %321 = arith.addf %320, %11 : vector<2x256xf32>
    %322 = vector.extract_strided_slice %321 {offsets = [0, 0], sizes = [2, 64], strides = [1, 1]} : vector<2x256xf32> to vector<2x64xf32>
    %323 = vector.extract_strided_slice %321 {offsets = [0, 64], sizes = [2, 64], strides = [1, 1]} : vector<2x256xf32> to vector<2x64xf32>
    %324 = vector.extract_strided_slice %321 {offsets = [0, 128], sizes = [2, 64], strides = [1, 1]} : vector<2x256xf32> to vector<2x64xf32>
    %325 = vector.extract_strided_slice %321 {offsets = [0, 192], sizes = [2, 64], strides = [1, 1]} : vector<2x256xf32> to vector<2x64xf32>
    %326 = arith.mulf %323, %306 : vector<2x64xf32>
    %327 = arith.mulf %322, %324 : vector<2x64xf32>
    %328 = arith.addf %326, %327 : vector<2x64xf32>
    %329 = math.tanh %328 : vector<2x64xf32>
    %330 = arith.mulf %325, %329 : vector<2x64xf32>
    %331 = vector.extract_strided_slice %330 {offsets = [0, 0], sizes = [2, 32], strides = [1, 1]} : vector<2x64xf32> to vector<2x32xf32>
    %c4_153 = arith.constant 4 : index
    %c0_154 = arith.constant 0 : index
    %332 = vector.load %arg4[%c4_153, %c0_154] : memref<16x64xf32, #tpu.memory_space<vmem>>, vector<2x32xf32>
    tpu.vector_store %arg4[%c4_153, %c0_154], %331 {strides = array<i32>} : memref<16x64xf32, #tpu.memory_space<vmem>>, vector<2x32xf32>,
    %333 = vector.extract_strided_slice %330 {offsets = [0, 32], sizes = [2, 32], strides = [1, 1]} : vector<2x64xf32> to vector<2x32xf32>
    %c10_155 = arith.constant 10 : index
    %c32_156 = arith.constant 32 : index
    %334 = vector.load %arg4[%c10_155, %c32_156] : memref<16x64xf32, #tpu.memory_space<vmem>>, vector<2x32xf32>
    tpu.vector_store %arg4[%c10_155, %c32_156], %333 {strides = array<i32>} : memref<16x64xf32, #tpu.memory_space<vmem>>, vector<2x32xf32>,
    %c6_157 = arith.constant 6 : index
    %c0_158 = arith.constant 0 : index
    %335 = vector.load %arg3[%c6_157, %c0_158] : memref<16x256xf32, #tpu.memory_space<vmem>>, vector<2x256xf32>
    %c8_159 = arith.constant 8 : index
    %c0_160 = arith.constant 0 : index
    %336 = vector.load %arg3[%c8_159, %c0_160] : memref<16x256xf32, #tpu.memory_space<vmem>>, vector<2x256xf32>
    %337 = arith.select %29, %335, %336 : vector<2x256xi1>, vector<2x256xf32>
    %cst_161 = arith.constant dense<0.000000e+00> : vector<2x256xf32>
    %338 = tpu.matmul %330, %266, %cst_161 {dimension_numbers = #tpu.dot_dimension_numbers<[1], [0], [0], [1], [0, 0, 1, 1], [], []>} : vector<2x64xf32>, vector<64x256xf32>, vector<2x256xf32> -> vector<2x256xf32>
    %339 = arith.addf %337, %338 : vector<2x256xf32>
    %340 = arith.mulf %8, %339 : vector<2x256xf32>
    %341 = math.tanh %340 : vector<2x256xf32>
    %342 = arith.mulf %8, %341 : vector<2x256xf32>
    %343 = arith.addf %342, %11 : vector<2x256xf32>
    %344 = vector.extract_strided_slice %343 {offsets = [0, 0], sizes = [2, 64], strides = [1, 1]} : vector<2x256xf32> to vector<2x64xf32>
    %345 = vector.extract_strided_slice %343 {offsets = [0, 64], sizes = [2, 64], strides = [1, 1]} : vector<2x256xf32> to vector<2x64xf32>
    %346 = vector.extract_strided_slice %343 {offsets = [0, 128], sizes = [2, 64], strides = [1, 1]} : vector<2x256xf32> to vector<2x64xf32>
    %347 = vector.extract_strided_slice %343 {offsets = [0, 192], sizes = [2, 64], strides = [1, 1]} : vector<2x256xf32> to vector<2x64xf32>
    %348 = arith.mulf %345, %328 : vector<2x64xf32>
    %349 = arith.mulf %344, %346 : vector<2x64xf32>
    %350 = arith.addf %348, %349 : vector<2x64xf32>
    %351 = math.tanh %350 : vector<2x64xf32>
    %352 = arith.mulf %347, %351 : vector<2x64xf32>
    %353 = vector.extract_strided_slice %352 {offsets = [0, 0], sizes = [2, 32], strides = [1, 1]} : vector<2x64xf32> to vector<2x32xf32>
    %c6_162 = arith.constant 6 : index
    %c0_163 = arith.constant 0 : index
    %354 = vector.load %arg4[%c6_162, %c0_163] : memref<16x64xf32, #tpu.memory_space<vmem>>, vector<2x32xf32>
    tpu.vector_store %arg4[%c6_162, %c0_163], %353 {strides = array<i32>} : memref<16x64xf32, #tpu.memory_space<vmem>>, vector<2x32xf32>,
    %355 = vector.extract_strided_slice %352 {offsets = [0, 32], sizes = [2, 32], strides = [1, 1]} : vector<2x64xf32> to vector<2x32xf32>
    %c8_164 = arith.constant 8 : index
    %c32_165 = arith.constant 32 : index
    %356 = vector.load %arg4[%c8_164, %c32_165] : memref<16x64xf32, #tpu.memory_space<vmem>>, vector<2x32xf32>
    tpu.vector_store %arg4[%c8_164, %c32_165], %355 {strides = array<i32>} : memref<16x64xf32, #tpu.memory_space<vmem>>, vector<2x32xf32>,
    %c8_166 = arith.constant 8 : index
    %c0_167 = arith.constant 0 : index
    %357 = vector.load %arg3[%c8_166, %c0_167] : memref<16x256xf32, #tpu.memory_space<vmem>>, vector<2x256xf32>
    %c6_168 = arith.constant 6 : index
    %c0_169 = arith.constant 0 : index
    %358 = vector.load %arg3[%c6_168, %c0_169] : memref<16x256xf32, #tpu.memory_space<vmem>>, vector<2x256xf32>
    %359 = arith.select %29, %357, %358 : vector<2x256xi1>, vector<2x256xf32>
    %cst_170 = arith.constant dense<0.000000e+00> : vector<2x256xf32>
    %360 = tpu.matmul %352, %266, %cst_170 {dimension_numbers = #tpu.dot_dimension_numbers<[1], [0], [0], [1], [0, 0, 1, 1], [], []>} : vector<2x64xf32>, vector<64x256xf32>, vector<2x256xf32> -> vector<2x256xf32>
    %361 = arith.addf %359, %360 : vector<2x256xf32>
    %362 = arith.mulf %8, %361 : vector<2x256xf32>
    %363 = math.tanh %362 : vector<2x256xf32>
    %364 = arith.mulf %8, %363 : vector<2x256xf32>
    %365 = arith.addf %364, %11 : vector<2x256xf32>
    %366 = vector.extract_strided_slice %365 {offsets = [0, 0], sizes = [2, 64], strides = [1, 1]} : vector<2x256xf32> to vector<2x64xf32>
    %367 = vector.extract_strided_slice %365 {offsets = [0, 64], sizes = [2, 64], strides = [1, 1]} : vector<2x256xf32> to vector<2x64xf32>
    %368 = vector.extract_strided_slice %365 {offsets = [0, 128], sizes = [2, 64], strides = [1, 1]} : vector<2x256xf32> to vector<2x64xf32>
    %369 = vector.extract_strided_slice %365 {offsets = [0, 192], sizes = [2, 64], strides = [1, 1]} : vector<2x256xf32> to vector<2x64xf32>
    %370 = arith.mulf %367, %350 : vector<2x64xf32>
    %371 = arith.mulf %366, %368 : vector<2x64xf32>
    %372 = arith.addf %370, %371 : vector<2x64xf32>
    %373 = math.tanh %372 : vector<2x64xf32>
    %374 = arith.mulf %369, %373 : vector<2x64xf32>
    %375 = vector.extract_strided_slice %374 {offsets = [0, 0], sizes = [2, 32], strides = [1, 1]} : vector<2x64xf32> to vector<2x32xf32>
    %c8_171 = arith.constant 8 : index
    %c0_172 = arith.constant 0 : index
    %376 = vector.load %arg4[%c8_171, %c0_172] : memref<16x64xf32, #tpu.memory_space<vmem>>, vector<2x32xf32>
    tpu.vector_store %arg4[%c8_171, %c0_172], %375 {strides = array<i32>} : memref<16x64xf32, #tpu.memory_space<vmem>>, vector<2x32xf32>,
    %377 = vector.extract_strided_slice %374 {offsets = [0, 32], sizes = [2, 32], strides = [1, 1]} : vector<2x64xf32> to vector<2x32xf32>
    %c6_173 = arith.constant 6 : index
    %c32_174 = arith.constant 32 : index
    %378 = vector.load %arg4[%c6_173, %c32_174] : memref<16x64xf32, #tpu.memory_space<vmem>>, vector<2x32xf32>
    tpu.vector_store %arg4[%c6_173, %c32_174], %377 {strides = array<i32>} : memref<16x64xf32, #tpu.memory_space<vmem>>, vector<2x32xf32>,
    %c10_175 = arith.constant 10 : index
    %c0_176 = arith.constant 0 : index
    %379 = vector.load %arg3[%c10_175, %c0_176] : memref<16x256xf32, #tpu.memory_space<vmem>>, vector<2x256xf32>
    %c4_177 = arith.constant 4 : index
    %c0_178 = arith.constant 0 : index
    %380 = vector.load %arg3[%c4_177, %c0_178] : memref<16x256xf32, #tpu.memory_space<vmem>>, vector<2x256xf32>
    %381 = arith.select %29, %379, %380 : vector<2x256xi1>, vector<2x256xf32>
    %cst_179 = arith.constant dense<0.000000e+00> : vector<2x256xf32>
    %382 = tpu.matmul %374, %266, %cst_179 {dimension_numbers = #tpu.dot_dimension_numbers<[1], [0], [0], [1], [0, 0, 1, 1], [], []>} : vector<2x64xf32>, vector<64x256xf32>, vector<2x256xf32> -> vector<2x256xf32>
    %383 = arith.addf %381, %382 : vector<2x256xf32>
    %384 = arith.mulf %8, %383 : vector<2x256xf32>
    %385 = math.tanh %384 : vector<2x256xf32>
    %386 = arith.mulf %8, %385 : vector<2x256xf32>
    %387 = arith.addf %386, %11 : vector<2x256xf32>
    %388 = vector.extract_strided_slice %387 {offsets = [0, 0], sizes = [2, 64], strides = [1, 1]} : vector<2x256xf32> to vector<2x64xf32>
    %389 = vector.extract_strided_slice %387 {offsets = [0, 64], sizes = [2, 64], strides = [1, 1]} : vector<2x256xf32> to vector<2x64xf32>
    %390 = vector.extract_strided_slice %387 {offsets = [0, 128], sizes = [2, 64], strides = [1, 1]} : vector<2x256xf32> to vector<2x64xf32>
    %391 = vector.extract_strided_slice %387 {offsets = [0, 192], sizes = [2, 64], strides = [1, 1]} : vector<2x256xf32> to vector<2x64xf32>
    %392 = arith.mulf %389, %372 : vector<2x64xf32>
    %393 = arith.mulf %388, %390 : vector<2x64xf32>
    %394 = arith.addf %392, %393 : vector<2x64xf32>
    %395 = math.tanh %394 : vector<2x64xf32>
    %396 = arith.mulf %391, %395 : vector<2x64xf32>
    %397 = vector.extract_strided_slice %396 {offsets = [0, 0], sizes = [2, 32], strides = [1, 1]} : vector<2x64xf32> to vector<2x32xf32>
    %c10_180 = arith.constant 10 : index
    %c0_181 = arith.constant 0 : index
    %398 = vector.load %arg4[%c10_180, %c0_181] : memref<16x64xf32, #tpu.memory_space<vmem>>, vector<2x32xf32>
    tpu.vector_store %arg4[%c10_180, %c0_181], %397 {strides = array<i32>} : memref<16x64xf32, #tpu.memory_space<vmem>>, vector<2x32xf32>,
    %399 = vector.extract_strided_slice %396 {offsets = [0, 32], sizes = [2, 32], strides = [1, 1]} : vector<2x64xf32> to vector<2x32xf32>
    %c4_182 = arith.constant 4 : index
    %c32_183 = arith.constant 32 : index
    %400 = vector.load %arg4[%c4_182, %c32_183] : memref<16x64xf32, #tpu.memory_space<vmem>>, vector<2x32xf32>
    tpu.vector_store %arg4[%c4_182, %c32_183], %399 {strides = array<i32>} : memref<16x64xf32, #tpu.memory_space<vmem>>, vector<2x32xf32>,
    %c12_184 = arith.constant 12 : index
    %c0_185 = arith.constant 0 : index
    %401 = vector.load %arg3[%c12_184, %c0_185] : memref<16x256xf32, #tpu.memory_space<vmem>>, vector<2x256xf32>
    %c2_186 = arith.constant 2 : index
    %c0_187 = arith.constant 0 : index
    %402 = vector.load %arg3[%c2_186, %c0_187] : memref<16x256xf32, #tpu.memory_space<vmem>>, vector<2x256xf32>
    %403 = arith.select %29, %401, %402 : vector<2x256xi1>, vector<2x256xf32>
    %cst_188 = arith.constant dense<0.000000e+00> : vector<2x256xf32>
    %404 = tpu.matmul %396, %266, %cst_188 {dimension_numbers = #tpu.dot_dimension_numbers<[1], [0], [0], [1], [0, 0, 1, 1], [], []>} : vector<2x64xf32>, vector<64x256xf32>, vector<2x256xf32> -> vector<2x256xf32>
    %405 = arith.addf %403, %404 : vector<2x256xf32>
    %406 = arith.mulf %8, %405 : vector<2x256xf32>
    %407 = math.tanh %406 : vector<2x256xf32>
    %408 = arith.mulf %8, %407 : vector<2x256xf32>
    %409 = arith.addf %408, %11 : vector<2x256xf32>
    %410 = vector.extract_strided_slice %409 {offsets = [0, 0], sizes = [2, 64], strides = [1, 1]} : vector<2x256xf32> to vector<2x64xf32>
    %411 = vector.extract_strided_slice %409 {offsets = [0, 64], sizes = [2, 64], strides = [1, 1]} : vector<2x256xf32> to vector<2x64xf32>
    %412 = vector.extract_strided_slice %409 {offsets = [0, 128], sizes = [2, 64], strides = [1, 1]} : vector<2x256xf32> to vector<2x64xf32>
    %413 = vector.extract_strided_slice %409 {offsets = [0, 192], sizes = [2, 64], strides = [1, 1]} : vector<2x256xf32> to vector<2x64xf32>
    %414 = arith.mulf %411, %394 : vector<2x64xf32>
    %415 = arith.mulf %410, %412 : vector<2x64xf32>
    %416 = arith.addf %414, %415 : vector<2x64xf32>
    %417 = math.tanh %416 : vector<2x64xf32>
    %418 = arith.mulf %413, %417 : vector<2x64xf32>
    %419 = vector.extract_strided_slice %418 {offsets = [0, 0], sizes = [2, 32], strides = [1, 1]} : vector<2x64xf32> to vector<2x32xf32>
    %c12_189 = arith.constant 12 : index
    %c0_190 = arith.constant 0 : index
    %420 = vector.load %arg4[%c12_189, %c0_190] : memref<16x64xf32, #tpu.memory_space<vmem>>, vector<2x32xf32>
    tpu.vector_store %arg4[%c12_189, %c0_190], %419 {strides = array<i32>} : memref<16x64xf32, #tpu.memory_space<vmem>>, vector<2x32xf32>,
    %421 = vector.extract_strided_slice %418 {offsets = [0, 32], sizes = [2, 32], strides = [1, 1]} : vector<2x64xf32> to vector<2x32xf32>
    %c2_191 = arith.constant 2 : index
    %c32_192 = arith.constant 32 : index
    %422 = vector.load %arg4[%c2_191, %c32_192] : memref<16x64xf32, #tpu.memory_space<vmem>>, vector<2x32xf32>
    tpu.vector_store %arg4[%c2_191, %c32_192], %421 {strides = array<i32>} : memref<16x64xf32, #tpu.memory_space<vmem>>, vector<2x32xf32>,
    %c14_193 = arith.constant 14 : index
    %c0_194 = arith.constant 0 : index
    %423 = vector.load %arg3[%c14_193, %c0_194] : memref<16x256xf32, #tpu.memory_space<vmem>>, vector<2x256xf32>
    %c0_195 = arith.constant 0 : index
    %c0_196 = arith.constant 0 : index
    %424 = vector.load %arg3[%c0_195, %c0_196] : memref<16x256xf32, #tpu.memory_space<vmem>>, vector<2x256xf32>
    %425 = arith.select %29, %423, %424 : vector<2x256xi1>, vector<2x256xf32>
    %cst_197 = arith.constant dense<0.000000e+00> : vector<2x256xf32>
    %426 = tpu.matmul %418, %266, %cst_197 {dimension_numbers = #tpu.dot_dimension_numbers<[1], [0], [0], [1], [0, 0, 1, 1], [], []>} : vector<2x64xf32>, vector<64x256xf32>, vector<2x256xf32> -> vector<2x256xf32>
    %427 = arith.addf %425, %426 : vector<2x256xf32>
    %428 = arith.mulf %8, %427 : vector<2x256xf32>
    %429 = math.tanh %428 : vector<2x256xf32>
    %430 = arith.mulf %8, %429 : vector<2x256xf32>
    %431 = arith.addf %430, %11 : vector<2x256xf32>
    %432 = vector.extract_strided_slice %431 {offsets = [0, 0], sizes = [2, 64], strides = [1, 1]} : vector<2x256xf32> to vector<2x64xf32>
    %433 = vector.extract_strided_slice %431 {offsets = [0, 64], sizes = [2, 64], strides = [1, 1]} : vector<2x256xf32> to vector<2x64xf32>
    %434 = vector.extract_strided_slice %431 {offsets = [0, 128], sizes = [2, 64], strides = [1, 1]} : vector<2x256xf32> to vector<2x64xf32>
    %435 = vector.extract_strided_slice %431 {offsets = [0, 192], sizes = [2, 64], strides = [1, 1]} : vector<2x256xf32> to vector<2x64xf32>
    %436 = arith.mulf %433, %416 : vector<2x64xf32>
    %437 = arith.mulf %432, %434 : vector<2x64xf32>
    %438 = arith.addf %436, %437 : vector<2x64xf32>
    %439 = math.tanh %438 : vector<2x64xf32>
    %440 = arith.mulf %435, %439 : vector<2x64xf32>
    %441 = vector.extract_strided_slice %440 {offsets = [0, 0], sizes = [2, 32], strides = [1, 1]} : vector<2x64xf32> to vector<2x32xf32>
    %c14_198 = arith.constant 14 : index
    %c0_199 = arith.constant 0 : index
    %442 = vector.load %arg4[%c14_198, %c0_199] : memref<16x64xf32, #tpu.memory_space<vmem>>, vector<2x32xf32>
    tpu.vector_store %arg4[%c14_198, %c0_199], %441 {strides = array<i32>} : memref<16x64xf32, #tpu.memory_space<vmem>>, vector<2x32xf32>,
    %443 = vector.extract_strided_slice %440 {offsets = [0, 32], sizes = [2, 32], strides = [1, 1]} : vector<2x64xf32> to vector<2x32xf32>
    %c0_200 = arith.constant 0 : index
    %c32_201 = arith.constant 32 : index
    %444 = vector.load %arg4[%c0_200, %c32_201] : memref<16x64xf32, #tpu.memory_space<vmem>>, vector<2x32xf32>
    tpu.vector_store %arg4[%c0_200, %c32_201], %443 {strides = array<i32>} : memref<16x64xf32, #tpu.memory_space<vmem>>, vector<2x32xf32>,
    %c10_202 = arith.constant 10 : index
    %c0_203 = arith.constant 0 : index
    %445 = vector.load %arg1[%c10_202, %c0_203] : memref<208x256xf32, #tpu.memory_space<vmem>>, vector<1x256xf32>
    %446 = vector.extract_strided_slice %445 {offsets = [0, 0], sizes = [1, 64], strides = [1, 1]} : vector<1x256xf32> to vector<1x64xf32>
    %447 = vector.extract_strided_slice %445 {offsets = [0, 64], sizes = [1, 1], strides = [1, 1]} : vector<1x256xf32> to vector<1x1xf32>
    %c0_204 = arith.constant 0 : index
    %c0_205 = arith.constant 0 : index
    %448 = vector.load %arg4[%c0_204, %c0_205] : memref<16x64xf32, #tpu.memory_space<vmem>>, vector<2x64xf32>
    %cst_206 = arith.constant 0.000000e+00 : f32
    %449 = vector.broadcast %cst_206 : f32 to vector<2x64xf32>
    %450 = arith.maximumf %448, %449 : vector<2x64xf32>
    %451 = vector.broadcast %446 : vector<1x64xf32> to vector<2x64xf32>
    %452 = arith.mulf %450, %451 : vector<2x64xf32>
    %cst_207 = arith.constant dense<0.000000e+00> : vector<2xf32>
    %453 = vector.multi_reduction <add>, %452, %cst_207 [1] : vector<2x64xf32> to vector<2xf32>
    %454 = vector.shape_cast %453 : vector<2xf32> to vector<2x1xf32>
    %c2_208 = arith.constant 2 : index
    %c0_209 = arith.constant 0 : index
    %455 = vector.load %arg4[%c2_208, %c0_209] : memref<16x64xf32, #tpu.memory_space<vmem>>, vector<2x64xf32>
    %cst_210 = arith.constant 0.000000e+00 : f32
    %456 = vector.broadcast %cst_210 : f32 to vector<2x64xf32>
    %457 = arith.maximumf %455, %456 : vector<2x64xf32>
    %458 = vector.broadcast %446 : vector<1x64xf32> to vector<2x64xf32>
    %459 = arith.mulf %457, %458 : vector<2x64xf32>
    %cst_211 = arith.constant dense<0.000000e+00> : vector<2xf32>
    %460 = vector.multi_reduction <add>, %459, %cst_211 [1] : vector<2x64xf32> to vector<2xf32>
    %461 = vector.shape_cast %460 : vector<2xf32> to vector<2x1xf32>
    %c4_212 = arith.constant 4 : index
    %c0_213 = arith.constant 0 : index
    %462 = vector.load %arg4[%c4_212, %c0_213] : memref<16x64xf32, #tpu.memory_space<vmem>>, vector<2x64xf32>
    %cst_214 = arith.constant 0.000000e+00 : f32
    %463 = vector.broadcast %cst_214 : f32 to vector<2x64xf32>
    %464 = arith.maximumf %462, %463 : vector<2x64xf32>
    %465 = vector.broadcast %446 : vector<1x64xf32> to vector<2x64xf32>
    %466 = arith.mulf %464, %465 : vector<2x64xf32>
    %cst_215 = arith.constant dense<0.000000e+00> : vector<2xf32>
    %467 = vector.multi_reduction <add>, %466, %cst_215 [1] : vector<2x64xf32> to vector<2xf32>
    %468 = vector.shape_cast %467 : vector<2xf32> to vector<2x1xf32>
    %c6_216 = arith.constant 6 : index
    %c0_217 = arith.constant 0 : index
    %469 = vector.load %arg4[%c6_216, %c0_217] : memref<16x64xf32, #tpu.memory_space<vmem>>, vector<2x64xf32>
    %cst_218 = arith.constant 0.000000e+00 : f32
    %470 = vector.broadcast %cst_218 : f32 to vector<2x64xf32>
    %471 = arith.maximumf %469, %470 : vector<2x64xf32>
    %472 = vector.broadcast %446 : vector<1x64xf32> to vector<2x64xf32>
    %473 = arith.mulf %471, %472 : vector<2x64xf32>
    %cst_219 = arith.constant dense<0.000000e+00> : vector<2xf32>
    %474 = vector.multi_reduction <add>, %473, %cst_219 [1] : vector<2x64xf32> to vector<2xf32>
    %475 = vector.shape_cast %474 : vector<2xf32> to vector<2x1xf32>
    %c8_220 = arith.constant 8 : index
    %c0_221 = arith.constant 0 : index
    %476 = vector.load %arg4[%c8_220, %c0_221] : memref<16x64xf32, #tpu.memory_space<vmem>>, vector<2x64xf32>
    %cst_222 = arith.constant 0.000000e+00 : f32
    %477 = vector.broadcast %cst_222 : f32 to vector<2x64xf32>
    %478 = arith.maximumf %476, %477 : vector<2x64xf32>
    %479 = vector.broadcast %446 : vector<1x64xf32> to vector<2x64xf32>
    %480 = arith.mulf %478, %479 : vector<2x64xf32>
    %cst_223 = arith.constant dense<0.000000e+00> : vector<2xf32>
    %481 = vector.multi_reduction <add>, %480, %cst_223 [1] : vector<2x64xf32> to vector<2xf32>
    %482 = vector.shape_cast %481 : vector<2xf32> to vector<2x1xf32>
    %c10_224 = arith.constant 10 : index
    %c0_225 = arith.constant 0 : index
    %483 = vector.load %arg4[%c10_224, %c0_225] : memref<16x64xf32, #tpu.memory_space<vmem>>, vector<2x64xf32>
    %cst_226 = arith.constant 0.000000e+00 : f32
    %484 = vector.broadcast %cst_226 : f32 to vector<2x64xf32>
    %485 = arith.maximumf %483, %484 : vector<2x64xf32>
    %486 = vector.broadcast %446 : vector<1x64xf32> to vector<2x64xf32>
    %487 = arith.mulf %485, %486 : vector<2x64xf32>
    %cst_227 = arith.constant dense<0.000000e+00> : vector<2xf32>
    %488 = vector.multi_reduction <add>, %487, %cst_227 [1] : vector<2x64xf32> to vector<2xf32>
    %489 = vector.shape_cast %488 : vector<2xf32> to vector<2x1xf32>
    %c12_228 = arith.constant 12 : index
    %c0_229 = arith.constant 0 : index
    %490 = vector.load %arg4[%c12_228, %c0_229] : memref<16x64xf32, #tpu.memory_space<vmem>>, vector<2x64xf32>
    %cst_230 = arith.constant 0.000000e+00 : f32
    %491 = vector.broadcast %cst_230 : f32 to vector<2x64xf32>
    %492 = arith.maximumf %490, %491 : vector<2x64xf32>
    %493 = vector.broadcast %446 : vector<1x64xf32> to vector<2x64xf32>
    %494 = arith.mulf %492, %493 : vector<2x64xf32>
    %cst_231 = arith.constant dense<0.000000e+00> : vector<2xf32>
    %495 = vector.multi_reduction <add>, %494, %cst_231 [1] : vector<2x64xf32> to vector<2xf32>
    %496 = vector.shape_cast %495 : vector<2xf32> to vector<2x1xf32>
    %c14_232 = arith.constant 14 : index
    %c0_233 = arith.constant 0 : index
    %497 = vector.load %arg4[%c14_232, %c0_233] : memref<16x64xf32, #tpu.memory_space<vmem>>, vector<2x64xf32>
    %cst_234 = arith.constant 0.000000e+00 : f32
    %498 = vector.broadcast %cst_234 : f32 to vector<2x64xf32>
    %499 = arith.maximumf %497, %498 : vector<2x64xf32>
    %500 = vector.broadcast %446 : vector<1x64xf32> to vector<2x64xf32>
    %501 = arith.mulf %499, %500 : vector<2x64xf32>
    %cst_235 = arith.constant dense<0.000000e+00> : vector<2xf32>
    %502 = vector.multi_reduction <add>, %501, %cst_235 [1] : vector<2x64xf32> to vector<2xf32>
    %503 = vector.shape_cast %502 : vector<2xf32> to vector<2x1xf32>
    %504 = tpu.concatenate %454, %461, %468, %475, %482, %489, %496, %503 in 1 : vector<2x1xf32>, vector<2x1xf32>, vector<2x1xf32>, vector<2x1xf32>, vector<2x1xf32>, vector<2x1xf32>, vector<2x1xf32>, vector<2x1xf32> -> vector<2x8xf32>
    %505 = vector.broadcast %447 : vector<1x1xf32> to vector<2x8xf32>
    %506 = arith.addf %504, %505 : vector<2x8xf32>
    %cst_236 = arith.constant 0.000000e+00 : f32
    %cst_237 = arith.constant 1.000000e+00 : f32
    %507 = vector.broadcast %cst_236 : f32 to vector<2x8xf32>
    %508 = arith.maximumf %507, %506 : vector<2x8xf32>
    %509 = vector.broadcast %cst_237 : f32 to vector<2x8xf32>
    %510 = arith.minimumf %509, %508 : vector<2x8xf32>
    %c0_238 = arith.constant 0 : index
    %c0_239 = arith.constant 0 : index
    %511 = vector.load %arg2[%c0_238, %c0_239] : memref<2x8xf32, #tpu.memory_space<vmem>>, vector<2x8xf32>
    tpu.vector_store %arg2[%c0_238, %c0_239], %510 {strides = array<i32>} : memref<2x8xf32, #tpu.memory_space<vmem>>, vector<2x8xf32>,
    return
  }
}

</mosaic_0001>

<bundles_post_ra>
// kernel: pet_tracker_forward.1
= control target key start
LH: loop header
LB: loop body
LE: loop exit
PB: predicated region body
PF: predicated region fallthrough
CT: control target
= control target key end

     0   :  { %7 = vsyncpa [#allocation5], 0  ;;  %s3107_s0 = inlined_call_operand.vmem [shape: f32[2,8,6], index: 0, kind: input, shape index: {}]   ;;  %s3108_s1 = inlined_call_operand.hbm [shape: f32[208,256], index: 1, kind: input, shape index: {}]   ;;  %s3109_s2 = inlined_call_operand.hbm [shape: f32[2,8], index: 2, kind: output, shape index: {}]  }
   0x1   :  { %8 = vsyncpa [#allocation6], 0  ;;  %s15_s11 = sshll.u32 %s3108_s1, 4  ;;  %s2365_s12 = smov [#allocation4]   ;;  %s16_s11 = int_to_ptr.hbm [resolvable:$true] %s15_s11 }
   0x2   :  { %s17_s13 = sshll.u32 %s2365_s12, 4  ;;  %s2366_s14 = smov 256   ;;  %s18_s13 = int_to_ptr.vmem [resolvable:$true] %s17_s13 }
   0x3   :  { %s2367_s15 = smov 16  }
   0x4   :  { %23 = dma.hbm_to_vmem [thread:$0]  %s16_s11, 6656, %s18_s13, [#allocation5], %s2366_s14, %s2366_s14, %s2367_s15  }
   0x5   :  { %2361 = dma.done.wait [#allocation5], 6656  }
   0x6   :  { %2362 = vsyncadd [#allocation5], 4294960640  ;;  %vm86_vm0 = vcmask 1045504   ;;  %vm81_vm1 = vcmask 1041409   ;;  %v2391_v0 = vld [vmem:[#allocation4] sm:$0x3f] }
   0x7   :  { %v2393_v1 = vld [vmem:[#allocation4 + $0x8] sm:$0x3f]  ;;  %v71_v2 = vld [vmem:[%s3107_s0] sm:$0x1]  ;;  %2143 = vmatpush.msk.msra.mxu2 %vm86_vm0, %v2391_v0  ;;  %v72_v3 = vld [vmem:[%s3107_s0 + $0x8] sm:$0x1]  ;;  %2151 = vmatpush.msk.msra.mxu0 %vm86_vm0, %v2391_v0 }
   0x8   :  { %2145 = vmatpush.msk.msra.mxu3 %vm86_vm0, %v2393_v1  ;;  %v191_v4 = vld [vmem:[%s3107_s0 + $0x2] sm:$0x1]  ;;  %v192_v5 = vld [vmem:[%s3107_s0 + $0xa] sm:$0x1]  ;;  %2153 = vmatpush.msk.msra.mxu1 %vm86_vm0, %v2393_v1  ;;  %v80_v6 = vrot.slane %v72_v3, 7  ;;  %vm83_vm2 = vcmask 48128  }
   0x9   :  { %v195_v7 = vrot.slane %v192_v5, 7  ;;  %2147 = vmatpush.msk.msrb.mxu2 %vm86_vm0, %v2391_v0  ;;  %v136_v8 = vld [vmem:[%s3107_s0 + $0x9] sm:$0x1]  ;;  %2159 = vmatpush.msk.msrb.mxu0 %vm86_vm0, %v2391_v0  ;;  %v304_v11 = vld [vmem:[%s3107_s0 + $0xc] sm:$0x1]  ;;  %v2459_v20 = vld [vmem:[#allocation4 + $0x90] sm:$0xff] }
   0xa   :  { %2149 = vmatpush.msk.msrb.mxu3 %vm86_vm0, %v2393_v1  ;;  %v82_v9 = vsel %vm81_vm1, %v80_v6, %v71_v2  ;;  %2161 = vmatpush.msk.msrb.mxu1 %vm86_vm0, %v2393_v1  ;;  %v139_v12 = vrot.slane %v136_v8, 7  ;;  %v135_v13 = vld [vmem:[%s3107_s0 + $0x1] sm:$0x1]  ;;  %v307_v14 = vrot.slane %v304_v11, 7  ;;  %v303_v15 = vld [vmem:[%s3107_s0 + $0x4] sm:$0x1] }
   0xb   :  { %v196_v10 = vsel %vm81_vm1, %v195_v7, %v191_v4  ;;  %2144 = vmatmul.msk.f32.vlgmr.msra.gmra.mxu2 %vm83_vm2, %v82_v9  ;;  %2146 = vmatmul.msk.f32.vlgmr.msra.gmra.mxu3 %vm83_vm2, %v82_v9  ;;  %v248_v18 = vld [vmem:[%s3107_s0 + $0xb] sm:$0x1]  ;;  %v410_v19 = vld [vmem:[%s3107_s0 + $0xe] sm:$0x1]  ;;  %v247_v23 = vld [vmem:[%s3107_s0 + $0x3] sm:$0x1] }
   0xc   :  { %2152 = vmatmul.msk.f32.vlgmr.msra.gmra.mxu0 %vm83_vm2, %v196_v10  ;;  %2154 = vmatmul.msk.f32.vlgmr.msra.gmra.mxu1 %vm83_vm2, %v196_v10  ;;  %v140_v16 = vsel %vm81_vm1, %v139_v12, %v135_v13  ;;  %v308_v17 = vsel %vm81_vm1, %v307_v14, %v303_v15  ;;  %v2461_v21 = vld [vmem:[#allocation4 + $0x98] sm:$0xff]  ;;  %v251_v22 = vrot.slane %v248_v18, 7  ;;  %v413_v24 = vrot.slane %v410_v19, 7  ;;  %v2472_v25 = vld [vmem:[#allocation4 + $0x80] sm:$0xff]  ;;  %v2474_v26 = vld [vmem:[#allocation4 + $0x88] sm:$0xff]  ;;  %s2372_s18 = smov [#allocation7]  }
   0xd   :  { %2155 = vmatpush.msk.msra.mxu2 %vm86_vm0, %v2391_v0  ;;  %2157 = vmatpush.msk.msra.mxu3 %vm86_vm0, %v2393_v1  ;;  %v409_v27 = vld [vmem:[%s3107_s0 + $0x6] sm:$0x1]  ;;  %v2483_v29 = vld [vmem:[#allocation4 + $0x78] sm:$0xff]  ;;  %v2496_v33 = vld [vmem:[#allocation4 + $0x60] sm:$0xff]  ;;  %v2368_v49 = vmov 0.0   ;;  %vm616_vm6 = vcmask 254976  }
   0xe   :  { %2167 = vmatpush.msk.msra.mxu0 %vm86_vm0, %v2391_v0  ;;  %2169 = vmatpush.msk.msra.mxu1 %vm86_vm0, %v2393_v1  ;;  %v2481_v28 = vld [vmem:[#allocation4 + $0x70] sm:$0xff]  ;;  %v252_v30 = vsel %vm81_vm1, %v251_v22, %v247_v23  ;;  %v414_v31 = vsel %vm81_vm1, %v413_v24, %v409_v27  ;;  %v354_v32 = vld [vmem:[%s3107_s0 + $0xd] sm:$0x1]  ;;  %v2498_v34 = vld [vmem:[#allocation4 + $0x68] sm:$0xff]  ;;  %vm549_vm7 = vcmask 523264   ;;  %vm618_vm8 = vcmask 517376  }
   0xf   :  { %v357_v35 = vrot.slane %v354_v32, 7  ;;  %v353_v36 = vld [vmem:[%s3107_s0 + $0x5] sm:$0x1]  ;;  %v2511_v38 = vld [vmem:[#allocation4 + $0x58] sm:$0xff]  ;;  %v2515_v39 = vld [vmem:[#allocation4 + $0x40] sm:$0xff]  ;;  %vm706_vm9 = vcmask 257026  }
  0x10   :  { %v2509_v37 = vld [vmem:[#allocation4 + $0x50] sm:$0xff]  ;;  %v2517_v40 = vld [vmem:[#allocation4 + $0x48] sm:$0xff]  ;;  %v466_v42 = vld [vmem:[%s3107_s0 + $0xf] sm:$0x1]  ;;  %vm708_vm10 = vcmask 519426   ;;  %vm799_vm11 = vcmask 259076  }
  0x11   :  { %v358_v41 = vsel %vm81_vm1, %v357_v35, %v353_v36  ;;  %v2525_v43 = vld [vmem:[#allocation4 + $0x30] sm:$0xff]  ;;  %v2527_v44 = vld [vmem:[#allocation4 + $0x38] sm:$0xff]  ;;  %v2533_v45 = vld [vmem:[#allocation4 + $0x20] sm:$0xff]  ;;  %v469_v47 = vrot.slane %v466_v42, 7  ;;  %v28_v36 = vlaneseq  ;;  %vm801_vm12 = vcmask 521476   ;;  %s2131_s19 = sshll.u32 %s2372_s18, 4  ;;  %s2132_s19 = int_to_ptr.vmem [resolvable:$true] %s2131_s19 }
  0x12   :  { %v2535_v46 = vld [vmem:[#allocation4 + $0x28] sm:$0xff]  ;;  %v465_v48 = vld [vmem:[%s3107_s0 + $0x7] sm:$0x1]  ;;  %v70_v51 = vld [vmem:[#allocation4 + $0x10] ss:$8 sm:$0x3] }
  0x13   :  { %2148 = vmatmul.msk.f32.vlgmr.msrb.gmra.mxu2 %vm83_vm2, %v140_v16  ;;  %2150 = vmatmul.msk.f32.vlgmr.msrb.gmra.mxu3 %vm83_vm2, %v140_v16  ;;  %v470_v50 = vsel %vm81_vm1, %v469_v47, %v465_v48  ;;  %v74_v52 = vperm.slane %v70_v51, 0  ;;  %v75_v53 = vperm.slane %v70_v51, 1  ;;  %s2370_s0 = smov 64   ;;  %vm892_vm13 = vcmask 261126   ;;  %s2133_s22 = sshll.u32 %s3109_s2, 4  ;;  %s2134_s22 = int_to_ptr.hbm [resolvable:$true] %s2133_s22 }
  0x14   :  { %2160 = vmatmul.msk.f32.vlgmr.msrb.gmra.mxu0 %vm83_vm2, %v308_v17  ;;  %2162 = vmatmul.msk.f32.vlgmr.msrb.gmra.mxu1 %vm83_vm2, %v308_v17  ;;  %vm894_vm14 = vcmask 523526   ;;  %vm2058_vm15 = vcmask 517120   ;;  %vm2106_vm1 = vcmask 15360  }
  0x15   :  { %2163 = vmatpush.msk.msrb.mxu2 %vm86_vm0, %v2391_v0  ;;  %2165 = vmatpush.msk.msrb.mxu3 %vm86_vm0, %v2393_v1 }
  0x16   :  { %561 = vmatpush.msrb.mxu0 %v2459_v20  ;;  %581 = vmatpush.msrb.mxu1 %v2461_v21 }
  0x18   :  { %562 = vmatpush.msrb.mxu0 %v2472_v25  ;;  %582 = vmatpush.msrb.mxu1 %v2474_v26 }
  0x1a   :  { %563 = vmatpush.msrb.mxu0 %v2481_v28  ;;  %583 = vmatpush.msrb.mxu1 %v2483_v29 }
  0x1b   :  { %2156 = vmatmul.msk.f32.vlgmr.msra.gmra.mxu2 %vm83_vm2, %v252_v30  ;;  %2158 = vmatmul.msk.f32.vlgmr.msra.gmra.mxu3 %vm83_vm2, %v252_v30 }
  0x1c   :  { %2168 = vmatmul.msk.f32.vlgmr.msra.gmra.mxu0 %vm83_vm2, %v414_v31  ;;  %2170 = vmatmul.msk.f32.vlgmr.msra.gmra.mxu1 %vm83_vm2, %v414_v31 }
  0x1d   :  { %2171 = vmatpush.msk.msra.mxu2 %vm86_vm0, %v2391_v0  ;;  %2173 = vmatpush.msk.msra.mxu3 %vm86_vm0, %v2393_v1  ;;  %vm2104_vm0 = vcmask 7168  }
  0x1e   :  { %564 = vmatpush.msrb.mxu0 %v2496_v33  ;;  %584 = vmatpush.msrb.mxu1 %v2498_v34 }
  0x20   :  { %565 = vmatpush.msrb.mxu0 %v2509_v37  ;;  %585 = vmatpush.msrb.mxu1 %v2511_v38 }
  0x22   :  { %566 = vmatpush.msrb.mxu0 %v2515_v39  ;;  %586 = vmatpush.msrb.mxu1 %v2517_v40 }
  0x23   :  { %2164 = vmatmul.msk.f32.vlgmr.msrb.gmra.mxu2 %vm83_vm2, %v358_v41  ;;  %2166 = vmatmul.msk.f32.vlgmr.msrb.gmra.mxu3 %vm83_vm2, %v358_v41 }
  0x24   :  { %567 = vmatpush.msrb.mxu0 %v2525_v43  ;;  %587 = vmatpush.msrb.mxu1 %v2527_v44 }
  0x25   :  { %642 = vmatpush.msrb.mxu2 %v2459_v20  ;;  %662 = vmatpush.msrb.mxu3 %v2461_v21 }
  0x26   :  { %568 = vmatpush.msrb.mxu0 %v2533_v45  ;;  %588 = vmatpush.msrb.mxu1 %v2535_v46 }
  0x27   :  { %569 = vmatmul.f32.vlgmr.msrb.gmra.mxu0 %v2368_v49  ;;  %589 = vmatmul.f32.vlgmr.msrb.gmra.mxu1 %v2368_v49 }
  0x28   :  { %643 = vmatpush.msrb.mxu2 %v2472_v25  ;;  %663 = vmatpush.msrb.mxu3 %v2474_v26 }
  0x29   :  { %735 = vmatpush.msra.mxu0 %v2459_v20  ;;  %755 = vmatpush.msra.mxu1 %v2461_v21 }
  0x2a   :  { %644 = vmatpush.msrb.mxu2 %v2481_v28  ;;  %664 = vmatpush.msrb.mxu3 %v2483_v29 }
  0x2b   :  { %2172 = vmatmul.msk.f32.vlgmr.msra.gmra.mxu2 %vm83_vm2, %v470_v50  ;;  %2174 = vmatmul.msk.f32.vlgmr.msra.gmra.mxu3 %vm83_vm2, %v470_v50 }
  0x2c   :  { %645 = vmatpush.msrb.mxu2 %v2496_v33  ;;  %665 = vmatpush.msrb.mxu3 %v2498_v34 }
  0x2d   :  { %736 = vmatpush.msra.mxu0 %v2472_v25  ;;  %756 = vmatpush.msra.mxu1 %v2474_v26 }
  0x2e   :  { %646 = vmatpush.msrb.mxu2 %v2509_v37  ;;  %666 = vmatpush.msrb.mxu3 %v2511_v38 }
  0x2f   :  { %737 = vmatpush.msra.mxu0 %v2481_v28  ;;  %757 = vmatpush.msra.mxu1 %v2483_v29 }
  0x30   :  { %647 = vmatpush.msrb.mxu2 %v2515_v39  ;;  %667 = vmatpush.msrb.mxu3 %v2517_v40 }
  0x31   :  { %738 = vmatpush.msra.mxu0 %v2496_v33  ;;  %758 = vmatpush.msra.mxu1 %v2498_v34 }
  0x32   :  { %648 = vmatpush.msrb.mxu2 %v2525_v43  ;;  %668 = vmatpush.msrb.mxu3 %v2527_v44 }
  0x33   :  { %739 = vmatpush.msra.mxu0 %v2509_v37  ;;  %759 = vmatpush.msra.mxu1 %v2511_v38 }
  0x34   :  { %649 = vmatpush.msrb.mxu2 %v2533_v45  ;;  %669 = vmatpush.msrb.mxu3 %v2535_v46 }
  0x35   :  { %740 = vmatpush.msra.mxu0 %v2515_v39  ;;  %760 = vmatpush.msra.mxu1 %v2517_v40 }
  0x36   :  { %828 = vmatpush.msra.mxu2 %v2459_v20  ;;  %848 = vmatpush.msra.mxu3 %v2461_v21 }
  0x37   :  { %741 = vmatpush.msra.mxu0 %v2525_v43  ;;  %761 = vmatpush.msra.mxu1 %v2527_v44 }
  0x38   :  { %829 = vmatpush.msra.mxu2 %v2472_v25  ;;  %849 = vmatpush.msra.mxu3 %v2474_v26 }
  0x39   :  { %742 = vmatpush.msra.mxu0 %v2533_v45  ;;  %762 = vmatpush.msra.mxu1 %v2535_v46 }
  0x3a   :  { %830 = vmatpush.msra.mxu2 %v2481_v28  ;;  %850 = vmatpush.msra.mxu3 %v2483_v29 }
  0x3b   :  { %921 = vmatpush.msrb.mxu0 %v2459_v20  ;;  %941 = vmatpush.msrb.mxu1 %v2461_v21 }
  0x3c   :  { %831 = vmatpush.msra.mxu2 %v2496_v33  ;;  %851 = vmatpush.msra.mxu3 %v2498_v34 }
  0x3d   :  { %922 = vmatpush.msrb.mxu0 %v2472_v25  ;;  %942 = vmatpush.msrb.mxu1 %v2474_v26 }
  0x3e   :  { %832 = vmatpush.msra.mxu2 %v2509_v37  ;;  %852 = vmatpush.msra.mxu3 %v2511_v38 }
  0x3f   :  { %923 = vmatpush.msrb.mxu0 %v2481_v28  ;;  %943 = vmatpush.msrb.mxu1 %v2483_v29 }
  0x40   :  { %833 = vmatpush.msra.mxu2 %v2515_v39  ;;  %853 = vmatpush.msra.mxu3 %v2517_v40 }
  0x41   :  { %924 = vmatpush.msrb.mxu0 %v2496_v33  ;;  %944 = vmatpush.msrb.mxu1 %v2498_v34 }
  0x42   :  { %834 = vmatpush.msra.mxu2 %v2525_v43  ;;  %854 = vmatpush.msra.mxu3 %v2527_v44 }
  0x43   :  { %925 = vmatpush.msrb.mxu0 %v2509_v37  ;;  %945 = vmatpush.msrb.mxu1 %v2511_v38 }
  0x44   :  { %835 = vmatpush.msra.mxu2 %v2533_v45  ;;  %855 = vmatpush.msra.mxu3 %v2535_v46 }
  0x45   :  { %926 = vmatpush.msrb.mxu0 %v2515_v39  ;;  %946 = vmatpush.msrb.mxu1 %v2517_v40 }
  0x47   :  { %927 = vmatpush.msrb.mxu0 %v2525_v43  ;;  %947 = vmatpush.msrb.mxu1 %v2527_v44 }
  0x49   :  { %928 = vmatpush.msrb.mxu0 %v2533_v45  ;;  %948 = vmatpush.msrb.mxu1 %v2535_v46 }
  0x89   :  { %v216_v54 = vpop.f32.mrf.mxu0  ;;  %v236_v55 = vpop.f32.mrf.mxu1 }
  0x8a   :  { %v217_v56 = vadd.f32 %v216_v54, %v74_v52  ;;  %v237_v57 = vadd.f32 %v236_v55, %v75_v53  ;;  %v29_v54 = vand.u32 127, %v28_v36 }
  0x8c   :  { %v241_v58 = vrot.slane %v217_v56, 4  ;;  %v242_v59 = vrot.slane %v237_v57, 4  ;;  %v30_v55 = vadd.s32 128, %v29_v54  ;;  %v45_v56 = vand.u32 63, %v29_v54 }
  0x8e   :  { %245 = vst [vmem:[#allocation2 + $0x10] sm:$0x30] %v241_v58  ;;  %v110_v60 = vpop.f32.mrf.mxu2  ;;  %v130_v61 = vpop.f32.mrf.mxu3  ;;  %v52_v57 = vand.u32 63, %v30_v55  ;;  %vm34_vm3 = vcmp.lt.s32.totalorder %v30_v55, 192  ;;  %vm2613_vm4 = vcmp.lt.s32.totalorder %v45_v56, 32 }
  0x8f   :  { %246 = vst [vmem:[#allocation2] sm:$0x30] %v242_v59  ;;  %v111_v62 = vadd.f32 %v110_v60, %v74_v52  ;;  %v131_v63 = vadd.f32 %v130_v61, %v75_v53 }
  0x90   :  { %vm2619_vm5 = vcmp.lt.s32.totalorder %v52_v57, 32 }
  0x91   :  { %133 = vst [vmem:[#allocation2 + $0x10] sm:$0x3] %v111_v62  ;;  %v328_v0 = vpop.f32.mrf.mxu0  ;;  %v348_v1 = vpop.f32.mrf.mxu1 }
  0x92   :  { %134 = vst [vmem:[#allocation2] sm:$0x3] %v131_v63  ;;  %v329_v2 = vadd.f32 %v328_v0, %v74_v52  ;;  %v349_v3 = vadd.f32 %v348_v1, %v75_v53 }
  0x94   :  { %351 = vst [vmem:[#allocation2 + $0x18] sm:$0x3] %v329_v2 }
  0x95   :  { %352 = vst [vmem:[#allocation2 + $0x8] sm:$0x3] %v349_v3 }
  0x96   :  { %v160_v4 = vpop.f32.mrf.mxu2  ;;  %v180_v5 = vpop.f32.mrf.mxu3 }
  0x97   :  { %v161_v6 = vadd.f32 %v160_v4, %v74_v52  ;;  %v181_v7 = vadd.f32 %v180_v5, %v75_v53  ;;  %v2369_v4 = vmov 0.5  }
  0x98   :  { %v537_v63 = vld [vmem:[#allocation2 + $0x10] sm:$0x3]  ;;  %v2624_v5 = vsel %vm34_vm3, 1.0, %v2369_v4 }
  0x99   :  { %v185_v8 = vrot.slane %v161_v6, 6  ;;  %v186_v9 = vrot.slane %v181_v7, 6  ;;  %v434_v10 = vpop.f32.mrf.mxu0  ;;  %v454_v11 = vpop.f32.mrf.mxu1  ;;  %v538_v2 = vld [vmem:[#allocation2] sm:$0x3] }
  0x9a   :  { %v435_v12 = vadd.f32 %v434_v10, %v74_v52  ;;  %v455_v13 = vadd.f32 %v454_v11, %v75_v53 }
  0x9b   :  { %189 = vst [vmem:[#allocation2 + $0x10] sm:$0xc] %v185_v8 }
  0x9c   :  { %190 = vst [vmem:[#allocation2] sm:$0xc] %v186_v9  ;;  %v459_v14 = vrot.slane %v435_v12, 4  ;;  %v460_v15 = vrot.slane %v455_v13, 4  ;;  %v2630_v13 = vsel %vm34_vm3, 0.0, %v2369_v4  ;;  %vm2108_vm3 = vcmask 23552  }
  0x9e   :  { %463 = vst [vmem:[#allocation2 + $0x18] sm:$0x30] %v459_v14  ;;  %v272_v16 = vpop.f32.mrf.mxu2  ;;  %v292_v17 = vpop.f32.mrf.mxu3 }
  0x9f   :  { %464 = vst [vmem:[#allocation2 + $0x8] sm:$0x30] %v460_v15  ;;  %v273_v18 = vadd.f32 %v272_v16, %v74_v52  ;;  %v293_v19 = vadd.f32 %v292_v17, %v75_v53 }
  0xa1   :  { %v297_v22 = vrot.slane %v273_v18, 2  ;;  %v298_v23 = vrot.slane %v293_v19, 2 }
  0xa3   :  { %301 = vst [vmem:[#allocation2 + $0x10] sm:$0xc0] %v297_v22 }
  0xa4   :  { %302 = vst [vmem:[#allocation2] sm:$0xc0] %v298_v23  ;;  %v570_v60 = vpop.f32.mrf.mxu0 }
  0xa6   :  { %v378_v24 = vpop.f32.mrf.mxu2  ;;  %v398_v27 = vpop.f32.mrf.mxu3 }
  0xa7   :  { %v379_v30 = vadd.f32 %v378_v24, %v74_v52  ;;  %v399_v31 = vadd.f32 %v398_v27, %v75_v53 }
  0xa9   :  { %v403_v32 = vrot.slane %v379_v30, 6  ;;  %v404_v35 = vrot.slane %v399_v31, 6  ;;  %v622_v30 = vld [vmem:[#allocation2 + $0x18] sm:$0x30]  ;;  %v623_v31 = vld [vmem:[#allocation2 + $0x8] sm:$0x30] }
  0xab   :  { %407 = vst [vmem:[#allocation2 + $0x18] sm:$0xc] %v403_v32  ;;  %v626_v32 = vrot.slane %v622_v30, 2 }
  0xac   :  { %408 = vst [vmem:[#allocation2 + $0x8] sm:$0xc] %v404_v35  ;;  %v627_v35 = vrot.slane %v623_v31, 2 }
  0xae   :  { %v490_v41 = vpop.f32.mrf.mxu2  ;;  %v510_v42 = vpop.f32.mrf.mxu3 }
  0xaf   :  { %v491_v47 = vadd.f32 %v490_v41, %v74_v52  ;;  %v511_v48 = vadd.f32 %v510_v42, %v75_v53  ;;  %v590_v53 = vpop.f32.mrf.mxu1  ;;  %v620_v42 = vld [vmem:[#allocation2 + $0x10] sm:$0xc] }
  0xb1   :  { %v515_v50 = vrot.slane %v491_v47, 2  ;;  %v516_v51 = vrot.slane %v511_v48, 2  ;;  %v621_v48 = vld [vmem:[#allocation2] sm:$0xc] }
  0xb2   :  { %v631_v54 = vsel %vm2619_vm5, %v621_v48, %v627_v35 }
  0xb3   :  { %519 = vst [vmem:[#allocation2 + $0x18] sm:$0xc0] %v515_v50 }
  0xb4   :  { %520 = vst [vmem:[#allocation2 + $0x8] sm:$0xc0] %v516_v51  ;;  %v630_v51 = vsel %vm2613_vm4, %v620_v42, %v626_v32 }
  0xba   :  { %v539_v58 = vld [vmem:[#allocation2 + $0x18] sm:$0xc0] }
  0xbb   :  { %v543_v59 = vrot.slane %v539_v58, 6  ;;  %v540_v61 = vld [vmem:[#allocation2 + $0x8] sm:$0xc0] }
  0xbc   :  { %v544_v52 = vrot.slane %v540_v61, 6 }
  0xbd   :  { %v547_v0 = vsel %vm2613_vm4, %v537_v63, %v543_v59 }
  0xbe   :  { %v593_v3 = vadd.f32 %v570_v60, %v547_v0  ;;  %v548_v6 = vsel %vm2619_vm5, %v538_v2, %v544_v52 }
  0xbf   :  { %v594_v7 = vadd.f32 %v590_v53, %v548_v6 }
  0xc0   :  { %v595_v8 = vmul.f32 0.5, %v593_v3 }
  0xc1   :  { %v596_v9 = vmul.f32 %v594_v7, %v2624_v5 }
  0xc2   :  { %2217 = vtanh.f32 %v595_v8 }
  0xc3   :  { %2219 = vtanh.f32 %v596_v9 }
  0xc8   :  { %v2218_v10 = vpop.eup %2217 }
  0xc9   :  { %v2220_v11 = vpop.eup %2219  ;;  %v599_v12 = vmul.f32 0.5, %v2218_v10 }
  0xca   :  { %v600_v14 = vmul.f32 %v2220_v11, %v2624_v5  ;;  %v712_v11 = vld [vmem:[#allocation2 + $0x18] sm:$0xc] }
  0xcb   :  { %v601_v15 = vadd.f32 0.5, %v599_v12  ;;  %v713_v12 = vld [vmem:[#allocation2 + $0x8] sm:$0xc] }
  0xcc   :  { %v602_v16 = vadd.f32 %v600_v14, %v2630_v13  ;;  %v716_v14 = vrot.slane %v712_v11, 6 }
  0xcd   :  { %v603_v18 = vmul.f32 0.0, %v601_v15 }
  0xce   :  { %v604_v17 = vmul.f32 %v602_v16, %v601_v15  ;;  %v717_v15 = vrot.slane %v713_v12, 6 }
  0xd0   :  { %606 = vrot.lane.b32.xlu0 %v604_v17, %s2370_s0 }
 0x142   :  { %v607_v19 = vpop.permute.xlu0 %606 }
 0x143   :  { %v609_v22 = vadd.f32 %v607_v19, %v603_v18  ;;  %v710_v18 = vld [vmem:[#allocation2 + $0x10] sm:$0x30] }
 0x145   :  { %2221 = vtanh.f32 %v609_v22  ;;  %v691_v52 = vrot.slane %v609_v22, 6  ;;  %v711_v22 = vld [vmem:[#allocation2] sm:$0x30] }
 0x14b   :  { %v2222_v23 = vpop.eup %2221 }
 0x14c   :  { %v611_v24 = vmul.f32 %v2222_v23, %v602_v16 }
 0x14e   :  { %613 = vrot.lane.b32.xlu0 %v611_v24, %s2370_s0  ;;  %v720_v24 = vsel %vm2613_vm4, %v710_v18, %v716_v14 }
 0x1c0   :  { %v614_v27 = vpop.permute.xlu0 %613 }
 0x1c1   :  { %617 = vst.msk [vmem:[#allocation3] sm:$0x3] %vm616_vm6, %v614_v27  ;;  %2175 = vmatmul.msk.f32.vlgmr.msrb.gmra.mxu2 %vm549_vm7, %v614_v27  ;;  %2176 = vmatmul.msk.f32.vlgmr.msrb.gmra.mxu3 %vm549_vm7, %v614_v27 }
 0x1c2   :  { %619 = vst.msk [vmem:[#allocation3 + $0xe] sm:$0x3] %vm618_vm8, %v614_v27  ;;  %1003 = vmatpush.msrb.mxu2 %v2459_v20  ;;  %1023 = vmatpush.msrb.mxu3 %v2461_v21  ;;  %v721_v27 = vsel %vm2619_vm5, %v711_v22, %v717_v15  ;;  %v896_v22 = vld [vmem:[#allocation2 + $0x18] sm:$0x3] }
 0x1c4   :  { %1004 = vmatpush.msrb.mxu2 %v2472_v25  ;;  %1024 = vmatpush.msrb.mxu3 %v2474_v26 }
 0x1c6   :  { %1005 = vmatpush.msrb.mxu2 %v2481_v28  ;;  %1025 = vmatpush.msrb.mxu3 %v2483_v29 }
 0x1c8   :  { %1006 = vmatpush.msrb.mxu2 %v2496_v33  ;;  %1026 = vmatpush.msrb.mxu3 %v2498_v34 }
 0x1ca   :  { %1007 = vmatpush.msrb.mxu2 %v2509_v37  ;;  %1027 = vmatpush.msrb.mxu3 %v2511_v38 }
 0x1cc   :  { %1008 = vmatpush.msrb.mxu2 %v2515_v39  ;;  %1028 = vmatpush.msrb.mxu3 %v2517_v40 }
 0x1ce   :  { %1009 = vmatpush.msrb.mxu2 %v2525_v43  ;;  %1029 = vmatpush.msrb.mxu3 %v2527_v44 }
 0x1d0   :  { %1010 = vmatpush.msrb.mxu2 %v2533_v45  ;;  %1030 = vmatpush.msrb.mxu3 %v2535_v46 }
 0x244   :  { %v651_v36 = vpop.f32.mrf.mxu2  ;;  %v671_v41 = vpop.f32.mrf.mxu3 }
 0x245   :  { %v676_v47 = vrot.slane %v651_v36, 6  ;;  %v677_v50 = vrot.slane %v671_v41, 6 }
 0x247   :  { %v680_v55 = vadd.f32 %v676_v47, %v630_v51  ;;  %v681_v56 = vadd.f32 %v677_v50, %v631_v54 }
 0x249   :  { %v682_v57 = vmul.f32 0.5, %v680_v55  ;;  %v683_v58 = vmul.f32 %v681_v56, %v2624_v5 }
 0x24b   :  { %2223 = vtanh.f32 %v682_v57 }
 0x24c   :  { %2225 = vtanh.f32 %v683_v58 }
 0x251   :  { %v2224_v59 = vpop.eup %2223 }
 0x252   :  { %v2226_v60 = vpop.eup %2225  ;;  %v686_v61 = vmul.f32 0.5, %v2224_v59 }
 0x253   :  { %v687_v63 = vmul.f32 %v2226_v60, %v2624_v5 }
 0x254   :  { %v688_v53 = vadd.f32 0.5, %v686_v61 }
 0x255   :  { %v689_v0 = vadd.f32 %v687_v63, %v2630_v13 }
 0x256   :  { %v693_v2 = vmul.f32 %v691_v52, %v688_v53 }
 0x257   :  { %v694_v3 = vmul.f32 %v689_v0, %v688_v53 }
 0x259   :  { %696 = vrot.lane.b32.xlu1 %v694_v3, %s2370_s0 }
 0x2cb   :  { %v697_v4 = vpop.permute.xlu1 %696 }
 0x2cc   :  { %v699_v6 = vadd.f32 %v697_v4, %v693_v2 }
 0x2ce   :  { %2227 = vtanh.f32 %v699_v6  ;;  %v784_v48 = vrot.slane %v699_v6, 6 }
 0x2d4   :  { %v2228_v7 = vpop.eup %2227 }
 0x2d5   :  { %v2664_v8 = vmul.f32 %v2228_v7, %v689_v0 }
 0x2d7   :  { %v722_v9 = vrot.slane %v2664_v8, 2 }
 0x2d9   :  { %723 = vrot.lane.b32.xlu1 %v722_v9, %s2370_s0 }
 0x34b   :  { %v724_v10 = vpop.permute.xlu1 %723 }
 0x34c   :  { %2177 = vmatmul.msk.f32.vlgmr.msra.gmra.mxu0 %vm549_vm7, %v724_v10  ;;  %2178 = vmatmul.msk.f32.vlgmr.msra.gmra.mxu1 %vm549_vm7, %v724_v10 }
 0x34d   :  { %1094 = vmatpush.msra.mxu0 %v2459_v20  ;;  %1114 = vmatpush.msra.mxu1 %v2461_v21 }
 0x34f   :  { %1095 = vmatpush.msra.mxu0 %v2472_v25  ;;  %1115 = vmatpush.msra.mxu1 %v2474_v26 }
 0x351   :  { %1096 = vmatpush.msra.mxu0 %v2481_v28  ;;  %1116 = vmatpush.msra.mxu1 %v2483_v29 }
 0x353   :  { %1097 = vmatpush.msra.mxu0 %v2496_v33  ;;  %1117 = vmatpush.msra.mxu1 %v2498_v34 }
 0x355   :  { %1098 = vmatpush.msra.mxu0 %v2509_v37  ;;  %1118 = vmatpush.msra.mxu1 %v2511_v38 }
 0x357   :  { %1099 = vmatpush.msra.mxu0 %v2515_v39  ;;  %1119 = vmatpush.msra.mxu1 %v2517_v40 }
 0x359   :  { %1100 = vmatpush.msra.mxu0 %v2525_v43  ;;  %1120 = vmatpush.msra.mxu1 %v2527_v44 }
 0x35b   :  { %1101 = vmatpush.msra.mxu0 %v2533_v45  ;;  %1121 = vmatpush.msra.mxu1 %v2535_v46 }
 0x3c9   :  { %v744_v16 = vpop.f32.mrf.mxu0  ;;  %v764_v17 = vpop.f32.mrf.mxu1 }
 0x3ca   :  { %v769_v19 = vrot.slane %v744_v16, 4  ;;  %v770_v23 = vrot.slane %v764_v17, 4  ;;  %v898_v16 = vld [vmem:[#allocation2 + $0x10] sm:$0xc0]  ;;  %v899_v17 = vld [vmem:[#allocation2] sm:$0xc0] }
 0x3cb   :  { %v902_v18 = vrot.slane %v898_v16, 6 }
 0x3cc   :  { %v773_v30 = vadd.f32 %v769_v19, %v720_v24  ;;  %v774_v31 = vadd.f32 %v770_v23, %v721_v27  ;;  %v903_v19 = vrot.slane %v899_v17, 6  ;;  %v897_v23 = vld [vmem:[#allocation2 + $0x8] sm:$0x3] }
 0x3cd   :  { %v906_v24 = vsel %vm2613_vm4, %v896_v22, %v902_v18  ;;  %v1072_v22 = vld [vmem:[#allocation2] sm:$0xc] }
 0x3ce   :  { %v775_v32 = vmul.f32 0.5, %v773_v30  ;;  %v776_v35 = vmul.f32 %v774_v31, %v2624_v5  ;;  %v907_v30 = vsel %vm2619_vm5, %v897_v23, %v903_v19  ;;  %v1071_v19 = vld [vmem:[#allocation2 + $0x10] sm:$0xc] }
 0x3cf   :  { %v1075_v23 = vrot.slane %v1071_v19, 6 }
 0x3d0   :  { %2229 = vtanh.f32 %v775_v32 }
 0x3d1   :  { %2231 = vtanh.f32 %v776_v35 }
 0x3d6   :  { %v2230_v36 = vpop.eup %2229 }
 0x3d7   :  { %v2232_v41 = vpop.eup %2231  ;;  %v779_v42 = vmul.f32 0.5, %v2230_v36 }
 0x3d8   :  { %v780_v47 = vmul.f32 %v2232_v41, %v2624_v5 }
 0x3d9   :  { %v781_v50 = vadd.f32 0.5, %v779_v42 }
 0x3da   :  { %v782_v51 = vadd.f32 %v780_v47, %v2630_v13 }
 0x3db   :  { %v786_v54 = vmul.f32 %v784_v48, %v781_v50 }
 0x3dc   :  { %v787_v55 = vmul.f32 %v782_v51, %v781_v50 }
 0x3de   :  { %789 = vrot.lane.b32.xlu2 %v787_v55, %s2370_s0 }
 0x438   :  { %v790_v56 = vpop.permute.xlu2 %789 }
 0x439   :  { %v792_v57 = vadd.f32 %v790_v56, %v786_v54 }
 0x43b   :  { %2233 = vtanh.f32 %v792_v57  ;;  %v877_v2 = vrot.slane %v792_v57, 6 }
 0x441   :  { %v2234_v58 = vpop.eup %2233 }
 0x442   :  { %v2694_v59 = vmul.f32 %v2234_v58, %v782_v51 }
 0x444   :  { %v815_v60 = vrot.slane %v2694_v59, 4 }
 0x446   :  { %816 = vrot.lane.b32.xlu2 %v815_v60, %s2370_s0 }
 0x4a0   :  { %v817_v61 = vpop.permute.xlu2 %816 }
 0x4a1   :  { %2179 = vmatmul.msk.f32.vlgmr.msra.gmra.mxu2 %vm549_vm7, %v817_v61  ;;  %2180 = vmatmul.msk.f32.vlgmr.msra.gmra.mxu3 %vm549_vm7, %v817_v61 }
 0x4a2   :  { %1185 = vmatpush.msra.mxu2 %v2459_v20  ;;  %1205 = vmatpush.msra.mxu3 %v2461_v21  ;;  %v805_v20 = vld [vmem:[#allocation2 + $0x18] sm:$0x3]  ;;  %v806_v21 = vld [vmem:[#allocation2 + $0x8] sm:$0x3] }
 0x4a4   :  { %1186 = vmatpush.msra.mxu2 %v2472_v25  ;;  %1206 = vmatpush.msra.mxu3 %v2474_v26  ;;  %v809_v25 = vrot.slane %v805_v20, 2  ;;  %v810_v26 = vrot.slane %v806_v21, 2 }
 0x4a6   :  { %1187 = vmatpush.msra.mxu2 %v2481_v28  ;;  %1207 = vmatpush.msra.mxu3 %v2483_v29  ;;  %v803_v28 = vld [vmem:[#allocation2 + $0x10] sm:$0xc0]  ;;  %v804_v29 = vld [vmem:[#allocation2] sm:$0xc0] }
 0x4a8   :  { %1188 = vmatpush.msra.mxu2 %v2496_v33  ;;  %1208 = vmatpush.msra.mxu3 %v2498_v34 }
 0x4aa   :  { %1189 = vmatpush.msra.mxu2 %v2509_v37  ;;  %1209 = vmatpush.msra.mxu3 %v2511_v38 }
 0x4ac   :  { %1190 = vmatpush.msra.mxu2 %v2515_v39  ;;  %1210 = vmatpush.msra.mxu3 %v2517_v40  ;;  %v813_v39 = vsel %vm2613_vm4, %v803_v28, %v809_v25  ;;  %v814_v40 = vsel %vm2619_vm5, %v804_v29, %v810_v26  ;;  %v983_v25 = vld [vmem:[#allocation2 + $0x10] sm:$0x30]  ;;  %v984_v26 = vld [vmem:[#allocation2] sm:$0x30] }
 0x4ad   :  { %v987_v28 = vrot.slane %v983_v25, 2  ;;  %v988_v29 = vrot.slane %v984_v26, 2 }
 0x4ae   :  { %1191 = vmatpush.msra.mxu2 %v2525_v43  ;;  %1211 = vmatpush.msra.mxu3 %v2527_v44 }
 0x4b0   :  { %1192 = vmatpush.msra.mxu2 %v2533_v45  ;;  %1212 = vmatpush.msra.mxu3 %v2535_v46 }
 0x524   :  { %v837_v33 = vpop.f32.mrf.mxu2  ;;  %v857_v34 = vpop.f32.mrf.mxu3 }
 0x525   :  { %v862_v37 = vrot.slane %v837_v33, 2  ;;  %v863_v38 = vrot.slane %v857_v34, 2  ;;  %v981_v33 = vld [vmem:[#allocation2 + $0x18] sm:$0xc]  ;;  %v982_v34 = vld [vmem:[#allocation2 + $0x8] sm:$0xc] }
 0x527   :  { %v866_v43 = vadd.f32 %v862_v37, %v813_v39  ;;  %v867_v44 = vadd.f32 %v863_v38, %v814_v40 }
 0x529   :  { %v868_v45 = vmul.f32 0.5, %v866_v43  ;;  %v869_v46 = vmul.f32 %v867_v44, %v2624_v5  ;;  %v991_v43 = vsel %vm2613_vm4, %v981_v33, %v987_v28  ;;  %v992_v44 = vsel %vm2619_vm5, %v982_v34, %v988_v29 }
 0x52b   :  { %2235 = vtanh.f32 %v868_v45 }
 0x52c   :  { %2237 = vtanh.f32 %v869_v46 }
 0x531   :  { %v2236_v63 = vpop.eup %2235 }
 0x532   :  { %v2238_v52 = vpop.eup %2237  ;;  %v872_v53 = vmul.f32 0.5, %v2236_v63 }
 0x533   :  { %v873_v0 = vmul.f32 %v2238_v52, %v2624_v5 }
 0x534   :  { %v874_v3 = vadd.f32 0.5, %v872_v53 }
 0x535   :  { %v875_v4 = vadd.f32 %v873_v0, %v2630_v13 }
 0x536   :  { %v879_v6 = vmul.f32 %v877_v2, %v874_v3 }
 0x537   :  { %v880_v7 = vmul.f32 %v875_v4, %v874_v3 }
 0x539   :  { %882 = vrot.lane.b32.xlu0 %v880_v7, %s2370_s0 }
 0x5ab   :  { %v883_v9 = vpop.permute.xlu0 %882 }
 0x5ac   :  { %v885_v10 = vadd.f32 %v883_v9, %v879_v6 }
 0x5ae   :  { %2239 = vtanh.f32 %v885_v10  ;;  %v964_v51 = vrot.slane %v885_v10, 6 }
 0x5b4   :  { %v2240_v11 = vpop.eup %2239 }
 0x5b5   :  { %v2724_v12 = vmul.f32 %v2240_v11, %v875_v4 }
 0x5b7   :  { %v908_v14 = vrot.slane %v2724_v12, 6 }
 0x5b9   :  { %909 = vrot.lane.b32.xlu1 %v908_v14, %s2370_s0 }
 0x62b   :  { %v910_v15 = vpop.permute.xlu1 %909 }
 0x62c   :  { %2181 = vmatmul.msk.f32.vlgmr.msrb.gmra.mxu0 %vm549_vm7, %v910_v15  ;;  %2182 = vmatmul.msk.f32.vlgmr.msrb.gmra.mxu1 %vm549_vm7, %v910_v15 }
 0x6a9   :  { %v930_v27 = vpop.f32.mrf.mxu0  ;;  %v950_v31 = vpop.f32.mrf.mxu1 }
 0x6aa   :  { %v953_v32 = vadd.f32 %v930_v27, %v906_v24  ;;  %v954_v35 = vadd.f32 %v950_v31, %v907_v30  ;;  %v1076_v24 = vrot.slane %v1072_v22, 6  ;;  %v1069_v27 = vld [vmem:[#allocation2 + $0x18] sm:$0x30]  ;;  %v1070_v30 = vld [vmem:[#allocation2 + $0x8] sm:$0x30] }
 0x6ac   :  { %v955_v36 = vmul.f32 0.5, %v953_v32  ;;  %v956_v41 = vmul.f32 %v954_v35, %v2624_v5 }
 0x6ae   :  { %2241 = vtanh.f32 %v955_v36 }
 0x6af   :  { %2243 = vtanh.f32 %v956_v41  ;;  %v1079_v41 = vsel %vm2613_vm4, %v1069_v27, %v1075_v23  ;;  %v1266_v27 = vld [vmem:[#allocation4 + $0x118] sm:$0xff] }
 0x6b0   :  { %1313 = vmatpush.msrb.mxu1 %v1266_v27 }
 0x6b4   :  { %v2242_v42 = vpop.eup %2241 }
 0x6b5   :  { %v2244_v47 = vpop.eup %2243  ;;  %v959_v48 = vmul.f32 0.5, %v2242_v42  ;;  %v1080_v42 = vsel %vm2619_vm5, %v1070_v30, %v1076_v24  ;;  %v1265_v24 = vld [vmem:[#allocation4 + $0x110] sm:$0xff]  ;;  %v1263_v30 = vld [vmem:[#allocation4 + $0x100] sm:$0xff] }
 0x6b6   :  { %v960_v50 = vmul.f32 %v2244_v47, %v2624_v5  ;;  %1290 = vmatpush.msrb.mxu0 %v1265_v24 }
 0x6b7   :  { %v961_v54 = vadd.f32 0.5, %v959_v48 }
 0x6b8   :  { %v962_v55 = vadd.f32 %v960_v50, %v2630_v13  ;;  %1291 = vmatpush.msrb.mxu0 %v1263_v30 }
 0x6b9   :  { %v966_v56 = vmul.f32 %v964_v51, %v961_v54 }
 0x6ba   :  { %v967_v57 = vmul.f32 %v962_v55, %v961_v54 }
 0x6bc   :  { %969 = vrot.lane.b32.xlu2 %v967_v57, %s2370_s0 }
 0x716   :  { %v970_v58 = vpop.permute.xlu2 %969 }
 0x717   :  { %v972_v60 = vadd.f32 %v970_v58, %v966_v56 }
 0x719   :  { %2245 = vtanh.f32 %v972_v60  ;;  %v1052_v4 = vrot.slane %v972_v60, 6 }
 0x71f   :  { %v2246_v61 = vpop.eup %2245 }
 0x720   :  { %v974_v20 = vmul.f32 %v2246_v61, %v962_v55 }
 0x722   :  { %976 = vrot.lane.b32.xlu0 %v974_v20, %s2370_s0 }
 0x794   :  { %v2739_v21 = vpop.permute.xlu0 %976 }
 0x795   :  { %2183 = vmatmul.msk.f32.vlgmr.msrb.gmra.mxu2 %vm549_vm7, %v2739_v21  ;;  %2184 = vmatmul.msk.f32.vlgmr.msrb.gmra.mxu3 %vm549_vm7, %v2739_v21 }
 0x818   :  { %v1012_v37 = vpop.f32.mrf.mxu2  ;;  %v1032_v38 = vpop.f32.mrf.mxu3 }
 0x819   :  { %v1037_v39 = vrot.slane %v1012_v37, 6  ;;  %v1038_v40 = vrot.slane %v1032_v38, 6 }
 0x81b   :  { %v1041_v45 = vadd.f32 %v1037_v39, %v991_v43  ;;  %v1042_v46 = vadd.f32 %v1038_v40, %v992_v44  ;;  %v1162_v40 = vld [vmem:[#allocation2 + $0x10] sm:$0x3]  ;;  %v1163_v43 = vld [vmem:[#allocation2] sm:$0x3]  ;;  %v1160_v44 = vld [vmem:[#allocation2 + $0x18] sm:$0xc0] }
 0x81d   :  { %v1043_v63 = vmul.f32 0.5, %v1041_v45  ;;  %v1044_v52 = vmul.f32 %v1042_v46, %v2624_v5  ;;  %v1161_v45 = vld [vmem:[#allocation2 + $0x8] sm:$0xc0]  ;;  %v1166_v46 = vrot.slane %v1162_v40, 2 }
 0x81e   :  { %v2842_v40 = vld [vmem:[#allocation4 + $0x138] sm:$0xff] }
 0x81f   :  { %2247 = vtanh.f32 %v1043_v63 }
 0x820   :  { %2249 = vtanh.f32 %v1044_v52  ;;  %v1167_v52 = vrot.slane %v1163_v43, 2  ;;  %v2848_v43 = vld [vmem:[#allocation4 + $0x120] sm:$0xff] }
 0x825   :  { %v2248_v53 = vpop.eup %2247 }
 0x826   :  { %v2250_v0 = vpop.eup %2249  ;;  %v1047_v2 = vmul.f32 0.5, %v2248_v53 }
 0x827   :  { %v1048_v3 = vmul.f32 %v2250_v0, %v2624_v5 }
 0x828   :  { %v1049_v6 = vadd.f32 0.5, %v1047_v2 }
 0x829   :  { %v1050_v7 = vadd.f32 %v1048_v3, %v2630_v13  ;;  %v1170_v3 = vsel %vm2613_vm4, %v1160_v44, %v1166_v46  ;;  %v2850_v44 = vld [vmem:[#allocation4 + $0x128] sm:$0xff] }
 0x82a   :  { %v1054_v9 = vmul.f32 %v1052_v4, %v1049_v6  ;;  %v1171_v4 = vsel %vm2619_vm5, %v1161_v45, %v1167_v52 }
 0x82b   :  { %v1055_v10 = vmul.f32 %v1050_v7, %v1049_v6 }
 0x82d   :  { %1057 = vrot.lane.b32.xlu1 %v1055_v10, %s2370_s0 }
 0x89f   :  { %v1058_v11 = vpop.permute.xlu1 %1057 }
 0x8a0   :  { %v1060_v14 = vadd.f32 %v1058_v11, %v1054_v9 }
 0x8a2   :  { %2251 = vtanh.f32 %v1060_v14  ;;  %v1143_v58 = vrot.slane %v1060_v14, 6 }
 0x8a8   :  { %v2252_v15 = vpop.eup %2251 }
 0x8a9   :  { %v1062_v16 = vmul.f32 %v2252_v15, %v1050_v7 }
 0x8ab   :  { %v1081_v17 = vrot.slane %v1062_v16, 2 }
 0x8ad   :  { %1082 = vrot.lane.b32.xlu2 %v1081_v17, %s2370_s0 }
 0x907   :  { %v1083_v18 = vpop.permute.xlu2 %1082 }
 0x908   :  { %2185 = vmatmul.msk.f32.vlgmr.msra.gmra.mxu0 %vm549_vm7, %v1083_v18  ;;  %2186 = vmatmul.msk.f32.vlgmr.msra.gmra.mxu1 %vm549_vm7, %v1083_v18 }
 0x985   :  { %v1103_v31 = vpop.f32.mrf.mxu0  ;;  %v1123_v32 = vpop.f32.mrf.mxu1 }
 0x986   :  { %v1128_v35 = vrot.slane %v1103_v31, 4  ;;  %v1129_v36 = vrot.slane %v1123_v32, 4  ;;  %v1264_v31 = vld [vmem:[#allocation4 + $0x108] sm:$0xff]  ;;  %v1261_v32 = vld [vmem:[#allocation4 + $0xf0] sm:$0xff] }
 0x987   :  { %1314 = vmatpush.msrb.mxu1 %v1264_v31  ;;  %1292 = vmatpush.msrb.mxu0 %v1261_v32 }
 0x988   :  { %v1132_v47 = vadd.f32 %v1128_v35, %v1079_v41  ;;  %v1133_v48 = vadd.f32 %v1129_v36, %v1080_v42  ;;  %v1262_v35 = vld [vmem:[#allocation4 + $0xf8] sm:$0xff]  ;;  %v1259_v36 = vld [vmem:[#allocation4 + $0xe0] sm:$0xff]  ;;  %v1260_v41 = vld [vmem:[#allocation4 + $0xe8] sm:$0xff] }
 0x989   :  { %1315 = vmatpush.msrb.mxu1 %v1262_v35  ;;  %1293 = vmatpush.msrb.mxu0 %v1259_v36 }
 0x98a   :  { %v1134_v50 = vmul.f32 0.5, %v1132_v47  ;;  %v1135_v51 = vmul.f32 %v1133_v48, %v2624_v5 }
 0x98b   :  { %1316 = vmatpush.msrb.mxu1 %v1260_v41 }
 0x98c   :  { %2253 = vtanh.f32 %v1134_v50 }
 0x98d   :  { %2255 = vtanh.f32 %v1135_v51  ;;  %v1257_v51 = vld [vmem:[#allocation4 + $0xd0] sm:$0xff] }
 0x98e   :  { %1294 = vmatpush.msrb.mxu0 %v1257_v51 }
 0x992   :  { %v2254_v54 = vpop.eup %2253 }
 0x993   :  { %v2256_v55 = vpop.eup %2255  ;;  %v1138_v56 = vmul.f32 0.5, %v2254_v54  ;;  %v1258_v54 = vld [vmem:[#allocation4 + $0xd8] sm:$0xff] }
 0x994   :  { %v1139_v57 = vmul.f32 %v2256_v55, %v2624_v5  ;;  %v1255_v55 = vld [vmem:[#allocation4 + $0xc0] sm:$0xff]  ;;  %1317 = vmatpush.msrb.mxu1 %v1258_v54 }
 0x995   :  { %v1140_v60 = vadd.f32 0.5, %v1138_v56  ;;  %v1256_v56 = vld [vmem:[#allocation4 + $0xc8] sm:$0xff]  ;;  %1295 = vmatpush.msrb.mxu0 %v1255_v55 }
 0x996   :  { %v1141_v61 = vadd.f32 %v1139_v57, %v2630_v13  ;;  %v1253_v57 = vld [vmem:[#allocation4 + $0xb0] sm:$0xff]  ;;  %1318 = vmatpush.msrb.mxu1 %v1256_v56 }
 0x997   :  { %v1145_v20 = vmul.f32 %v1143_v58, %v1140_v60  ;;  %v1254_v58 = vld [vmem:[#allocation4 + $0xb8] sm:$0xff]  ;;  %1296 = vmatpush.msrb.mxu0 %v1253_v57 }
 0x998   :  { %v1146_v25 = vmul.f32 %v1141_v61, %v1140_v60  ;;  %v1251_v60 = vld [vmem:[#allocation4 + $0xa0] sm:$0xff]  ;;  %1319 = vmatpush.msrb.mxu1 %v1254_v58 }
 0x999   :  { %1297 = vmatpush.msrb.mxu0 %v1251_v60 }
 0x99a   :  { %1148 = vrot.lane.b32.xlu0 %v1146_v25, %s2370_s0  ;;  %v2802_v25 = vld [vmem:[#allocation4 + $0x180] sm:$0xff] }
 0x9a2   :  { %703 = vrot.lane.b32.xlu0 %v2664_v8, %s2370_s0 }
 0x9aa   :  { %1064 = vrot.lane.b32.xlu0 %v1062_v16, %s2370_s0 }
 0xa0c   :  { %v1149_v26 = vpop.permute.xlu0 %1148 }
 0xa0d   :  { %v1151_v28 = vadd.f32 %v1149_v26, %v1145_v20  ;;  %v2798_v20 = vld [vmem:[#allocation4 + $0x190] sm:$0xff]  ;;  %v2806_v26 = vld [vmem:[#allocation4 + $0x188] sm:$0xff] }
 0xa0e   :  { %1368 = vmatpush.msrb.mxu2 %v2798_v20  ;;  %1447 = vmatpush.msra.mxu0 %v2798_v20 }
 0xa0f   :  { %2257 = vtanh.f32 %v1151_v28  ;;  %v1234_v17 = vrot.slane %v1151_v28, 6  ;;  %v2808_v28 = vld [vmem:[#allocation4 + $0x170] sm:$0xff] }
 0xa10   :  { %1369 = vmatpush.msrb.mxu2 %v2802_v25  ;;  %1448 = vmatpush.msra.mxu0 %v2802_v25 }
 0xa12   :  { %1370 = vmatpush.msrb.mxu2 %v2808_v28  ;;  %1449 = vmatpush.msra.mxu0 %v2808_v28 }
 0xa14   :  { %v704_v29 = vpop.permute.xlu0 %703 }
 0xa15   :  { %v2258_v33 = vpop.eup %2257  ;;  %707 = vst.msk [vmem:[#allocation3] sm:$0xc] %vm706_vm9, %v704_v29 }
 0xa16   :  { %709 = vst.msk [vmem:[#allocation3 + $0xa] sm:$0xc] %vm708_vm10, %v704_v29  ;;  %v1153_v34 = vmul.f32 %v2258_v33, %v1141_v61  ;;  %v1252_v61 = vld [vmem:[#allocation4 + $0xa8] sm:$0xff]  ;;  %v2810_v29 = vld [vmem:[#allocation4 + $0x178] sm:$0xff]  ;;  %v2816_v33 = vld [vmem:[#allocation4 + $0x160] sm:$0xff] }
 0xa17   :  { %1320 = vmatpush.msrb.mxu1 %v1252_v61  ;;  %1371 = vmatpush.msrb.mxu2 %v2816_v33 }
 0xa18   :  { %v1172_v37 = vrot.slane %v1153_v34, 4  ;;  %1450 = vmatpush.msra.mxu0 %v2816_v33 }
 0xa1a   :  { %1173 = vrot.lane.b32.xlu1 %v1172_v37, %s2370_s0  ;;  %v2828_v37 = vld [vmem:[#allocation4 + $0x150] sm:$0xff] }
 0xa1b   :  { %1372 = vmatpush.msrb.mxu2 %v2828_v37  ;;  %1451 = vmatpush.msra.mxu0 %v2828_v37 }
 0xa1c   :  { %v1065_v39 = vpop.permute.xlu0 %1064 }
 0xa22   :  { %796 = vrot.lane.b32.xlu1 %v2694_v59, %s2370_s0 }
 0xa2a   :  { %1155 = vrot.lane.b32.xlu1 %v1153_v34, %s2370_s0  ;;  %v2818_v34 = vld [vmem:[#allocation4 + $0x168] sm:$0xff] }
 0xa8c   :  { %v1174_v8 = vpop.permute.xlu1 %1173 }
 0xa8d   :  { %2187 = vmatmul.msk.f32.vlgmr.msra.gmra.mxu2 %vm549_vm7, %v1174_v8  ;;  %2188 = vmatmul.msk.f32.vlgmr.msra.gmra.mxu3 %vm549_vm7, %v1174_v8  ;;  %v2830_v8 = vld [vmem:[#allocation4 + $0x158] sm:$0xff] }
 0xa94   :  { %v797_v38 = vpop.permute.xlu1 %796 }
 0xa95   :  { %800 = vst.msk [vmem:[#allocation3] sm:$0x30] %vm799_vm11, %v797_v38 }
 0xa96   :  { %802 = vst.msk [vmem:[#allocation3 + $0x6] sm:$0x30] %vm801_vm12, %v797_v38  ;;  %v2832_v38 = vld [vmem:[#allocation4 + $0x140] sm:$0xff] }
 0xa97   :  { %1067 = vst.msk [vmem:[#allocation3 + $0x8] sm:$0xc] %vm706_vm9, %v1065_v39  ;;  %1373 = vmatpush.msrb.mxu2 %v2832_v38  ;;  %1452 = vmatpush.msra.mxu0 %v2832_v38 }
 0xa98   :  { %1068 = vst.msk [vmem:[#allocation3 + $0x2] sm:$0xc] %vm708_vm10, %v1065_v39  ;;  %v2838_v39 = vld [vmem:[#allocation4 + $0x148] sm:$0xff] }
 0xa9c   :  { %v1156_v59 = vpop.permute.xlu1 %1155 }
 0xa9d   :  { %1158 = vst.msk [vmem:[#allocation3 + $0x8] sm:$0x30] %vm799_vm11, %v1156_v59 }
 0xa9e   :  { %1159 = vst.msk [vmem:[#allocation3 - $0x2] sm:$0x30] %vm801_vm12, %v1156_v59  ;;  %v2840_v59 = vld [vmem:[#allocation4 + $0x130] sm:$0xff] }
 0xa9f   :  { %1374 = vmatpush.msrb.mxu2 %v2840_v59  ;;  %1453 = vmatpush.msra.mxu0 %v2840_v59 }
 0xaa1   :  { %1375 = vmatpush.msrb.mxu2 %v2848_v43  ;;  %1454 = vmatpush.msra.mxu0 %v2848_v43 }
 0xaa2   :  { %1376 = vmatmul.f32.vlgmr.msrb.gmra.mxu2 %v2368_v49 }
 0xaa3   :  { %1538 = vmatpush.msra.mxu2 %v2798_v20 }
 0xaa5   :  { %1539 = vmatpush.msra.mxu2 %v2802_v25 }
 0xaa7   :  { %1540 = vmatpush.msra.mxu2 %v2808_v28 }
 0xaa9   :  { %1541 = vmatpush.msra.mxu2 %v2816_v33 }
 0xaab   :  { %1542 = vmatpush.msra.mxu2 %v2828_v37 }
 0xaad   :  { %1543 = vmatpush.msra.mxu2 %v2832_v38 }
 0xaaf   :  { %1544 = vmatpush.msra.mxu2 %v2840_v59 }
 0xab1   :  { %1545 = vmatpush.msra.mxu2 %v2848_v43 }
 0xab3   :  { %1720 = vmatpush.msrb.mxu2 %v2798_v20 }
 0xab5   :  { %1721 = vmatpush.msrb.mxu2 %v2802_v25 }
 0xab7   :  { %1722 = vmatpush.msrb.mxu2 %v2808_v28 }
 0xab9   :  { %1723 = vmatpush.msrb.mxu2 %v2816_v33 }
 0xabb   :  { %1724 = vmatpush.msrb.mxu2 %v2828_v37 }
 0xabd   :  { %1725 = vmatpush.msrb.mxu2 %v2832_v38 }
 0xabf   :  { %1726 = vmatpush.msrb.mxu2 %v2840_v59 }
 0xac1   :  { %1727 = vmatpush.msrb.mxu2 %v2848_v43 }
 0xb10   :  { %v1194_v63 = vpop.f32.mrf.mxu2  ;;  %v1214_v53 = vpop.f32.mrf.mxu3 }
 0xb11   :  { %v1219_v0 = vrot.slane %v1194_v63, 2  ;;  %v1220_v2 = vrot.slane %v1214_v53, 2  ;;  %v1268_v63 = vld [vmem:[#allocation4 + $0x11] ss:$8 sm:$0x3] }
 0xb12   :  { %v1272_v52 = vperm.slane %v1268_v63, 0  ;;  %v1273_v53 = vperm.slane %v1268_v63, 1 }
 0xb13   :  { %v1223_v6 = vadd.f32 %v1219_v0, %v1170_v3  ;;  %v1224_v7 = vadd.f32 %v1220_v2, %v1171_v4 }
 0xb15   :  { %v1225_v9 = vmul.f32 0.5, %v1223_v6  ;;  %v1226_v10 = vmul.f32 %v1224_v7, %v2624_v5 }
 0xb17   :  { %2259 = vtanh.f32 %v1225_v9 }
 0xb18   :  { %2261 = vtanh.f32 %v1226_v10 }
 0xb1d   :  { %v2260_v11 = vpop.eup %2259 }
 0xb1e   :  { %v2262_v14 = vpop.eup %2261  ;;  %v1229_v15 = vmul.f32 0.5, %v2260_v11 }
 0xb1f   :  { %v1230_v16 = vmul.f32 %v2262_v14, %v2624_v5 }
 0xb20   :  { %v1231_v18 = vadd.f32 0.5, %v1229_v15 }
 0xb21   :  { %v1232_v19 = vadd.f32 %v1230_v16, %v2630_v13 }
 0xb22   :  { %v1236_v22 = vmul.f32 %v1234_v17, %v1231_v18 }
 0xb23   :  { %v1237_v23 = vmul.f32 %v1232_v19, %v1231_v18 }
 0xb25   :  { %1239 = vrot.lane.b32.xlu2 %v1237_v23, %s2370_s0  ;;  %v1377_v15 = vpop.f32.mrf.mxu2 }
 0xb2d   :  { %889 = vrot.lane.b32.xlu2 %v2724_v12, %s2370_s0 }
 0xb7f   :  { %v1240_v42 = vpop.permute.xlu2 %1239 }
 0xb80   :  { %v1242_v47 = vadd.f32 %v1240_v42, %v1236_v22 }
 0xb82   :  { %2263 = vtanh.f32 %v1242_v47 }
 0xb87   :  { %v890_v12 = vpop.permute.xlu2 %889 }
 0xb88   :  { %v2264_v48 = vpop.eup %2263  ;;  %893 = vst.msk [vmem:[#allocation3] sm:$0xc0] %vm892_vm13, %v890_v12 }
 0xb89   :  { %895 = vst.msk [vmem:[#allocation3 + $0x2] sm:$0xc0] %vm894_vm14, %v890_v12  ;;  %v1244_v50 = vmul.f32 %v2264_v48, %v1232_v19 }
 0xb8a   :  { %979 = vst.msk [vmem:[#allocation3 + $0x8] sm:$0x3] %vm616_vm6, %v2739_v21 }
 0xb8b   :  { %980 = vst.msk [vmem:[#allocation3 + $0x6] sm:$0x3] %vm618_vm8, %v2739_v21  ;;  %1246 = vrot.lane.b32.xlu2 %v1244_v50, %s2370_s0  ;;  %v2800_v21 = vld [vmem:[#allocation4 + $0x198] sm:$0xff] }
 0xb8c   :  { %1388 = vmatpush.msrb.mxu3 %v2800_v21  ;;  %1467 = vmatpush.msra.mxu1 %v2800_v21 }
 0xb8e   :  { %1389 = vmatpush.msrb.mxu3 %v2806_v26  ;;  %1468 = vmatpush.msra.mxu1 %v2806_v26 }
 0xb90   :  { %1390 = vmatpush.msrb.mxu3 %v2810_v29  ;;  %1469 = vmatpush.msra.mxu1 %v2810_v29 }
 0xb92   :  { %1391 = vmatpush.msrb.mxu3 %v2818_v34  ;;  %1470 = vmatpush.msra.mxu1 %v2818_v34 }
 0xb94   :  { %1392 = vmatpush.msrb.mxu3 %v2830_v8  ;;  %1471 = vmatpush.msra.mxu1 %v2830_v8 }
 0xb96   :  { %1393 = vmatpush.msrb.mxu3 %v2838_v39  ;;  %1472 = vmatpush.msra.mxu1 %v2838_v39 }
 0xb98   :  { %1394 = vmatpush.msrb.mxu3 %v2842_v40  ;;  %1473 = vmatpush.msra.mxu1 %v2842_v40 }
 0xb9a   :  { %1395 = vmatpush.msrb.mxu3 %v2850_v44  ;;  %1474 = vmatpush.msra.mxu1 %v2850_v44 }
 0xb9b   :  { %1396 = vmatmul.f32.vlgmr.msrb.gmra.mxu3 %v2368_v49 }
 0xb9c   :  { %1558 = vmatpush.msra.mxu3 %v2800_v21 }
 0xb9e   :  { %1559 = vmatpush.msra.mxu3 %v2806_v26 }
 0xba0   :  { %1560 = vmatpush.msra.mxu3 %v2810_v29 }
 0xba2   :  { %1561 = vmatpush.msra.mxu3 %v2818_v34 }
 0xba4   :  { %1562 = vmatpush.msra.mxu3 %v2830_v8 }
 0xba6   :  { %1563 = vmatpush.msra.mxu3 %v2838_v39 }
 0xba8   :  { %1564 = vmatpush.msra.mxu3 %v2842_v40 }
 0xbaa   :  { %1565 = vmatpush.msra.mxu3 %v2850_v44 }
 0xbac   :  { %1740 = vmatpush.msrb.mxu3 %v2800_v21 }
 0xbae   :  { %1741 = vmatpush.msrb.mxu3 %v2806_v26 }
 0xbb0   :  { %1742 = vmatpush.msrb.mxu3 %v2810_v29 }
 0xbb2   :  { %1743 = vmatpush.msrb.mxu3 %v2818_v34 }
 0xbb4   :  { %1744 = vmatpush.msrb.mxu3 %v2830_v8 }
 0xbb6   :  { %1745 = vmatpush.msrb.mxu3 %v2838_v39 }
 0xbb8   :  { %1746 = vmatpush.msrb.mxu3 %v2842_v40 }
 0xbba   :  { %1747 = vmatpush.msrb.mxu3 %v2850_v44 }
 0xbe5   :  { %v1247_v45 = vpop.permute.xlu2 %1246 }
 0xbe6   :  { %1249 = vst.msk [vmem:[#allocation3 + $0x8] sm:$0xc0] %vm892_vm13, %v1247_v45 }
 0xbe7   :  { %1250 = vst.msk [vmem:[#allocation3 - $0x6] sm:$0xc0] %vm894_vm14, %v1247_v45 }
 0xbed   :  { %v1270_v46 = vld [vmem:[#allocation3 + $0x8] sm:$0xff] }
 0xbee   :  { %v1269_v49 = vld [vmem:[#allocation3] sm:$0xff] }
 0xbef   :  { %2189 = vmatmul.msk.f32.vlgmr.msrb.gmra.mxu0 %vm549_vm7, %v1269_v49  ;;  %2191 = vmatmul.msk.f32.vlgmr.msrb.gmra.mxu1 %vm549_vm7, %v1269_v49 }
 0xbf0   :  { %1629 = vmatpush.msrb.mxu0 %v2798_v20  ;;  %1649 = vmatpush.msrb.mxu1 %v2800_v21 }
 0xbf2   :  { %1630 = vmatpush.msrb.mxu0 %v2802_v25  ;;  %1650 = vmatpush.msrb.mxu1 %v2806_v26 }
 0xbf4   :  { %1631 = vmatpush.msrb.mxu0 %v2808_v28  ;;  %1651 = vmatpush.msrb.mxu1 %v2810_v29 }
 0xbf6   :  { %1632 = vmatpush.msrb.mxu0 %v2816_v33  ;;  %1652 = vmatpush.msrb.mxu1 %v2818_v34 }
 0xbf7   :  { %2190 = vmatmul.msk.f32.gmra.mxu0 %vm549_vm7, %v1270_v46  ;;  %2192 = vmatmul.msk.f32.gmra.mxu1 %vm549_vm7, %v1270_v46 }
 0xbf8   :  { %1633 = vmatpush.msrb.mxu0 %v2828_v37  ;;  %1653 = vmatpush.msrb.mxu1 %v2830_v8 }
 0xbfa   :  { %1634 = vmatpush.msrb.mxu0 %v2832_v38  ;;  %1654 = vmatpush.msrb.mxu1 %v2838_v39 }
 0xbfc   :  { %1635 = vmatpush.msrb.mxu0 %v2840_v59  ;;  %1655 = vmatpush.msrb.mxu1 %v2842_v40 }
 0xbfe   :  { %1636 = vmatpush.msrb.mxu0 %v2848_v43  ;;  %1656 = vmatpush.msrb.mxu1 %v2850_v44 }
 0xc1e   :  { %v1397_v19 = vpop.f32.mrf.mxu3 }
 0xc6c   :  { %v1299_v0 = vpop.f32.mrf.mxu0  ;;  %v1322_v2 = vpop.f32.mrf.mxu1 }
 0xc6d   :  { %v1300_v3 = vadd.f32 %v1299_v0, %v1272_v52  ;;  %v1323_v4 = vadd.f32 %v1322_v2, %v1273_v53 }
 0xc6f   :  { %1328 = vst [vmem:[#allocation2 + $0x10] sm:$0xff] %v1300_v3 }
 0xc70   :  { %1329 = vst [vmem:[#allocation2] sm:$0xff] %v1323_v4 }
 0xc74   :  { %v1302_v6 = vpop.f32.mrf.mxu0  ;;  %v1325_v7 = vpop.f32.mrf.mxu1 }
 0xc75   :  { %v1303_v9 = vadd.f32 %v1302_v6, %v1272_v52  ;;  %v1326_v10 = vadd.f32 %v1325_v7, %v1273_v53 }
 0xc76   :  { %v1348_v17 = vld [vmem:[#allocation2 + $0x10] sm:$0x3]  ;;  %v1425_v63 = vld [vmem:[#allocation2 + $0x10] sm:$0xc] }
 0xc77   :  { %1330 = vst [vmem:[#allocation2 + $0x18] sm:$0xff] %v1303_v9  ;;  %v1349_v23 = vld [vmem:[#allocation2] sm:$0x3]  ;;  %v1426_v53 = vld [vmem:[#allocation2] sm:$0xc] }
 0xc78   :  { %1331 = vst [vmem:[#allocation2 + $0x8] sm:$0xff] %v1326_v10 }
 0xc7e   :  { %v1350_v11 = vld [vmem:[#allocation2 + $0x18] sm:$0xc0]  ;;  %v1427_v58 = vld [vmem:[#allocation2 + $0x18] sm:$0x30] }
 0xc7f   :  { %v1354_v14 = vrot.slane %v1350_v11, 6  ;;  %v1351_v16 = vld [vmem:[#allocation2 + $0x8] sm:$0xc0]  ;;  %v1428_v60 = vld [vmem:[#allocation2 + $0x8] sm:$0x30]  ;;  %v1431_v61 = vrot.slane %v1427_v58, 2 }
 0xc80   :  { %v1355_v18 = vrot.slane %v1351_v16, 6  ;;  %v1432_v45 = vrot.slane %v1428_v60, 2 }
 0xc81   :  { %v1358_v22 = vsel %vm2613_vm4, %v1348_v17, %v1354_v14  ;;  %v1435_v2 = vsel %vm2613_vm4, %v1425_v63, %v1431_v61 }
 0xc82   :  { %v1400_v24 = vadd.f32 %v1377_v15, %v1358_v22  ;;  %v1359_v27 = vsel %vm2619_vm5, %v1349_v23, %v1355_v18  ;;  %v1436_v3 = vsel %vm2619_vm5, %v1426_v53, %v1432_v45 }
 0xc83   :  { %v1401_v30 = vadd.f32 %v1397_v19, %v1359_v27 }
 0xc84   :  { %v1402_v31 = vmul.f32 0.5, %v1400_v24 }
 0xc85   :  { %v1403_v32 = vmul.f32 %v1401_v30, %v2624_v5 }
 0xc86   :  { %2265 = vtanh.f32 %v1402_v31 }
 0xc87   :  { %2267 = vtanh.f32 %v1403_v32 }
 0xc8c   :  { %v2266_v35 = vpop.eup %2265 }
 0xc8d   :  { %v2268_v36 = vpop.eup %2267  ;;  %v1406_v41 = vmul.f32 0.5, %v2266_v35  ;;  %v1515_v35 = vld [vmem:[#allocation2 + $0x18] sm:$0xc] }
 0xc8e   :  { %v1407_v42 = vmul.f32 %v2268_v36, %v2624_v5  ;;  %v1516_v36 = vld [vmem:[#allocation2 + $0x8] sm:$0xc] }
 0xc8f   :  { %v1408_v47 = vadd.f32 0.5, %v1406_v41  ;;  %v1519_v41 = vrot.slane %v1515_v35, 6 }
 0xc90   :  { %v1409_v12 = vadd.f32 %v1407_v42, %v2630_v13  ;;  %v1520_v42 = vrot.slane %v1516_v36, 6 }
 0xc91   :  { %v1410_v50 = vmul.f32 0.0, %v1408_v47 }
 0xc92   :  { %v1411_v48 = vmul.f32 %v1409_v12, %v1408_v47 }
 0xc94   :  { %1413 = vrot.lane.b32.xlu0 %v1411_v48, %s2370_s0  ;;  %v1513_v48 = vld [vmem:[#allocation2 + $0x10] sm:$0x30] }
 0xd06   :  { %v1414_v51 = vpop.permute.xlu0 %1413 }
 0xd07   :  { %v1416_v54 = vadd.f32 %v1414_v51, %v1410_v50  ;;  %v1514_v51 = vld [vmem:[#allocation2] sm:$0x30] }
 0xd09   :  { %2269 = vtanh.f32 %v1416_v54  ;;  %v1496_v16 = vrot.slane %v1416_v54, 6 }
 0xd0f   :  { %v2270_v55 = vpop.eup %2269 }
 0xd10   :  { %v1418_v56 = vmul.f32 %v2270_v55, %v1409_v12  ;;  %v1523_v55 = vsel %vm2613_vm4, %v1513_v48, %v1519_v41  ;;  %v1696_v48 = vld [vmem:[#allocation2 + $0x8] sm:$0x3] }
 0xd12   :  { %1420 = vrot.lane.b32.xlu1 %v1418_v56, %s2370_s0  ;;  %v1524_v56 = vsel %vm2619_vm5, %v1514_v51, %v1520_v42  ;;  %v1697_v42 = vld [vmem:[#allocation2 + $0x10] sm:$0xc0] }
 0xd84   :  { %v1421_v57 = vpop.permute.xlu1 %1420 }
 0xd85   :  { %1423 = vst.msk [vmem:[#allocation3] sm:$0x3] %vm616_vm6, %v1421_v57  ;;  %2193 = vmatmul.msk.f32.vlgmr.msra.gmra.mxu0 %vm549_vm7, %v1421_v57  ;;  %2194 = vmatmul.msk.f32.vlgmr.msra.gmra.mxu1 %vm549_vm7, %v1421_v57 }
 0xd86   :  { %1424 = vst.msk [vmem:[#allocation3 + $0xe] sm:$0x3] %vm618_vm8, %v1421_v57  ;;  %1802 = vmatpush.msra.mxu0 %v2798_v20  ;;  %1822 = vmatpush.msra.mxu1 %v2800_v21 }
 0xd88   :  { %1803 = vmatpush.msra.mxu0 %v2802_v25  ;;  %1823 = vmatpush.msra.mxu1 %v2806_v26 }
 0xd8a   :  { %1804 = vmatpush.msra.mxu0 %v2808_v28  ;;  %1824 = vmatpush.msra.mxu1 %v2810_v29 }
 0xd8c   :  { %1805 = vmatpush.msra.mxu0 %v2816_v33  ;;  %1825 = vmatpush.msra.mxu1 %v2818_v34 }
 0xd8e   :  { %1806 = vmatpush.msra.mxu0 %v2828_v37  ;;  %1826 = vmatpush.msra.mxu1 %v2830_v8 }
 0xd90   :  { %1807 = vmatpush.msra.mxu0 %v2832_v38  ;;  %1827 = vmatpush.msra.mxu1 %v2838_v39 }
 0xd92   :  { %1808 = vmatpush.msra.mxu0 %v2840_v59  ;;  %1828 = vmatpush.msra.mxu1 %v2842_v40 }
 0xd94   :  { %1809 = vmatpush.msra.mxu0 %v2848_v43  ;;  %1829 = vmatpush.msra.mxu1 %v2850_v44 }
 0xe02   :  { %v1456_v49 = vpop.f32.mrf.mxu0  ;;  %v1476_v46 = vpop.f32.mrf.mxu1 }
 0xe03   :  { %v1481_v52 = vrot.slane %v1456_v49, 6  ;;  %v1482_v0 = vrot.slane %v1476_v46, 6 }
 0xe05   :  { %v1485_v4 = vadd.f32 %v1481_v52, %v1435_v2  ;;  %v1486_v6 = vadd.f32 %v1482_v0, %v1436_v3 }
 0xe07   :  { %v1487_v7 = vmul.f32 0.5, %v1485_v4  ;;  %v1488_v9 = vmul.f32 %v1486_v6, %v2624_v5 }
 0xe09   :  { %2271 = vtanh.f32 %v1487_v7 }
 0xe0a   :  { %2273 = vtanh.f32 %v1488_v9 }
 0xe0f   :  { %v2272_v10 = vpop.eup %2271 }
 0xe10   :  { %v2274_v11 = vpop.eup %2273  ;;  %v1491_v14 = vmul.f32 0.5, %v2272_v10 }
 0xe11   :  { %v1492_v15 = vmul.f32 %v2274_v11, %v2624_v5 }
 0xe12   :  { %v1493_v17 = vadd.f32 0.5, %v1491_v14 }
 0xe13   :  { %v1494_v18 = vadd.f32 %v1492_v15, %v2630_v13 }
 0xe14   :  { %v1498_v19 = vmul.f32 %v1496_v16, %v1493_v17 }
 0xe15   :  { %v1499_v22 = vmul.f32 %v1494_v18, %v1493_v17 }
 0xe17   :  { %1501 = vrot.lane.b32.xlu2 %v1499_v22, %s2370_s0 }
 0xe71   :  { %v1502_v23 = vpop.permute.xlu2 %1501 }
 0xe72   :  { %v1504_v24 = vadd.f32 %v1502_v23, %v1498_v19 }
 0xe74   :  { %2275 = vtanh.f32 %v1504_v24  ;;  %v1587_v52 = vrot.slane %v1504_v24, 6 }
 0xe7a   :  { %v2276_v27 = vpop.eup %2275 }
 0xe7b   :  { %v2955_v30 = vmul.f32 %v2276_v27, %v1494_v18 }
 0xe7d   :  { %v1525_v31 = vrot.slane %v2955_v30, 2 }
 0xe7f   :  { %1526 = vrot.lane.b32.xlu0 %v1525_v31, %s2370_s0 }
 0xef1   :  { %v1527_v32 = vpop.permute.xlu0 %1526 }
 0xef2   :  { %2195 = vmatmul.msk.f32.vlgmr.msra.gmra.mxu2 %vm549_vm7, %v1527_v32  ;;  %2196 = vmatmul.msk.f32.vlgmr.msra.gmra.mxu3 %vm549_vm7, %v1527_v32 }
 0xef3   :  { %1893 = vmatpush.msra.mxu2 %v2798_v20  ;;  %1913 = vmatpush.msra.mxu3 %v2800_v21 }
 0xef5   :  { %1894 = vmatpush.msra.mxu2 %v2802_v25  ;;  %1914 = vmatpush.msra.mxu3 %v2806_v26 }
 0xef7   :  { %1895 = vmatpush.msra.mxu2 %v2808_v28  ;;  %1915 = vmatpush.msra.mxu3 %v2810_v29 }
 0xef9   :  { %1896 = vmatpush.msra.mxu2 %v2816_v33  ;;  %1916 = vmatpush.msra.mxu3 %v2818_v34 }
 0xefb   :  { %1897 = vmatpush.msra.mxu2 %v2828_v37  ;;  %1917 = vmatpush.msra.mxu3 %v2830_v8 }
 0xefd   :  { %1898 = vmatpush.msra.mxu2 %v2832_v38  ;;  %1918 = vmatpush.msra.mxu3 %v2838_v39 }
 0xeff   :  { %1899 = vmatpush.msra.mxu2 %v2840_v59  ;;  %1919 = vmatpush.msra.mxu3 %v2842_v40 }
 0xf01   :  { %1900 = vmatpush.msra.mxu2 %v2848_v43  ;;  %1920 = vmatpush.msra.mxu3 %v2850_v44 }
 0xf75   :  { %v1547_v47 = vpop.f32.mrf.mxu2  ;;  %v1567_v12 = vpop.f32.mrf.mxu3 }
 0xf76   :  { %v1572_v50 = vrot.slane %v1547_v47, 4  ;;  %v1573_v54 = vrot.slane %v1567_v12, 4  ;;  %v1698_v47 = vld [vmem:[#allocation2] sm:$0xc0]  ;;  %v1695_v12 = vld [vmem:[#allocation2 + $0x18] sm:$0x3] }
 0xf77   :  { %v1702_v51 = vrot.slane %v1698_v47, 6 }
 0xf78   :  { %v1576_v57 = vadd.f32 %v1572_v50, %v1523_v55  ;;  %v1577_v58 = vadd.f32 %v1573_v54, %v1524_v56  ;;  %v1701_v50 = vrot.slane %v1697_v42, 6 }
 0xf79   :  { %v1706_v56 = vsel %vm2619_vm5, %v1696_v48, %v1702_v51  ;;  %v1871_v48 = vld [vmem:[#allocation2] sm:$0xc]  ;;  %v1869_v51 = vld [vmem:[#allocation2 + $0x8] sm:$0x30] }
 0xf7a   :  { %v1578_v60 = vmul.f32 0.5, %v1576_v57  ;;  %v1579_v61 = vmul.f32 %v1577_v58, %v2624_v5  ;;  %v1705_v54 = vsel %vm2613_vm4, %v1695_v12, %v1701_v50  ;;  %v1870_v12 = vld [vmem:[#allocation2 + $0x10] sm:$0xc]  ;;  %v1868_v50 = vld [vmem:[#allocation2 + $0x18] sm:$0x30] }
 0xf7c   :  { %2277 = vtanh.f32 %v1578_v60 }
 0xf7d   :  { %2279 = vtanh.f32 %v1579_v61 }
 0xf82   :  { %v2278_v45 = vpop.eup %2277 }
 0xf83   :  { %v2280_v49 = vpop.eup %2279  ;;  %v1582_v46 = vmul.f32 0.5, %v2278_v45 }
 0xf84   :  { %v1583_v63 = vmul.f32 %v2280_v49, %v2624_v5 }
 0xf85   :  { %v1584_v53 = vadd.f32 0.5, %v1582_v46 }
 0xf86   :  { %v1585_v0 = vadd.f32 %v1583_v63, %v2630_v13 }
 0xf87   :  { %v1589_v2 = vmul.f32 %v1587_v52, %v1584_v53 }
 0xf88   :  { %v1590_v3 = vmul.f32 %v1585_v0, %v1584_v53 }
 0xf8a   :  { %1592 = vrot.lane.b32.xlu1 %v1590_v3, %s2370_s0 }
 0xffc   :  { %v1593_v4 = vpop.permute.xlu1 %1592 }
 0xffd   :  { %v1595_v6 = vadd.f32 %v1593_v4, %v1589_v2 }
 0xfff   :  { %2281 = vtanh.f32 %v1595_v6  ;;  %v1678_v18 = vrot.slane %v1595_v6, 6 }
0x1005   :  { %v2282_v7 = vpop.eup %2281 }
0x1006   :  { %v2985_v9 = vmul.f32 %v2282_v7, %v1585_v0 }
0x1008   :  { %v1616_v10 = vrot.slane %v2985_v9, 4 }
0x100a   :  { %1617 = vrot.lane.b32.xlu2 %v1616_v10, %s2370_s0 }
0x1064   :  { %v1618_v11 = vpop.permute.xlu2 %1617 }
0x1065   :  { %2197 = vmatmul.msk.f32.vlgmr.msrb.gmra.mxu0 %vm549_vm7, %v1618_v11  ;;  %2198 = vmatmul.msk.f32.vlgmr.msrb.gmra.mxu1 %vm549_vm7, %v1618_v11 }
0x1066   :  { %1984 = vmatpush.msrb.mxu0 %v2798_v20  ;;  %2004 = vmatpush.msrb.mxu1 %v2800_v21  ;;  %v1606_v20 = vld [vmem:[#allocation2 + $0x18] sm:$0x3]  ;;  %v1607_v21 = vld [vmem:[#allocation2 + $0x8] sm:$0x3] }
0x1068   :  { %1985 = vmatpush.msrb.mxu0 %v2802_v25  ;;  %2005 = vmatpush.msrb.mxu1 %v2806_v26  ;;  %v1610_v25 = vrot.slane %v1606_v20, 2  ;;  %v1611_v26 = vrot.slane %v1607_v21, 2  ;;  %v1782_v21 = vld [vmem:[#allocation2 + $0x10] sm:$0x30] }
0x106a   :  { %1986 = vmatpush.msrb.mxu0 %v2808_v28  ;;  %2006 = vmatpush.msrb.mxu1 %v2810_v29 }
0x106c   :  { %1987 = vmatpush.msrb.mxu0 %v2816_v33  ;;  %2007 = vmatpush.msrb.mxu1 %v2818_v34  ;;  %v1604_v33 = vld [vmem:[#allocation2 + $0x10] sm:$0xc0] }
0x106e   :  { %1988 = vmatpush.msrb.mxu0 %v2828_v37  ;;  %2008 = vmatpush.msrb.mxu1 %v2830_v8  ;;  %v1605_v37 = vld [vmem:[#allocation2] sm:$0xc0] }
0x1070   :  { %1989 = vmatpush.msrb.mxu0 %v2832_v38  ;;  %2009 = vmatpush.msrb.mxu1 %v2838_v39  ;;  %v1614_v38 = vsel %vm2613_vm4, %v1604_v33, %v1610_v25  ;;  %v1615_v39 = vsel %vm2619_vm5, %v1605_v37, %v1611_v26  ;;  %v1783_v25 = vld [vmem:[#allocation2] sm:$0x30]  ;;  %v1780_v26 = vld [vmem:[#allocation2 + $0x18] sm:$0xc] }
0x1072   :  { %1990 = vmatpush.msrb.mxu0 %v2840_v59  ;;  %2010 = vmatpush.msrb.mxu1 %v2842_v40 }
0x1074   :  { %1991 = vmatpush.msrb.mxu0 %v2848_v43  ;;  %2011 = vmatpush.msrb.mxu1 %v2850_v44 }
0x10e2   :  { %v1638_v28 = vpop.f32.mrf.mxu0  ;;  %v1658_v29 = vpop.f32.mrf.mxu1 }
0x10e3   :  { %v1663_v34 = vrot.slane %v1638_v28, 2  ;;  %v1664_v8 = vrot.slane %v1658_v29, 2  ;;  %v1781_v28 = vld [vmem:[#allocation2 + $0x8] sm:$0xc]  ;;  %v1786_v29 = vrot.slane %v1782_v21, 2 }
0x10e5   :  { %v1667_v59 = vadd.f32 %v1663_v34, %v1614_v38  ;;  %v1668_v40 = vadd.f32 %v1664_v8, %v1615_v39  ;;  %v1787_v34 = vrot.slane %v1783_v25, 2  ;;  %v1790_v39 = vsel %vm2613_vm4, %v1780_v26, %v1786_v29 }
0x10e7   :  { %v1669_v43 = vmul.f32 0.5, %v1667_v59  ;;  %v1670_v44 = vmul.f32 %v1668_v40, %v2624_v5  ;;  %v1791_v59 = vsel %vm2619_vm5, %v1781_v28, %v1787_v34 }
0x10e9   :  { %2283 = vtanh.f32 %v1669_v43 }
0x10ea   :  { %2285 = vtanh.f32 %v1670_v44 }
0x10ef   :  { %v2284_v14 = vpop.eup %2283 }
0x10f0   :  { %v2286_v15 = vpop.eup %2285  ;;  %v1673_v16 = vmul.f32 0.5, %v2284_v14 }
0x10f1   :  { %v1674_v17 = vmul.f32 %v2286_v15, %v2624_v5 }
0x10f2   :  { %v1675_v19 = vadd.f32 0.5, %v1673_v16 }
0x10f3   :  { %v1676_v22 = vadd.f32 %v1674_v17, %v2630_v13 }
0x10f4   :  { %v1680_v23 = vmul.f32 %v1678_v18, %v1675_v19 }
0x10f5   :  { %v1681_v24 = vmul.f32 %v1676_v22, %v1675_v19 }
0x10f7   :  { %1683 = vrot.lane.b32.xlu0 %v1681_v24, %s2370_s0 }
0x1169   :  { %v1684_v27 = vpop.permute.xlu0 %1683 }
0x116a   :  { %v1686_v31 = vadd.f32 %v1684_v27, %v1680_v23 }
0x116c   :  { %2287 = vtanh.f32 %v1686_v31  ;;  %v1763_v53 = vrot.slane %v1686_v31, 6 }
0x1172   :  { %v2288_v32 = vpop.eup %2287 }
0x1173   :  { %v3015_v35 = vmul.f32 %v2288_v32, %v1676_v22 }
0x1175   :  { %v1707_v36 = vrot.slane %v3015_v35, 6 }
0x1177   :  { %1708 = vrot.lane.b32.xlu1 %v1707_v36, %s2370_s0 }
0x11e9   :  { %v1709_v41 = vpop.permute.xlu1 %1708 }
0x11ea   :  { %2199 = vmatmul.msk.f32.vlgmr.msrb.gmra.mxu2 %vm549_vm7, %v1709_v41  ;;  %2200 = vmatmul.msk.f32.vlgmr.msrb.gmra.mxu3 %vm549_vm7, %v1709_v41 }
0x126d   :  { %v1729_v55 = vpop.f32.mrf.mxu2  ;;  %v1749_v57 = vpop.f32.mrf.mxu3 }
0x126e   :  { %v1752_v58 = vadd.f32 %v1729_v55, %v1705_v54  ;;  %v1753_v60 = vadd.f32 %v1749_v57, %v1706_v56  ;;  %v1874_v54 = vrot.slane %v1870_v12, 6  ;;  %v1875_v56 = vrot.slane %v1871_v48, 6 }
0x1270   :  { %v1754_v61 = vmul.f32 0.5, %v1752_v58  ;;  %v1755_v45 = vmul.f32 %v1753_v60, %v2624_v5 }
0x1272   :  { %2289 = vtanh.f32 %v1754_v61  ;;  %v1878_v61 = vsel %vm2613_vm4, %v1868_v50, %v1874_v54 }
0x1273   :  { %2291 = vtanh.f32 %v1755_v45  ;;  %v1879_v45 = vsel %vm2619_vm5, %v1869_v51, %v1875_v56 }
0x1278   :  { %v2290_v49 = vpop.eup %2289 }
0x1279   :  { %v2292_v46 = vpop.eup %2291  ;;  %v1758_v63 = vmul.f32 0.5, %v2290_v49 }
0x127a   :  { %v1759_v52 = vmul.f32 %v2292_v46, %v2624_v5 }
0x127b   :  { %v1760_v0 = vadd.f32 0.5, %v1758_v63 }
0x127c   :  { %v1761_v2 = vadd.f32 %v1759_v52, %v2630_v13 }
0x127d   :  { %v1765_v3 = vmul.f32 %v1763_v53, %v1760_v0 }
0x127e   :  { %v1766_v4 = vmul.f32 %v1761_v2, %v1760_v0 }
0x1280   :  { %1768 = vrot.lane.b32.xlu2 %v1766_v4, %s2370_s0 }
0x12da   :  { %v1769_v6 = vpop.permute.xlu2 %1768 }
0x12db   :  { %v1771_v7 = vadd.f32 %v1769_v6, %v1765_v3 }
0x12dd   :  { %2293 = vtanh.f32 %v1771_v7  ;;  %v1851_v19 = vrot.slane %v1771_v7, 6 }
0x12e3   :  { %v2294_v10 = vpop.eup %2293 }
0x12e4   :  { %v1773_v11 = vmul.f32 %v2294_v10, %v1761_v2 }
0x12e6   :  { %1775 = vrot.lane.b32.xlu0 %v1773_v11, %s2370_s0 }
0x1358   :  { %v3030_v20 = vpop.permute.xlu0 %1775 }
0x1359   :  { %2201 = vmatmul.msk.f32.vlgmr.msra.gmra.mxu0 %vm549_vm7, %v3030_v20  ;;  %2202 = vmatmul.msk.f32.vlgmr.msra.gmra.mxu1 %vm549_vm7, %v3030_v20 }
0x13d6   :  { %v1811_v33 = vpop.f32.mrf.mxu0  ;;  %v1831_v37 = vpop.f32.mrf.mxu1 }
0x13d7   :  { %v1836_v8 = vrot.slane %v1811_v33, 6  ;;  %v1837_v38 = vrot.slane %v1831_v37, 6 }
0x13d9   :  { %v1840_v40 = vadd.f32 %v1836_v8, %v1790_v39  ;;  %v1841_v43 = vadd.f32 %v1837_v38, %v1791_v59  ;;  %v1959_v8 = vld [vmem:[#allocation2 + $0x18] sm:$0xc0]  ;;  %v1960_v38 = vld [vmem:[#allocation2 + $0x8] sm:$0xc0] }
0x13db   :  { %v1842_v44 = vmul.f32 0.5, %v1840_v40  ;;  %v1843_v14 = vmul.f32 %v1841_v43, %v2624_v5 }
0x13dd   :  { %2295 = vtanh.f32 %v1842_v44 }
0x13de   :  { %2297 = vtanh.f32 %v1843_v14 }
0x13e3   :  { %v2296_v15 = vpop.eup %2295 }
0x13e4   :  { %v2298_v16 = vpop.eup %2297  ;;  %v1846_v17 = vmul.f32 0.5, %v2296_v15 }
0x13e5   :  { %v1847_v18 = vmul.f32 %v2298_v16, %v2624_v5 }
0x13e6   :  { %v1848_v22 = vadd.f32 0.5, %v1846_v17 }
0x13e7   :  { %v1849_v23 = vadd.f32 %v1847_v18, %v2630_v13 }
0x13e8   :  { %v1853_v24 = vmul.f32 %v1851_v19, %v1848_v22 }
0x13e9   :  { %v1854_v27 = vmul.f32 %v1849_v23, %v1848_v22 }
0x13eb   :  { %1856 = vrot.lane.b32.xlu1 %v1854_v27, %s2370_s0 }
0x145d   :  { %v1857_v31 = vpop.permute.xlu1 %1856 }
0x145e   :  { %v1859_v32 = vadd.f32 %v1857_v31, %v1853_v24 }
0x1460   :  { %2299 = vtanh.f32 %v1859_v32  ;;  %v1942_v4 = vrot.slane %v1859_v32, 6 }
0x1466   :  { %v2300_v36 = vpop.eup %2299 }
0x1467   :  { %v3044_v41 = vmul.f32 %v2300_v36, %v1849_v23 }
0x1469   :  { %v1880_v42 = vrot.slane %v3044_v41, 2 }
0x146b   :  { %1881 = vrot.lane.b32.xlu2 %v1880_v42, %s2370_s0 }
0x14c5   :  { %v1882_v47 = vpop.permute.xlu2 %1881 }
0x14c6   :  { %2203 = vmatmul.msk.f32.vlgmr.msra.gmra.mxu2 %vm549_vm7, %v1882_v47  ;;  %2204 = vmatmul.msk.f32.vlgmr.msra.gmra.mxu3 %vm549_vm7, %v1882_v47 }
0x1549   :  { %v1902_v55 = vpop.f32.mrf.mxu2  ;;  %v1922_v57 = vpop.f32.mrf.mxu3 }
0x154a   :  { %v1927_v58 = vrot.slane %v1902_v55, 4  ;;  %v1928_v60 = vrot.slane %v1922_v57, 4 }
0x154c   :  { %v1931_v49 = vadd.f32 %v1927_v58, %v1878_v61  ;;  %v1932_v46 = vadd.f32 %v1928_v60, %v1879_v45 }
0x154e   :  { %v1933_v63 = vmul.f32 0.5, %v1931_v49  ;;  %v1934_v52 = vmul.f32 %v1932_v46, %v2624_v5 }
0x1550   :  { %2301 = vtanh.f32 %v1933_v63 }
0x1551   :  { %2303 = vtanh.f32 %v1934_v52 }
0x1556   :  { %v2302_v53 = vpop.eup %2301 }
0x1557   :  { %v2304_v0 = vpop.eup %2303  ;;  %v1937_v2 = vmul.f32 0.5, %v2302_v53 }
0x1558   :  { %v1938_v3 = vmul.f32 %v2304_v0, %v2624_v5 }
0x1559   :  { %v1939_v6 = vadd.f32 0.5, %v1937_v2 }
0x155a   :  { %v1940_v7 = vadd.f32 %v1938_v3, %v2630_v13 }
0x155b   :  { %v1944_v10 = vmul.f32 %v1942_v4, %v1939_v6 }
0x155c   :  { %v1945_v11 = vmul.f32 %v1940_v7, %v1939_v6 }
0x155e   :  { %1947 = vrot.lane.b32.xlu0 %v1945_v11, %s2370_s0 }
0x1566   :  { %1508 = vrot.lane.b32.xlu0 %v2955_v30, %s2370_s0 }
0x15d0   :  { %v1948_v21 = vpop.permute.xlu0 %1947 }
0x15d1   :  { %v1950_v25 = vadd.f32 %v1948_v21, %v1944_v10 }
0x15d3   :  { %2305 = vtanh.f32 %v1950_v25  ;;  %v2033_v31 = vrot.slane %v1950_v25, 6 }
0x15d8   :  { %v1509_v26 = vpop.permute.xlu0 %1508 }
0x15d9   :  { %v2306_v28 = vpop.eup %2305  ;;  %1511 = vst.msk [vmem:[#allocation3] sm:$0xc] %vm706_vm9, %v1509_v26 }
0x15da   :  { %1512 = vst.msk [vmem:[#allocation3 + $0xa] sm:$0xc] %vm708_vm10, %v1509_v26  ;;  %v1952_v29 = vmul.f32 %v2306_v28, %v1940_v7  ;;  %v2371_v26 = vmov 64  }
0x15db   :  { %2215 = vset.pattern.permute.xlu1 %v2371_v26  ;;  %2216 = vset.pattern.permute.xlu0 %v2371_v26 }
0x15dc   :  { %v1971_v33 = vrot.slane %v1952_v29, 4 }
0x15de   :  { %1972 = vrot.lane.b32.xlu1 %v1971_v33, %s2370_s0 }
0x15e6   :  { %1599 = vrot.lane.b32.xlu1 %v2985_v9, %s2370_s0  ;;  %v1961_v9 = vld [vmem:[#allocation2 + $0x10] sm:$0x3] }
0x15e7   :  { %v1965_v39 = vrot.slane %v1961_v9, 2 }
0x15e9   :  { %v1969_v15 = vsel %vm2613_vm4, %v1959_v8, %v1965_v39  ;;  %vm2110_vm4 = vcmask 31744  }
0x15ee   :  { %1690 = vrot.lane.b32.xlu1 %v3015_v35, %s2370_s0  ;;  %v1962_v35 = vld [vmem:[#allocation2] sm:$0x3] }
0x15ef   :  { %v1966_v40 = vrot.slane %v1962_v35, 2 }
0x15f1   :  { %v1970_v16 = vsel %vm2619_vm5, %v1960_v38, %v1966_v40  ;;  %vm2112_vm5 = vcmask 39936  }
0x1650   :  { %v1973_v30 = vpop.permute.xlu1 %1972 }
0x1651   :  { %2205 = vmatmul.msk.f32.vlgmr.msrb.gmra.mxu0 %vm549_vm7, %v1973_v30  ;;  %2206 = vmatmul.msk.f32.vlgmr.msrb.gmra.mxu1 %vm549_vm7, %v1973_v30  ;;  %vm2124_vm7 = vcmask 58368  }
0x1658   :  { %v1600_v34 = vpop.permute.xlu1 %1599 }
0x1659   :  { %1602 = vst.msk [vmem:[#allocation3] sm:$0x30] %vm799_vm11, %v1600_v34 }
0x165a   :  { %1603 = vst.msk [vmem:[#allocation3 + $0x6] sm:$0x30] %vm801_vm12, %v1600_v34 }
0x1660   :  { %v1691_v37 = vpop.permute.xlu1 %1690 }
0x1661   :  { %1693 = vst.msk [vmem:[#allocation3] sm:$0xc0] %vm892_vm13, %v1691_v37 }
0x1662   :  { %1694 = vst.msk [vmem:[#allocation3 + $0x2] sm:$0xc0] %vm894_vm14, %v1691_v37 }
0x1663   :  { %1778 = vst.msk [vmem:[#allocation3 + $0x8] sm:$0x3] %vm616_vm6, %v3030_v20  ;;  %vm2115_vm6 = vcmask 56320  }
0x1664   :  { %1779 = vst.msk [vmem:[#allocation3 + $0x6] sm:$0x3] %vm618_vm8, %v3030_v20 }
0x166a   :  { %v2080_v7 = vld [vmem:[#allocation3 + $0x8] sm:$0x3] }
0x166b   :  { %v2074_v49 = vld [vmem:[#allocation3 + $0x6] sm:$0x3]  ;;  %v2081_v10 = vmax.f32 %v2080_v7, 0.0 }
0x166c   :  { %v2075_v53 = vmax.f32 %v2074_v49, 0.0 }
0x16ce   :  { %v1993_v59 = vpop.f32.mrf.mxu0  ;;  %v2013_v43 = vpop.f32.mrf.mxu1 }
0x16cf   :  { %v2018_v44 = vrot.slane %v1993_v59, 2  ;;  %v2019_v14 = vrot.slane %v2013_v43, 2 }
0x16d1   :  { %v2022_v17 = vadd.f32 %v2018_v44, %v1969_v15  ;;  %v2023_v18 = vadd.f32 %v2019_v14, %v1970_v16 }
0x16d3   :  { %v2024_v19 = vmul.f32 0.5, %v2022_v17  ;;  %v2025_v20 = vmul.f32 %v2023_v18, %v2624_v5 }
0x16d5   :  { %2307 = vtanh.f32 %v2024_v19 }
0x16d6   :  { %2309 = vtanh.f32 %v2025_v20 }
0x16db   :  { %v2308_v22 = vpop.eup %2307 }
0x16dc   :  { %v2310_v23 = vpop.eup %2309  ;;  %v2028_v24 = vmul.f32 0.5, %v2308_v22 }
0x16dd   :  { %v2029_v27 = vmul.f32 %v2310_v23, %v2624_v5 }
0x16de   :  { %v2030_v32 = vadd.f32 0.5, %v2028_v24 }
0x16df   :  { %v2031_v62 = vadd.f32 %v2029_v27, %v2630_v13  ;;  %v2051_v13 = vld [vmem:[#allocation4 + $0x12] ss:$8 sm:$0x3] }
0x16e0   :  { %v2035_v36 = vmul.f32 %v2033_v31, %v2030_v32 }
0x16e1   :  { %v2036_v42 = vmul.f32 %v2031_v62, %v2030_v32 }
0x16e3   :  { %2038 = vrot.lane.b32.xlu2 %v2036_v42, %s2370_s0 }
0x16eb   :  { %1954 = vrot.lane.b32.xlu2 %v1952_v29, %s2370_s0 }
0x16f3   :  { %1863 = vrot.lane.b32.xlu2 %v3044_v41, %s2370_s0  ;;  %v2055_v41 = vperm.slane %v2051_v13, 0 }
0x16f5   :  { %v2076_v0 = vmul.f32 %v2075_v53, %v2055_v41  ;;  %v2082_v21 = vmul.f32 %v2081_v10, %v2055_v41 }
0x16f7   :  { %v2077_v3 = vsel %vm2058_vm15, %v2076_v0, 0.0  ;;  %v2083_v25 = vsel %vm2058_vm15, %v2082_v21, 0.0 }
0x173d   :  { %v2039_v1 = vpop.permute.xlu2 %2038 }
0x173e   :  { %v2041_v47 = vadd.f32 %v2039_v1, %v2035_v36 }
0x1740   :  { %2311 = vtanh.f32 %v2041_v47 }
0x1745   :  { %v1955_v12 = vpop.permute.xlu2 %1954 }
0x1746   :  { %v2312_v48 = vpop.eup %2311  ;;  %1957 = vst.msk [vmem:[#allocation3 + $0x8] sm:$0x30] %vm799_vm11, %v1955_v12 }
0x1747   :  { %1958 = vst.msk [vmem:[#allocation3 - $0x2] sm:$0x30] %vm801_vm12, %v1955_v12  ;;  %v2043_v5 = vmul.f32 %v2312_v48, %v2031_v62 }
0x1749   :  { %2045 = vrot.lane.b32.xlu0 %v2043_v5, %s2370_s0 }
0x174d   :  { %v1864_v50 = vpop.permute.xlu2 %1863  ;;  %v2092_v2 = vld [vmem:[#allocation3 + $0xc] sm:$0x3] }
0x174e   :  { %1866 = vst.msk [vmem:[#allocation3 + $0x8] sm:$0xc] %vm706_vm9, %v1864_v50  ;;  %v2062_v51 = vld [vmem:[#allocation3 + $0x2] sm:$0x3]  ;;  %v2093_v4 = vmax.f32 %v2092_v2, 0.0 }
0x174f   :  { %1867 = vst.msk [vmem:[#allocation3 + $0x2] sm:$0xc] %vm708_vm10, %v1864_v50  ;;  %v2063_v54 = vmax.f32 %v2062_v51, 0.0 }
0x1750   :  { %v2094_v6 = vmul.f32 %v2093_v4, %v2055_v41 }
0x1751   :  { %v2064_v55 = vmul.f32 %v2063_v54, %v2055_v41 }
0x1752   :  { %v2095_v11 = vsel %vm2058_vm15, %v2094_v6, 0.0 }
0x1753   :  { %v2065_v56 = vsel %vm2058_vm15, %v2064_v55, 0.0 }
0x1754   :  { %2066 = vadd.xlane.f32.xlu1 %v2065_v56 }
0x1755   :  { %v2086_v57 = vld [vmem:[#allocation3 + $0xa] sm:$0x3] }
0x1756   :  { %v2087_v58 = vmax.f32 %v2086_v57, 0.0  ;;  %v2068_v60 = vld [vmem:[#allocation3 + $0x4] sm:$0x3] }
0x1757   :  { %v2069_v61 = vmax.f32 %v2068_v60, 0.0 }
0x1758   :  { %v2088_v45 = vmul.f32 %v2087_v58, %v2055_v41 }
0x1759   :  { %v2070_v46 = vmul.f32 %v2069_v61, %v2055_v41 }
0x175a   :  { %v2089_v63 = vsel %vm2058_vm15, %v2088_v45, 0.0 }
0x175b   :  { %v2071_v52 = vsel %vm2058_vm15, %v2070_v46, 0.0 }
0x175c   :  { %2090 = vadd.xlane.f32.xlu1 %v2089_v63  ;;  %2072 = vadd.xlane.f32.xlu2 %v2071_v52 }
0x1764   :  { %2078 = vadd.xlane.f32.xlu2 %v2077_v3 }
0x176c   :  { %2096 = vadd.xlane.f32.xlu2 %v2095_v11 }
0x1773   :  { %2084 = vadd.xlane.f32.xlu0 %v2083_v25 }
0x1775   :  { %2118 = vperm.xlu1 %2215, %v2055_v41  }
0x17bb   :  { %v2046_v28 = vpop.permute.xlu0 %2045 }
0x17bc   :  { %2048 = vst.msk [vmem:[#allocation3 + $0x8] sm:$0xc0] %vm892_vm13, %v2046_v28 }
0x17bd   :  { %2049 = vst.msk [vmem:[#allocation3 - $0x6] sm:$0xc0] %vm894_vm14, %v2046_v28 }
0x17c3   :  { %v2098_v30 = vld [vmem:[#allocation3 + $0xe] sm:$0x3] }
0x17c4   :  { %v2052_v29 = vld [vmem:[#allocation3] sm:$0x3]  ;;  %v2099_v9 = vmax.f32 %v2098_v30, 0.0 }
0x17c5   :  { %v2053_v33 = vmax.f32 %v2052_v29, 0.0 }
0x17c6   :  { %v2100_v35 = vmul.f32 %v2099_v9, %v2055_v41 }
0x17c7   :  { %v2057_v34 = vmul.f32 %v2055_v41, %v2053_v33  ;;  %v2067_v39 = vpop.xlane.xlu1 %2066 }
0x17c8   :  { %v2101_v8 = vsel %vm2058_vm15, %v2100_v35, 0.0 }
0x17c9   :  { %v2059_v37 = vsel %vm2058_vm15, %v2057_v34, 0.0 }
0x17ca   :  { %2060 = vadd.xlane.f32.xlu0 %v2059_v37 }
0x17cf   :  { %v2073_v38 = vpop.xlane.xlu2 %2072  ;;  %v2091_v43 = vpop.xlane.xlu1 %2090 }
0x17d2   :  { %2102 = vadd.xlane.f32.xlu0 %v2101_v8 }
0x17d7   :  { %v2079_v40 = vpop.xlane.xlu2 %2078 }
0x17df   :  { %v2097_v19 = vpop.xlane.xlu2 %2096 }
0x17e6   :  { %v2085_v59 = vpop.xlane.xlu0 %2084 }
0x17e7   :  { %v2119_v20 = vpop.permute.xlu1 %2118 }
0x183d   :  { %v2061_v44 = vpop.xlane.xlu0 %2060 }
0x183e   :  { %v2105_v14 = vsel %vm2104_vm0, %v2061_v44, %v2067_v39 }
0x183f   :  { %v2107_v15 = vsel %vm2106_vm1, %v2105_v14, %v2073_v38 }
0x1840   :  { %v2109_v16 = vsel %vm2108_vm3, %v2107_v15, %v2079_v40 }
0x1841   :  { %v2111_v17 = vsel %vm2110_vm4, %v2109_v16, %v2085_v59 }
0x1842   :  { %v2113_v18 = vsel %vm2112_vm5, %v2111_v17, %v2091_v43 }
0x1843   :  { %v2114_v23 = vsel %vm83_vm2, %v2113_v18, %v2097_v19 }
0x1845   :  { %v2103_v22 = vpop.xlane.xlu0 %2102 }
0x1846   :  { %v2116_v24 = vsel %vm2115_vm6, %v2114_v23, %v2103_v22 }
0x1847   :  { %v2121_v27 = vadd.f32 %v2119_v20, %v2116_v24 }
0x1849   :  { %v2122_v31 = vmax.f32 %v2121_v27, 0.0 }
0x184b   :  { %v2123_v32 = vmin.f32 %v2122_v31, 1.0 }
0x184d   :  { %2125 = vst.msk [vmem:[#allocation7] sm:$0x3] %vm2124_vm7, %v2123_v32 }
0x184e   :  { %2136 = dma.vmem_to_hbm [thread:$0]  %s2132_s19, 32, %s2134_s22, [#allocation6]  }
0x184f   :  { %2363 = dma.done.wait [#allocation6], 32  }
0x1850   :  { %2364 = vsyncadd [#allocation6], 4294967264 }
0x1851   :  { %2141 = vsyncpa [#allocation5], 1 }
0x1852   :  { %2142 = vsyncpa [#allocation6], 1 }

</bundles_post_ra>
